<compile_context>
chip_gen: v6e
topology: v6e:2x2x1
jax: 0.10.0
libtpu: 0.0.40
codegen_flags: <defaults>
</compile_context>

<pallas_src>
import math
import functools

import jax
import jax.numpy as jnp
from jax.experimental import pallas as pl
from jax.experimental.pallas import tpu as pltpu

LN_EPS = 1e-5  # torch.nn.LayerNorm default


def _layernorm(x, g, b):
    """f32 LayerNorm over the last dim. x: (N, D); g, b: (1, D)."""
    mu = jnp.mean(x, axis=-1, keepdims=True)
    var = jnp.mean((x - mu) ** 2, axis=-1, keepdims=True)
    return (x - mu) * jax.lax.rsqrt(var + LN_EPS) * g + b


def _backbone_kernel(x_ref, vecs_ref, wqkv_ref, wout_ref, wfc1_ref, wfc2_ref,
                     lnf_ref, o_ref, x_sc, *, num_heads):
    """Grid point (b, l): apply transformer block l to a tile of Bt batch elements.

    The residual stream is carried across the l axis in the (Bt*T, D) f32 scratch `x_sc`.
    At l == 0 the input tile is loaded; at l == L-1 the final LayerNorm is applied and the
    result stored to the output block (which is resident across l).
    """
    l = pl.program_id(1)
    n_layers = pl.num_programs(1)

    Bt, T, D = x_ref.shape
    NH = num_heads
    DH = D // NH
    R = Bt * T

    @pl.when(l == 0)
    def _():
        x_sc[...] = x_ref[...].reshape(R, D).astype(jnp.float32)

    x2 = x_sc[...]                                    # (R, D) f32 residual stream

    # packed per-layer vectors: rows 0..5 are D-wide, row 6 is b_fc1 (H-wide)
    ln1_g = vecs_ref[0, 0:1, :D]
    ln1_b = vecs_ref[0, 1:2, :D]
    b_out = vecs_ref[0, 2:3, :D]
    ln2_g = vecs_ref[0, 3:4, :D]
    ln2_b = vecs_ref[0, 4:5, :D]
    b_fc2 = vecs_ref[0, 5:6, :D]
    b_fc1 = vecs_ref[0, 6:7, :]

    # ---------------- attention branch: x + Attn(LN1(x)) ----------------
    h = _layernorm(x2, ln1_g, ln1_b).astype(jnp.bfloat16)
    qkv = jnp.dot(h, wqkv_ref[0], preferred_element_type=jnp.float32)     # (R, 3D) f32
    scale = 1.0 / math.sqrt(DH)
    q3 = (qkv[:, 0 * D:1 * D] * scale).astype(jnp.bfloat16).reshape(Bt, T, D)
    k3 = qkv[:, 1 * D:2 * D].astype(jnp.bfloat16).reshape(Bt, T, D)
    v3 = qkv[:, 2 * D:3 * D].astype(jnp.bfloat16).reshape(Bt, T, D)

    # causal mask, hoisted out of the head loop
    row = jax.lax.broadcasted_iota(jnp.int32, (T, T), 0)
    col = jax.lax.broadcasted_iota(jnp.int32, (T, T), 1)
    not_causal = (col > row)[None, :, :]              # (1, T, T)

    heads = []
    for n in range(NH):                               # unrolled at trace time (NH small)
        qn = q3[:, :, n * DH:(n + 1) * DH]            # (Bt, T, DH) bf16
        kn = k3[:, :, n * DH:(n + 1) * DH]
        vn = v3[:, :, n * DH:(n + 1) * DH]
        att = jnp.einsum('btd,bsd->bts', qn, kn,
                         preferred_element_type=jnp.float32)              # (Bt, T, T) f32
        att = jnp.where(not_causal, -jnp.inf, att)
        att = att - jnp.max(att, axis=-1, keepdims=True)
        p = jnp.exp(att)
        p = p * pl.reciprocal(jnp.sum(p, axis=-1, keepdims=True), approx=True)
        heads.append(jnp.einsum('bts,bsd->btd', p.astype(jnp.bfloat16), vn,
                                preferred_element_type=jnp.float32))
    y = jnp.concatenate(heads, axis=-1).reshape(R, D)                     # (R, D) f32
    y = jnp.dot(y.astype(jnp.bfloat16), wout_ref[0],
                preferred_element_type=jnp.float32) + b_out
    x2 = x2 + y

    # ---------------- mlp branch: x + MLP(LN2(x)) ----------------
    h2 = _layernorm(x2, ln2_g, ln2_b).astype(jnp.bfloat16)
    h2 = jnp.dot(h2, wfc1_ref[0], preferred_element_type=jnp.float32) + b_fc1
    h2 = jax.nn.gelu(h2, approximate=True)            # tanh GELU (see TODO above)
    h2 = jnp.dot(h2.astype(jnp.bfloat16), wfc2_ref[0],
                 preferred_element_type=jnp.float32) + b_fc2
    x2 = x2 + h2

    x_sc[...] = x2

    @pl.when(l == n_layers - 1)
    def _():
        out = _layernorm(x2, lnf_ref[0:1, :], lnf_ref[1:2, :])
        o_ref[...] = out.reshape(Bt, T, D).astype(o_ref.dtype)


def _choose_batch_tile(B, T, D, H):
    """Largest batch tile whose per-step activation footprint stays under ~16 MiB
    (safe even against v7x's 64 MiB physical VMEM), with the row count capped."""
    per_b = 4 * T * (9 * D + 2 * H + 4 * T)           # rough f32 bytes per batch element
    mem_cap = max(1, (16 * 1024 * 1024) // max(per_b, 1))
    row_cap = max(1, 4096 // max(T, 1))               # cap MXU M at ~4096 rows
    return int(max(1, min(B, mem_cap, row_cap)))


def _vmem_limit_bytes(Bt, T, D, H, wbytes):
    """Explicit scoped-VMEM budget: double-buffered layer-weight blocks + activation tiles
    + intermediates (with headroom), clamped to ~68% of physical VMEM per generation."""
    R = Bt * T
    w_layer = (3 * D * D + D * D + D * H + H * D) * wbytes + 8 * H * 4
    weights = 2 * w_layer                              # double-buffered
    io = 2 * 2 * (Bt * T * D * 4)                      # x / out blocks, double-buffered
    scratch = R * D * 4
    inter = (R * 3 * D * 6                             # qkv f32 + bf16 copies
             + 4 * Bt * T * T * 4                      # per-head score/exp/p live set
             + R * D * 4                               # concatenated head outputs
             + R * H * 6                               # fc1 activations f32 + bf16
             + 6 * R * D * 4)                          # residual / LN temporaries
    need = weights + io + scratch + inter + 8 * D * 4
    try:
        cap = int(pltpu.get_tpu_info().vmem_capacity_bytes)
    except Exception:
        cap = 64 * 1024 * 1024                         # conservative (v7x) fallback
    ceiling = int(cap * 0.68)                          # ~44 MiB on v7x, ~87 MiB on v5e/v6e
    return int(min(ceiling, max(2 * need, 32 * 1024 * 1024)))


def gpt_backbone_forward(inputs, params, num_heads):
    """Forward pass of GPT_Backbone: L stacked SelfAttentionBlocks + final LayerNorm,
    fused into one pallas_call. inputs: (B, context_length, embed_dim)."""
    B, T, D = inputs.shape
    L = params['w_qkv'].shape[0]
    H = params['w_fc1'].shape[-1]
    assert D % num_heads == 0
    wbytes = jnp.dtype(params['w_qkv'].dtype).itemsize

    Bt = _choose_batch_tile(B, T, D, H)
    nb = pl.cdiv(B, Bt)
    Bp = nb * Bt
    x = inputs if Bp == B else jnp.pad(inputs, ((0, Bp - B), (0, 0), (0, 0)))

    def wspec(shape):                                  # per-layer weight block, indexed by l
        return pl.BlockSpec(shape, lambda b, l: (l,) + (0,) * (len(shape) - 1))

    out = pl.pallas_call(
        functools.partial(_backbone_kernel, num_heads=num_heads),
        out_shape=jax.ShapeDtypeStruct((Bp, T, D), inputs.dtype),
        grid=(nb, L),
        in_specs=[
            pl.BlockSpec((Bt, T, D), lambda b, l: (b, 0, 0)),   # x tile (loaded once per b)
            wspec((1, 8, H)),                                   # packed per-layer vectors
            wspec((1, D, 3 * D)),                               # qkv weight (bias=False)
            wspec((1, D, D)),                                   # output proj weight
            wspec((1, D, H)),                                   # mlp fc1 weight
            wspec((1, H, D)),                                   # mlp fc2 weight
            pl.BlockSpec((8, D), lambda b, l: (0, 0)),          # final LN gamma/beta pack
        ],
        out_specs=pl.BlockSpec((Bt, T, D), lambda b, l: (b, 0, 0)),  # resident across l
        scratch_shapes=[pltpu.VMEM((Bt * T, D), jnp.float32)],
        compiler_params=pltpu.CompilerParams(
            dimension_semantics=("parallel", "arbitrary"),
            vmem_limit_bytes=_vmem_limit_bytes(Bt, T, D, H, wbytes)),
    )(x, params['vecs'], params['w_qkv'], params['w_out'],
      params['w_fc1'], params['w_fc2'], params['lnf'])

    return out if Bp == B else out[:B]


def init_gpt_backbone_params(key, embed_dim, num_layers, weight_dtype=jnp.bfloat16):
    """Deterministic synthetic init matching GPT_Backbone._init_weights:
    Linear weights ~ N(0, 0.02), biases = 0, LayerNorm weight = 1, bias = 0.
    Weights are stored (in, out) so the kernel computes x @ W + b (== torch x @ W.T + b),
    stacked over layers (leading L axis), kept in bf16 for the MXU.  All small per-layer
    vectors are packed into a single (L, 8, H) f32 tensor."""
    D = embed_dim
    H = 4 * D
    L = num_layers
    std = 0.02
    k1, k2, k3, k4 = jax.random.split(key, 4)

    def w(k, shape):
        return (std * jax.random.normal(k, shape, jnp.float32)).astype(weight_dtype)

    # rows: 0 ln1_g, 1 ln1_b, 2 b_out, 3 ln2_g, 4 ln2_b, 5 b_fc2 (D-wide), 6 b_fc1 (H-wide)
    vecs = jnp.zeros((L, 8, H), jnp.float32)
    vecs = vecs.at[:, 0, :D].set(1.0)                  # ln1 gamma
    vecs = vecs.at[:, 3, :D].set(1.0)                  # ln2 gamma

    lnf = jnp.zeros((8, D), jnp.float32)
    lnf = lnf.at[0, :].set(1.0)                        # final LN gamma (row 1 = beta = 0)

    return {
        'w_qkv': w(k1, (L, D, 3 * D)),                 # torch qkv Linear has bias=False
        'w_out': w(k2, (L, D, D)),
        'w_fc1': w(k3, (L, D, H)),
        'w_fc2': w(k4, (L, H, D)),
        'vecs': vecs,
        'lnf': lnf,
    }


if __name__ == "__main__":
    # small config consistent with GPT_Backbone(embed_dim, context_length, ...);
    # embed_dim kept lane-dense (multiple of 128) per the perf review.
    B = 4
    embed_dim = 128
    context_length = 16
    num_layers = 2
    num_heads = 4

    key = jax.random.PRNGKey(0)
    pkey, xkey = jax.random.split(key)
    params = init_gpt_backbone_params(pkey, embed_dim, num_layers)
    x = jax.random.normal(xkey, (B, context_length, embed_dim), jnp.float32)

    fwd = jax.jit(functools.partial(gpt_backbone_forward, num_heads=num_heads))
    out = fwd(x, params)
    jax.block_until_ready(out)
    assert out.shape == (B, context_length, embed_dim)
    assert bool(jnp.all(jnp.isfinite(out)))
    print("KERNEL_OK")
</pallas_src>

<mosaic_0001>
module attributes {stable_mosaic.version = 11 : i64} {
  func.func @_backbone_kernel(%arg0: i32, %arg1: i32, %arg2: memref<4x16x128xf32, #tpu.memory_space<vmem>>, %arg3: memref<1x8x512xf32, #tpu.memory_space<vmem>>, %arg4: memref<1x128x384xbf16, #tpu.memory_space<vmem>>, %arg5: memref<1x128x128xbf16, #tpu.memory_space<vmem>>, %arg6: memref<1x128x512xbf16, #tpu.memory_space<vmem>>, %arg7: memref<1x512x128xbf16, #tpu.memory_space<vmem>>, %arg8: memref<8x128xf32, #tpu.memory_space<vmem>>, %arg9: memref<4x16x128xf32, #tpu.memory_space<vmem>>, %arg10: memref<64x128xf32, #tpu.memory_space<vmem>>) attributes {dimension_semantics = [#tpu.dimension_semantics<parallel>, #tpu.dimension_semantics<arbitrary>], iteration_bounds = array<i64: 1, 2>, scalar_prefetch = 0 : i64, scratch_operands = 1 : i64, tpu.core_type = #tpu.core_type<tc>, window_params = [{transform_indices = @transform_0, window_bounds = array<i64: 4, 16, 128>}, {transform_indices = @transform_1, window_bounds = array<i64: 1, 8, 512>}, {transform_indices = @transform_2, window_bounds = array<i64: 1, 128, 384>}, {transform_indices = @transform_3, window_bounds = array<i64: 1, 128, 128>}, {transform_indices = @transform_4, window_bounds = array<i64: 1, 128, 512>}, {transform_indices = @transform_5, window_bounds = array<i64: 1, 512, 128>}, {pipeline_mode = #tpu.pipeline_mode<synchronous>, transform_indices = @transform_6, window_bounds = array<i64: 8, 128>}, {transform_indices = @transform_7, window_bounds = array<i64: 4, 16, 128>}]} {
    %c0_i32 = arith.constant 0 : i32
    %0 = arith.cmpi eq, %arg1, %c0_i32 : i32
    %1 = arith.extui %0 : i1 to i32
    %c0_i32_0 = arith.constant 0 : i32
    %2 = arith.cmpi ne, %1, %c0_i32_0 : i32
    scf.if %2 {
      %c0_70 = arith.constant 0 : index
      %c0_71 = arith.constant 0 : index
      %c0_72 = arith.constant 0 : index
      %200 = vector.load %arg2[%c0_70, %c0_71, %c0_72] : memref<4x16x128xf32, #tpu.memory_space<vmem>>, vector<4x16x128xf32>
      %201 = vector.shape_cast %200 : vector<4x16x128xf32> to vector<64x128xf32>
      %c0_73 = arith.constant 0 : index
      %c0_74 = arith.constant 0 : index
      %202 = vector.load %arg10[%c0_73, %c0_74] : memref<64x128xf32, #tpu.memory_space<vmem>>, vector<64x128xf32>
      tpu.vector_store %arg10[%c0_73, %c0_74], %201 {strides = array<i32>} : memref<64x128xf32, #tpu.memory_space<vmem>>, vector<64x128xf32>,
    } else {
    }
    %c0 = arith.constant 0 : index
    %c0_1 = arith.constant 0 : index
    %3 = vector.load %arg10[%c0, %c0_1] : memref<64x128xf32, #tpu.memory_space<vmem>>, vector<64x128xf32>
    %c0_2 = arith.constant 0 : index
    %c0_3 = arith.constant 0 : index
    %c0_4 = arith.constant 0 : index
    %4 = vector.load %arg3[%c0_2, %c0_3, %c0_4] : memref<1x8x512xf32, #tpu.memory_space<vmem>>, vector<1x1x128xf32>
    %5 = vector.shape_cast %4 : vector<1x1x128xf32> to vector<1x128xf32>
    %c0_5 = arith.constant 0 : index
    %c1 = arith.constant 1 : index
    %c0_6 = arith.constant 0 : index
    %6 = vector.load %arg3[%c0_5, %c1, %c0_6] : memref<1x8x512xf32, #tpu.memory_space<vmem>>, vector<1x1x128xf32>
    %7 = vector.shape_cast %6 : vector<1x1x128xf32> to vector<1x128xf32>
    %c0_7 = arith.constant 0 : index
    %c2 = arith.constant 2 : index
    %c0_8 = arith.constant 0 : index
    %8 = vector.load %arg3[%c0_7, %c2, %c0_8] : memref<1x8x512xf32, #tpu.memory_space<vmem>>, vector<1x1x128xf32>
    %9 = vector.shape_cast %8 : vector<1x1x128xf32> to vector<1x128xf32>
    %c0_9 = arith.constant 0 : index
    %c3 = arith.constant 3 : index
    %c0_10 = arith.constant 0 : index
    %10 = vector.load %arg3[%c0_9, %c3, %c0_10] : memref<1x8x512xf32, #tpu.memory_space<vmem>>, vector<1x1x128xf32>
    %11 = vector.shape_cast %10 : vector<1x1x128xf32> to vector<1x128xf32>
    %c0_11 = arith.constant 0 : index
    %c4 = arith.constant 4 : index
    %c0_12 = arith.constant 0 : index
    %12 = vector.load %arg3[%c0_11, %c4, %c0_12] : memref<1x8x512xf32, #tpu.memory_space<vmem>>, vector<1x1x128xf32>
    %13 = vector.shape_cast %12 : vector<1x1x128xf32> to vector<1x128xf32>
    %c0_13 = arith.constant 0 : index
    %c5 = arith.constant 5 : index
    %c0_14 = arith.constant 0 : index
    %14 = vector.load %arg3[%c0_13, %c5, %c0_14] : memref<1x8x512xf32, #tpu.memory_space<vmem>>, vector<1x1x128xf32>
    %15 = vector.shape_cast %14 : vector<1x1x128xf32> to vector<1x128xf32>
    %c0_15 = arith.constant 0 : index
    %c6 = arith.constant 6 : index
    %c0_16 = arith.constant 0 : index
    %16 = vector.load %arg3[%c0_15, %c6, %c0_16] : memref<1x8x512xf32, #tpu.memory_space<vmem>>, vector<1x1x512xf32>
    %17 = vector.shape_cast %16 : vector<1x1x512xf32> to vector<1x512xf32>
    %cst = arith.constant dense<0.000000e+00> : vector<64xf32>
    %18 = vector.multi_reduction <add>, %3, %cst [1] : vector<64x128xf32> to vector<64xf32>
    %19 = vector.shape_cast %18 : vector<64xf32> to vector<64x1xf32>
    %cst_17 = arith.constant 1.280000e+02 : f32
    %20 = vector.broadcast %cst_17 : f32 to vector<64x1xf32>
    %21 = arith.divf %19, %20 : vector<64x1xf32>
    %22 = vector.broadcast %21 : vector<64x1xf32> to vector<64x128xf32>
    %23 = arith.subf %3, %22 : vector<64x128xf32>
    %24 = arith.mulf %23, %23 : vector<64x128xf32>
    %cst_18 = arith.constant dense<0.000000e+00> : vector<64xf32>
    %25 = vector.multi_reduction <add>, %24, %cst_18 [1] : vector<64x128xf32> to vector<64xf32>
    %26 = vector.shape_cast %25 : vector<64xf32> to vector<64x1xf32>
    %cst_19 = arith.constant 1.280000e+02 : f32
    %27 = vector.broadcast %cst_19 : f32 to vector<64x1xf32>
    %28 = arith.divf %26, %27 : vector<64x1xf32>
    %29 = vector.broadcast %21 : vector<64x1xf32> to vector<64x128xf32>
    %30 = arith.subf %3, %29 : vector<64x128xf32>
    %cst_20 = arith.constant 9.99999974E-6 : f32
    %31 = vector.broadcast %cst_20 : f32 to vector<64x1xf32>
    %32 = arith.addf %28, %31 : vector<64x1xf32>
    %33 = math.rsqrt %32 : vector<64x1xf32>
    %34 = vector.broadcast %33 : vector<64x1xf32> to vector<64x128xf32>
    %35 = arith.mulf %30, %34 : vector<64x128xf32>
    %36 = vector.broadcast %5 : vector<1x128xf32> to vector<64x128xf32>
    %37 = arith.mulf %35, %36 : vector<64x128xf32>
    %38 = vector.broadcast %7 : vector<1x128xf32> to vector<64x128xf32>
    %39 = arith.addf %37, %38 : vector<64x128xf32>
    %40 = arith.truncf %39 : vector<64x128xf32> to vector<64x128xbf16>
    %c0_21 = arith.constant 0 : index
    %c0_22 = arith.constant 0 : index
    %c0_23 = arith.constant 0 : index
    %41 = vector.load %arg4[%c0_21, %c0_22, %c0_23] : memref<1x128x384xbf16, #tpu.memory_space<vmem>>, vector<1x128x384xbf16>
    %42 = vector.shape_cast %41 : vector<1x128x384xbf16> to vector<128x384xbf16>
    %cst_24 = arith.constant dense<0.000000e+00> : vector<64x384xf32>
    %43 = tpu.matmul %40, %42, %cst_24 {dimension_numbers = #tpu.dot_dimension_numbers<[1], [0], [0], [1], [0, 0, 1, 1], [], []>} : vector<64x128xbf16>, vector<128x384xbf16>, vector<64x384xf32> -> vector<64x384xf32>
    %44 = vector.extract_strided_slice %43 {offsets = [0, 0], sizes = [64, 128], strides = [1, 1]} : vector<64x384xf32> to vector<64x128xf32>
    %cst_25 = arith.constant 0.176776692 : f32
    %45 = vector.broadcast %cst_25 : f32 to vector<64x128xf32>
    %46 = arith.mulf %44, %45 : vector<64x128xf32>
    %47 = arith.truncf %46 : vector<64x128xf32> to vector<64x128xbf16>
    %48 = vector.shape_cast %47 : vector<64x128xbf16> to vector<4x16x128xbf16>
    %49 = vector.extract_strided_slice %43 {offsets = [0, 128], sizes = [64, 128], strides = [1, 1]} : vector<64x384xf32> to vector<64x128xf32>
    %50 = arith.truncf %49 : vector<64x128xf32> to vector<64x128xbf16>
    %51 = vector.shape_cast %50 : vector<64x128xbf16> to vector<4x16x128xbf16>
    %52 = vector.extract_strided_slice %43 {offsets = [0, 256], sizes = [64, 128], strides = [1, 1]} : vector<64x384xf32> to vector<64x128xf32>
    %53 = arith.truncf %52 : vector<64x128xf32> to vector<64x128xbf16>
    %54 = vector.shape_cast %53 : vector<64x128xbf16> to vector<4x16x128xbf16>
    %55 = tpu.iota {dimensions = array<i32: 0>} : vector<16x16xi32>
    %56 = tpu.iota {dimensions = array<i32: 1>} : vector<16x16xi32>
    %57 = arith.cmpi sgt, %56, %55 : vector<16x16xi32>
    %58 = vector.shape_cast %57 : vector<16x16xi1> to vector<1x16x16xi1>
    %59 = vector.extract_strided_slice %48 {offsets = [0, 0, 0], sizes = [4, 16, 32], strides = [1, 1, 1]} : vector<4x16x128xbf16> to vector<4x16x32xbf16>
    %60 = vector.extract_strided_slice %51 {offsets = [0, 0, 0], sizes = [4, 16, 32], strides = [1, 1, 1]} : vector<4x16x128xbf16> to vector<4x16x32xbf16>
    %61 = vector.extract_strided_slice %54 {offsets = [0, 0, 0], sizes = [4, 16, 32], strides = [1, 1, 1]} : vector<4x16x128xbf16> to vector<4x16x32xbf16>
    "tpu.trace_start"() <{level = 10 : i32, message = "btd,bsd->bts"}> : () -> ()
    %cst_26 = arith.constant dense<0.000000e+00> : vector<4x16x16xf32>
    %62 = tpu.matmul %59, %60, %cst_26 {dimension_numbers = #tpu.dot_dimension_numbers<[2], [2], [1], [1], [0, 0, 0, 1, 1, 1], [0], [0]>} : vector<4x16x32xbf16>, vector<4x16x32xbf16>, vector<4x16x16xf32> -> vector<4x16x16xf32>
    %cst_27 = arith.constant 0xFF800000 : f32
    "tpu.trace_stop"() : () -> ()
    %63 = vector.shape_cast %58 : vector<1x16x16xi1> to vector<1x16x16xi1>
    %64 = vector.broadcast %63 : vector<1x16x16xi1> to vector<4x16x16xi1>
    %65 = vector.broadcast %cst_27 : f32 to vector<4x16x16xf32>
    %66 = arith.select %64, %65, %62 : vector<4x16x16xi1>, vector<4x16x16xf32>
    %cst_28 = arith.constant dense<0xFF800000> : vector<4x16xf32>
    %67 = vector.multi_reduction <maximumf>, %66, %cst_28 [2] : vector<4x16x16xf32> to vector<4x16xf32>
    %68 = vector.shape_cast %67 : vector<4x16xf32> to vector<4x16x1xf32>
    %69 = vector.broadcast %68 : vector<4x16x1xf32> to vector<4x16x16xf32>
    %70 = arith.subf %66, %69 : vector<4x16x16xf32>
    %71 = math.exp %70 : vector<4x16x16xf32>
    %cst_29 = arith.constant dense<0.000000e+00> : vector<4x16xf32>
    %72 = vector.multi_reduction <add>, %71, %cst_29 [2] : vector<4x16x16xf32> to vector<4x16xf32>
    %73 = vector.shape_cast %72 : vector<4x16xf32> to vector<4x16x1xf32>
    %74 = tpu.reciprocal %73 {approx = true} : vector<4x16x1xf32> -> vector<4x16x1xf32>
    %75 = vector.broadcast %74 : vector<4x16x1xf32> to vector<4x16x16xf32>
    %76 = arith.mulf %71, %75 : vector<4x16x16xf32>
    %77 = arith.truncf %76 : vector<4x16x16xf32> to vector<4x16x16xbf16>
    "tpu.trace_start"() <{level = 10 : i32, message = "bts,bsd->btd"}> : () -> ()
    %cst_30 = arith.constant dense<0.000000e+00> : vector<4x16x32xf32>
    %78 = tpu.matmul %77, %61, %cst_30 {dimension_numbers = #tpu.dot_dimension_numbers<[2], [1], [1], [2], [0, 0, 0, 1, 1, 2], [0], [0]>} : vector<4x16x16xbf16>, vector<4x16x32xbf16>, vector<4x16x32xf32> -> vector<4x16x32xf32>
    "tpu.trace_stop"() : () -> ()
    %79 = vector.extract_strided_slice %48 {offsets = [0, 0, 32], sizes = [4, 16, 32], strides = [1, 1, 1]} : vector<4x16x128xbf16> to vector<4x16x32xbf16>
    %80 = vector.extract_strided_slice %51 {offsets = [0, 0, 32], sizes = [4, 16, 32], strides = [1, 1, 1]} : vector<4x16x128xbf16> to vector<4x16x32xbf16>
    %81 = vector.extract_strided_slice %54 {offsets = [0, 0, 32], sizes = [4, 16, 32], strides = [1, 1, 1]} : vector<4x16x128xbf16> to vector<4x16x32xbf16>
    "tpu.trace_start"() <{level = 10 : i32, message = "btd,bsd->bts"}> : () -> ()
    %cst_31 = arith.constant dense<0.000000e+00> : vector<4x16x16xf32>
    %82 = tpu.matmul %79, %80, %cst_31 {dimension_numbers = #tpu.dot_dimension_numbers<[2], [2], [1], [1], [0, 0, 0, 1, 1, 1], [0], [0]>} : vector<4x16x32xbf16>, vector<4x16x32xbf16>, vector<4x16x16xf32> -> vector<4x16x16xf32>
    %cst_32 = arith.constant 0xFF800000 : f32
    "tpu.trace_stop"() : () -> ()
    %83 = vector.shape_cast %58 : vector<1x16x16xi1> to vector<1x16x16xi1>
    %84 = vector.broadcast %83 : vector<1x16x16xi1> to vector<4x16x16xi1>
    %85 = vector.broadcast %cst_32 : f32 to vector<4x16x16xf32>
    %86 = arith.select %84, %85, %82 : vector<4x16x16xi1>, vector<4x16x16xf32>
    %cst_33 = arith.constant dense<0xFF800000> : vector<4x16xf32>
    %87 = vector.multi_reduction <maximumf>, %86, %cst_33 [2] : vector<4x16x16xf32> to vector<4x16xf32>
    %88 = vector.shape_cast %87 : vector<4x16xf32> to vector<4x16x1xf32>
    %89 = vector.broadcast %88 : vector<4x16x1xf32> to vector<4x16x16xf32>
    %90 = arith.subf %86, %89 : vector<4x16x16xf32>
    %91 = math.exp %90 : vector<4x16x16xf32>
    %cst_34 = arith.constant dense<0.000000e+00> : vector<4x16xf32>
    %92 = vector.multi_reduction <add>, %91, %cst_34 [2] : vector<4x16x16xf32> to vector<4x16xf32>
    %93 = vector.shape_cast %92 : vector<4x16xf32> to vector<4x16x1xf32>
    %94 = tpu.reciprocal %93 {approx = true} : vector<4x16x1xf32> -> vector<4x16x1xf32>
    %95 = vector.broadcast %94 : vector<4x16x1xf32> to vector<4x16x16xf32>
    %96 = arith.mulf %91, %95 : vector<4x16x16xf32>
    %97 = arith.truncf %96 : vector<4x16x16xf32> to vector<4x16x16xbf16>
    "tpu.trace_start"() <{level = 10 : i32, message = "bts,bsd->btd"}> : () -> ()
    %cst_35 = arith.constant dense<0.000000e+00> : vector<4x16x32xf32>
    %98 = tpu.matmul %97, %81, %cst_35 {dimension_numbers = #tpu.dot_dimension_numbers<[2], [1], [1], [2], [0, 0, 0, 1, 1, 2], [0], [0]>} : vector<4x16x16xbf16>, vector<4x16x32xbf16>, vector<4x16x32xf32> -> vector<4x16x32xf32>
    "tpu.trace_stop"() : () -> ()
    %99 = vector.extract_strided_slice %48 {offsets = [0, 0, 64], sizes = [4, 16, 32], strides = [1, 1, 1]} : vector<4x16x128xbf16> to vector<4x16x32xbf16>
    %100 = vector.extract_strided_slice %51 {offsets = [0, 0, 64], sizes = [4, 16, 32], strides = [1, 1, 1]} : vector<4x16x128xbf16> to vector<4x16x32xbf16>
    %101 = vector.extract_strided_slice %54 {offsets = [0, 0, 64], sizes = [4, 16, 32], strides = [1, 1, 1]} : vector<4x16x128xbf16> to vector<4x16x32xbf16>
    "tpu.trace_start"() <{level = 10 : i32, message = "btd,bsd->bts"}> : () -> ()
    %cst_36 = arith.constant dense<0.000000e+00> : vector<4x16x16xf32>
    %102 = tpu.matmul %99, %100, %cst_36 {dimension_numbers = #tpu.dot_dimension_numbers<[2], [2], [1], [1], [0, 0, 0, 1, 1, 1], [0], [0]>} : vector<4x16x32xbf16>, vector<4x16x32xbf16>, vector<4x16x16xf32> -> vector<4x16x16xf32>
    %cst_37 = arith.constant 0xFF800000 : f32
    "tpu.trace_stop"() : () -> ()
    %103 = vector.shape_cast %58 : vector<1x16x16xi1> to vector<1x16x16xi1>
    %104 = vector.broadcast %103 : vector<1x16x16xi1> to vector<4x16x16xi1>
    %105 = vector.broadcast %cst_37 : f32 to vector<4x16x16xf32>
    %106 = arith.select %104, %105, %102 : vector<4x16x16xi1>, vector<4x16x16xf32>
    %cst_38 = arith.constant dense<0xFF800000> : vector<4x16xf32>
    %107 = vector.multi_reduction <maximumf>, %106, %cst_38 [2] : vector<4x16x16xf32> to vector<4x16xf32>
    %108 = vector.shape_cast %107 : vector<4x16xf32> to vector<4x16x1xf32>
    %109 = vector.broadcast %108 : vector<4x16x1xf32> to vector<4x16x16xf32>
    %110 = arith.subf %106, %109 : vector<4x16x16xf32>
    %111 = math.exp %110 : vector<4x16x16xf32>
    %cst_39 = arith.constant dense<0.000000e+00> : vector<4x16xf32>
    %112 = vector.multi_reduction <add>, %111, %cst_39 [2] : vector<4x16x16xf32> to vector<4x16xf32>
    %113 = vector.shape_cast %112 : vector<4x16xf32> to vector<4x16x1xf32>
    %114 = tpu.reciprocal %113 {approx = true} : vector<4x16x1xf32> -> vector<4x16x1xf32>
    %115 = vector.broadcast %114 : vector<4x16x1xf32> to vector<4x16x16xf32>
    %116 = arith.mulf %111, %115 : vector<4x16x16xf32>
    %117 = arith.truncf %116 : vector<4x16x16xf32> to vector<4x16x16xbf16>
    "tpu.trace_start"() <{level = 10 : i32, message = "bts,bsd->btd"}> : () -> ()
    %cst_40 = arith.constant dense<0.000000e+00> : vector<4x16x32xf32>
    %118 = tpu.matmul %117, %101, %cst_40 {dimension_numbers = #tpu.dot_dimension_numbers<[2], [1], [1], [2], [0, 0, 0, 1, 1, 2], [0], [0]>} : vector<4x16x16xbf16>, vector<4x16x32xbf16>, vector<4x16x32xf32> -> vector<4x16x32xf32>
    "tpu.trace_stop"() : () -> ()
    %119 = vector.extract_strided_slice %48 {offsets = [0, 0, 96], sizes = [4, 16, 32], strides = [1, 1, 1]} : vector<4x16x128xbf16> to vector<4x16x32xbf16>
    %120 = vector.extract_strided_slice %51 {offsets = [0, 0, 96], sizes = [4, 16, 32], strides = [1, 1, 1]} : vector<4x16x128xbf16> to vector<4x16x32xbf16>
    %121 = vector.extract_strided_slice %54 {offsets = [0, 0, 96], sizes = [4, 16, 32], strides = [1, 1, 1]} : vector<4x16x128xbf16> to vector<4x16x32xbf16>
    "tpu.trace_start"() <{level = 10 : i32, message = "btd,bsd->bts"}> : () -> ()
    %cst_41 = arith.constant dense<0.000000e+00> : vector<4x16x16xf32>
    %122 = tpu.matmul %119, %120, %cst_41 {dimension_numbers = #tpu.dot_dimension_numbers<[2], [2], [1], [1], [0, 0, 0, 1, 1, 1], [0], [0]>} : vector<4x16x32xbf16>, vector<4x16x32xbf16>, vector<4x16x16xf32> -> vector<4x16x16xf32>
    %cst_42 = arith.constant 0xFF800000 : f32
    "tpu.trace_stop"() : () -> ()
    %123 = vector.shape_cast %58 : vector<1x16x16xi1> to vector<1x16x16xi1>
    %124 = vector.broadcast %123 : vector<1x16x16xi1> to vector<4x16x16xi1>
    %125 = vector.broadcast %cst_42 : f32 to vector<4x16x16xf32>
    %126 = arith.select %124, %125, %122 : vector<4x16x16xi1>, vector<4x16x16xf32>
    %cst_43 = arith.constant dense<0xFF800000> : vector<4x16xf32>
    %127 = vector.multi_reduction <maximumf>, %126, %cst_43 [2] : vector<4x16x16xf32> to vector<4x16xf32>
    %128 = vector.shape_cast %127 : vector<4x16xf32> to vector<4x16x1xf32>
    %129 = vector.broadcast %128 : vector<4x16x1xf32> to vector<4x16x16xf32>
    %130 = arith.subf %126, %129 : vector<4x16x16xf32>
    %131 = math.exp %130 : vector<4x16x16xf32>
    %cst_44 = arith.constant dense<0.000000e+00> : vector<4x16xf32>
    %132 = vector.multi_reduction <add>, %131, %cst_44 [2] : vector<4x16x16xf32> to vector<4x16xf32>
    %133 = vector.shape_cast %132 : vector<4x16xf32> to vector<4x16x1xf32>
    %134 = tpu.reciprocal %133 {approx = true} : vector<4x16x1xf32> -> vector<4x16x1xf32>
    %135 = vector.broadcast %134 : vector<4x16x1xf32> to vector<4x16x16xf32>
    %136 = arith.mulf %131, %135 : vector<4x16x16xf32>
    %137 = arith.truncf %136 : vector<4x16x16xf32> to vector<4x16x16xbf16>
    "tpu.trace_start"() <{level = 10 : i32, message = "bts,bsd->btd"}> : () -> ()
    %cst_45 = arith.constant dense<0.000000e+00> : vector<4x16x32xf32>
    %138 = tpu.matmul %137, %121, %cst_45 {dimension_numbers = #tpu.dot_dimension_numbers<[2], [1], [1], [2], [0, 0, 0, 1, 1, 2], [0], [0]>} : vector<4x16x16xbf16>, vector<4x16x32xbf16>, vector<4x16x32xf32> -> vector<4x16x32xf32>
    "tpu.trace_stop"() : () -> ()
    %139 = tpu.concatenate %78, %98, %118, %138 in 2 : vector<4x16x32xf32>, vector<4x16x32xf32>, vector<4x16x32xf32>, vector<4x16x32xf32> -> vector<4x16x128xf32>
    %140 = vector.shape_cast %139 : vector<4x16x128xf32> to vector<64x128xf32>
    %141 = arith.truncf %140 : vector<64x128xf32> to vector<64x128xbf16>
    %c0_46 = arith.constant 0 : index
    %c0_47 = arith.constant 0 : index
    %c0_48 = arith.constant 0 : index
    %142 = vector.load %arg5[%c0_46, %c0_47, %c0_48] : memref<1x128x128xbf16, #tpu.memory_space<vmem>>, vector<1x128x128xbf16>
    %143 = vector.shape_cast %142 : vector<1x128x128xbf16> to vector<128x128xbf16>
    %cst_49 = arith.constant dense<0.000000e+00> : vector<64x128xf32>
    %144 = tpu.matmul %141, %143, %cst_49 {dimension_numbers = #tpu.dot_dimension_numbers<[1], [0], [0], [1], [0, 0, 1, 1], [], []>} : vector<64x128xbf16>, vector<128x128xbf16>, vector<64x128xf32> -> vector<64x128xf32>
    %145 = vector.broadcast %9 : vector<1x128xf32> to vector<64x128xf32>
    %146 = arith.addf %144, %145 : vector<64x128xf32>
    %147 = arith.addf %3, %146 : vector<64x128xf32>
    %cst_50 = arith.constant dense<0.000000e+00> : vector<64xf32>
    %148 = vector.multi_reduction <add>, %147, %cst_50 [1] : vector<64x128xf32> to vector<64xf32>
    %149 = vector.shape_cast %148 : vector<64xf32> to vector<64x1xf32>
    %cst_51 = arith.constant 1.280000e+02 : f32
    %150 = vector.broadcast %cst_51 : f32 to vector<64x1xf32>
    %151 = arith.divf %149, %150 : vector<64x1xf32>
    %152 = vector.broadcast %151 : vector<64x1xf32> to vector<64x128xf32>
    %153 = arith.subf %147, %152 : vector<64x128xf32>
    %154 = arith.mulf %153, %153 : vector<64x128xf32>
    %cst_52 = arith.constant dense<0.000000e+00> : vector<64xf32>
    %155 = vector.multi_reduction <add>, %154, %cst_52 [1] : vector<64x128xf32> to vector<64xf32>
    %156 = vector.shape_cast %155 : vector<64xf32> to vector<64x1xf32>
    %cst_53 = arith.constant 1.280000e+02 : f32
    %157 = vector.broadcast %cst_53 : f32 to vector<64x1xf32>
    %158 = arith.divf %156, %157 : vector<64x1xf32>
    %159 = vector.broadcast %151 : vector<64x1xf32> to vector<64x128xf32>
    %160 = arith.subf %147, %159 : vector<64x128xf32>
    %cst_54 = arith.constant 9.99999974E-6 : f32
    %161 = vector.broadcast %cst_54 : f32 to vector<64x1xf32>
    %162 = arith.addf %158, %161 : vector<64x1xf32>
    %163 = math.rsqrt %162 : vector<64x1xf32>
    %164 = vector.broadcast %163 : vector<64x1xf32> to vector<64x128xf32>
    %165 = arith.mulf %160, %164 : vector<64x128xf32>
    %166 = vector.broadcast %11 : vector<1x128xf32> to vector<64x128xf32>
    %167 = arith.mulf %165, %166 : vector<64x128xf32>
    %168 = vector.broadcast %13 : vector<1x128xf32> to vector<64x128xf32>
    %169 = arith.addf %167, %168 : vector<64x128xf32>
    %170 = arith.truncf %169 : vector<64x128xf32> to vector<64x128xbf16>
    %c0_55 = arith.constant 0 : index
    %c0_56 = arith.constant 0 : index
    %c0_57 = arith.constant 0 : index
    %171 = vector.load %arg6[%c0_55, %c0_56, %c0_57] : memref<1x128x512xbf16, #tpu.memory_space<vmem>>, vector<1x128x512xbf16>
    %172 = vector.shape_cast %171 : vector<1x128x512xbf16> to vector<128x512xbf16>
    %cst_58 = arith.constant dense<0.000000e+00> : vector<64x512xf32>
    %173 = tpu.matmul %170, %172, %cst_58 {dimension_numbers = #tpu.dot_dimension_numbers<[1], [0], [0], [1], [0, 0, 1, 1], [], []>} : vector<64x128xbf16>, vector<128x512xbf16>, vector<64x512xf32> -> vector<64x512xf32>
    %174 = vector.broadcast %17 : vector<1x512xf32> to vector<64x512xf32>
    %175 = arith.addf %173, %174 : vector<64x512xf32>
    %176 = arith.mulf %175, %175 : vector<64x512xf32>
    %177 = arith.mulf %175, %176 : vector<64x512xf32>
    %cst_59 = arith.constant 4.471500e-02 : f32
    %178 = vector.broadcast %cst_59 : f32 to vector<64x512xf32>
    %179 = arith.mulf %178, %177 : vector<64x512xf32>
    %180 = arith.addf %175, %179 : vector<64x512xf32>
    %cst_60 = arith.constant 0.797884583 : f32
    %181 = vector.broadcast %cst_60 : f32 to vector<64x512xf32>
    %182 = arith.mulf %181, %180 : vector<64x512xf32>
    %183 = math.tanh %182 : vector<64x512xf32>
    %cst_61 = arith.constant 1.000000e+00 : f32
    %184 = vector.broadcast %cst_61 : f32 to vector<64x512xf32>
    %185 = arith.addf %184, %183 : vector<64x512xf32>
    %cst_62 = arith.constant 5.000000e-01 : f32
    %186 = vector.broadcast %cst_62 : f32 to vector<64x512xf32>
    %187 = arith.mulf %186, %185 : vector<64x512xf32>
    %188 = arith.mulf %175, %187 : vector<64x512xf32>
    %189 = arith.truncf %188 : vector<64x512xf32> to vector<64x512xbf16>
    %c0_63 = arith.constant 0 : index
    %c0_64 = arith.constant 0 : index
    %c0_65 = arith.constant 0 : index
    %190 = vector.load %arg7[%c0_63, %c0_64, %c0_65] : memref<1x512x128xbf16, #tpu.memory_space<vmem>>, vector<1x512x128xbf16>
    %191 = vector.shape_cast %190 : vector<1x512x128xbf16> to vector<512x128xbf16>
    %cst_66 = arith.constant dense<0.000000e+00> : vector<64x128xf32>
    %192 = tpu.matmul %189, %191, %cst_66 {dimension_numbers = #tpu.dot_dimension_numbers<[1], [0], [0], [1], [0, 0, 1, 1], [], []>} : vector<64x512xbf16>, vector<512x128xbf16>, vector<64x128xf32> -> vector<64x128xf32>
    %193 = vector.broadcast %15 : vector<1x128xf32> to vector<64x128xf32>
    %194 = arith.addf %192, %193 : vector<64x128xf32>
    %195 = arith.addf %147, %194 : vector<64x128xf32>
    %c0_67 = arith.constant 0 : index
    %c0_68 = arith.constant 0 : index
    %196 = vector.load %arg10[%c0_67, %c0_68] : memref<64x128xf32, #tpu.memory_space<vmem>>, vector<64x128xf32>
    tpu.vector_store %arg10[%c0_67, %c0_68], %195 {strides = array<i32>} : memref<64x128xf32, #tpu.memory_space<vmem>>, vector<64x128xf32>,
    %c1_i32 = arith.constant 1 : i32
    %197 = arith.cmpi eq, %arg1, %c1_i32 : i32
    %198 = arith.extui %197 : i1 to i32
    %c0_i32_69 = arith.constant 0 : i32
    %199 = arith.cmpi ne, %198, %c0_i32_69 : i32
    scf.if %199 {
      %c0_70 = arith.constant 0 : index
      %c0_71 = arith.constant 0 : index
      %200 = vector.load %arg8[%c0_70, %c0_71] : memref<8x128xf32, #tpu.memory_space<vmem>>, vector<1x128xf32>
      %c1_72 = arith.constant 1 : index
      %c0_73 = arith.constant 0 : index
      %201 = vector.load %arg8[%c1_72, %c0_73] : memref<8x128xf32, #tpu.memory_space<vmem>>, vector<1x128xf32>
      %cst_74 = arith.constant dense<0.000000e+00> : vector<64xf32>
      %202 = vector.multi_reduction <add>, %195, %cst_74 [1] : vector<64x128xf32> to vector<64xf32>
      %203 = vector.shape_cast %202 : vector<64xf32> to vector<64x1xf32>
      %cst_75 = arith.constant 1.280000e+02 : f32
      %204 = vector.broadcast %cst_75 : f32 to vector<64x1xf32>
      %205 = arith.divf %203, %204 : vector<64x1xf32>
      %206 = vector.broadcast %205 : vector<64x1xf32> to vector<64x128xf32>
      %207 = arith.subf %195, %206 : vector<64x128xf32>
      %208 = arith.mulf %207, %207 : vector<64x128xf32>
      %cst_76 = arith.constant dense<0.000000e+00> : vector<64xf32>
      %209 = vector.multi_reduction <add>, %208, %cst_76 [1] : vector<64x128xf32> to vector<64xf32>
      %210 = vector.shape_cast %209 : vector<64xf32> to vector<64x1xf32>
      %cst_77 = arith.constant 1.280000e+02 : f32
      %211 = vector.broadcast %cst_77 : f32 to vector<64x1xf32>
      %212 = arith.divf %210, %211 : vector<64x1xf32>
      %213 = vector.broadcast %205 : vector<64x1xf32> to vector<64x128xf32>
      %214 = arith.subf %195, %213 : vector<64x128xf32>
      %cst_78 = arith.constant 9.99999974E-6 : f32
      %215 = vector.broadcast %cst_78 : f32 to vector<64x1xf32>
      %216 = arith.addf %212, %215 : vector<64x1xf32>
      %217 = math.rsqrt %216 : vector<64x1xf32>
      %218 = vector.broadcast %217 : vector<64x1xf32> to vector<64x128xf32>
      %219 = arith.mulf %214, %218 : vector<64x128xf32>
      %220 = vector.broadcast %200 : vector<1x128xf32> to vector<64x128xf32>
      %221 = arith.mulf %219, %220 : vector<64x128xf32>
      %222 = vector.broadcast %201 : vector<1x128xf32> to vector<64x128xf32>
      %223 = arith.addf %221, %222 : vector<64x128xf32>
      %224 = vector.shape_cast %223 : vector<64x128xf32> to vector<4x16x128xf32>
      %c0_79 = arith.constant 0 : index
      %c0_80 = arith.constant 0 : index
      %c0_81 = arith.constant 0 : index
      %225 = vector.load %arg9[%c0_79, %c0_80, %c0_81] : memref<4x16x128xf32, #tpu.memory_space<vmem>>, vector<4x16x128xf32>
      tpu.vector_store %arg9[%c0_79, %c0_80, %c0_81], %224 {strides = array<i32>} : memref<4x16x128xf32, #tpu.memory_space<vmem>>, vector<4x16x128xf32>,
    } else {
    }
    return
  }
  func.func @transform_0(%arg0: i32, %arg1: i32) -> (i32, i32, i32) {
    %c0_i32 = arith.constant 0 : i32
    %c0_i32_0 = arith.constant 0 : i32
    %c0_i32_1 = arith.constant 0 : i32
    return %arg0, %c0_i32, %c0_i32_0 : i32, i32, i32
  }
  func.func @transform_1(%arg0: i32, %arg1: i32) -> (i32, i32, i32) {
    %c0_i32 = arith.constant 0 : i32
    %c0_i32_0 = arith.constant 0 : i32
    %c0_i32_1 = arith.constant 0 : i32
    return %arg1, %c0_i32, %c0_i32_0 : i32, i32, i32
  }
  func.func @transform_2(%arg0: i32, %arg1: i32) -> (i32, i32, i32) {
    %c0_i32 = arith.constant 0 : i32
    %c0_i32_0 = arith.constant 0 : i32
    %c0_i32_1 = arith.constant 0 : i32
    return %arg1, %c0_i32, %c0_i32_0 : i32, i32, i32
  }
  func.func @transform_3(%arg0: i32, %arg1: i32) -> (i32, i32, i32) {
    %c0_i32 = arith.constant 0 : i32
    %c0_i32_0 = arith.constant 0 : i32
    %c0_i32_1 = arith.constant 0 : i32
    return %arg1, %c0_i32, %c0_i32_0 : i32, i32, i32
  }
  func.func @transform_4(%arg0: i32, %arg1: i32) -> (i32, i32, i32) {
    %c0_i32 = arith.constant 0 : i32
    %c0_i32_0 = arith.constant 0 : i32
    %c0_i32_1 = arith.constant 0 : i32
    return %arg1, %c0_i32, %c0_i32_0 : i32, i32, i32
  }
  func.func @transform_5(%arg0: i32, %arg1: i32) -> (i32, i32, i32) {
    %c0_i32 = arith.constant 0 : i32
    %c0_i32_0 = arith.constant 0 : i32
    %c0_i32_1 = arith.constant 0 : i32
    return %arg1, %c0_i32, %c0_i32_0 : i32, i32, i32
  }
  func.func @transform_6(%arg0: i32, %arg1: i32) -> (i32, i32) {
    %c0_i32 = arith.constant 0 : i32
    %c0_i32_0 = arith.constant 0 : i32
    %c0_i32_1 = arith.constant 0 : i32
    return %c0_i32, %c0_i32_0 : i32, i32
  }
  func.func @transform_7(%arg0: i32, %arg1: i32) -> (i32, i32, i32) {
    %c0_i32 = arith.constant 0 : i32
    %c0_i32_0 = arith.constant 0 : i32
    %c0_i32_1 = arith.constant 0 : i32
    return %arg0, %c0_i32, %c0_i32_0 : i32, i32, i32
  }
}

</mosaic_0001>

<bundles_post_ra>
// kernel: gpt_backbone_forward.1
= control target key start
LH: loop header
LB: loop body
LE: loop exit
PB: predicated region body
PF: predicated region fallthrough
CT: control target
= control target key end

     0   :  { %s7600_s0 = inlined_call_operand.hbm [shape: f32[4,16,128], index: 0, kind: input, shape index: {}]   ;;  %s7601_s1 = inlined_call_operand.hbm [shape: f32[2,8,512], index: 1, kind: input, shape index: {}]   ;;  %s7602_s2 = inlined_call_operand.hbm [shape: bf16[2,128,384], index: 2, kind: input, shape index: {}]   ;;  %s7603_s3 = inlined_call_operand.hbm [shape: bf16[2,128,128], index: 3, kind: input, shape index: {}]   ;;  %s7604_s4 = inlined_call_operand.hbm [shape: bf16[2,128,512], index: 4, kind: input, shape index: {}]   ;;  %s7605_s5 = inlined_call_operand.hbm [shape: bf16[2,512,128], index: 5, kind: input, shape index: {}]   ;;  %s7606_s6 = inlined_call_operand.hbm [shape: f32[8,128], index: 6, kind: input, shape index: {}]   ;;  %s7607_s7 = inlined_call_operand.hbm [shape: f32[4,16,128], index: 7, kind: output, shape index: {}]  }
   0x1   :  { %7622 = sst [smem:[#allocation31_spill]] %s7600_s0 }
   0x2   :  { %7623 = sst [smem:[#allocation32_spill]] %s7601_s1 }
   0x3   :  { %7624 = sst [smem:[#allocation33_spill]] %s7606_s6 }
   0x4   :  { %7625 = sst [smem:[#allocation34_spill]] %s7607_s7 }
   0x5   :  { %12 = vsyncpa [#allocation4], 0 }
   0x6   :  { %13 = vsyncpa [#allocation7], 0 }
   0x7   :  { %15 = vsyncpa [#allocation7 + $0x1], 0 }
   0x8   :  { %16 = vsyncpa [#allocation10], 0 }
   0x9   :  { %18 = vsyncpa [#allocation10 + $0x1], 0 }
   0xa   :  { %19 = vsyncpa [#allocation13], 0 }
   0xb   :  { %21 = vsyncpa [#allocation13 + $0x1], 0 }
   0xc   :  { %22 = vsyncpa [#allocation5], 0  ;;  %s6158_s24 = smov 0   ;;  %s6160_s25 = smov 0  }
   0xd   :  { %s6162_s26 = smov 0   ;;  %s6164_s27 = smov 0  }
   0xe   :  { %s6166_s28 = smov 0   ;;  %s6168_s29 = smov 0  }
   0xf LB: > { %7626 = sst [smem:[#allocation22_spill]] %s6084_s27  ;;  %s6187_s30 = sadd.s32 4294967295, %s6092_s29   ;;  %s6092_s29 = sphi %s6168_s29, %s28_s29   ;;  %s6088_s28 = sphi %s6166_s28, %s7675_s28   ;;  %s6084_s27 = sphi %s6164_s27, %s7674_s27   ;;  %s6080_s26 = sphi %s6162_s26, %s7673_s26   ;;  %s6076_s25 = sphi %s6160_s25, %s7672_s25   ;;  %s6072_s24 = sphi %s6158_s24, %s7671_s24  }
  0x10   : > { %7627 = sst [smem:[#allocation23_spill]] %s6092_s29  ;;  %p80_p0 = scmp.ne.s32.totalorder %s6080_s26, %s6076_s25 }
  0x11   : > { %p81_p1 = scmp.eq.s32.totalorder %s6092_s29, 0  ;;  %p86_p2 = scmp.ne.s32.totalorder %s6076_s25, %s6072_s24 }
  0x12   : > { %p7608_p3 = scmp.eq.s32.totalorder %s6187_s30, 0  ;;  %p4667_p5 = scmp.ge.s32.totalorder %s6092_s29, 1 }
  0x13   : > { %p82_p4 = por %p81_p1, %p80_p0  ;;  %p248_p7 = scmp.lt.s32.totalorder %s6092_s29, 3 }
  0x14   : > { %p6198_p6 = por %p7608_p3, %p86_p2  ;;  %s6094_s11 = smov [#allocation14]  }
  0x15   : > { %p6203_p8 = pnand %p4667_p5, %p248_p7  ;;  %s278_s12 = sshll.u32 %s6094_s11, 4  ;;  %s279_s12 = int_to_ptr.vmem [resolvable:$true] %s278_s12 }
  0x16   : > { %s7628_s9 = scalar_select %p6198_p6, 1, 0 }
  0x17   : > { %p5281_p9 = pneg %p6203_p8  ;;  %p5306_p10 = scmp.lt.s32.totalorder %s6092_s29, 2 }
  0x18   : > { %7629 = sst [smem:[#allocation24_spill]] %s7628_s9  ;;  %s6211_s13 = sand.u32 1, %s6092_s29  }
  0x19   : > { %p6215_p11 = pnand %p5281_p9, %p7608_p3  ;;  %p6219_p12 = pnand %p5306_p10, %p82_p4 }
  0x1a   : > { %s5817_s16 = scalar_lea.vmem %s279_s12, 128  ;;  %p5825_p5 = scmp.lt.s32.totalorder %s279_s12, %s279_s12 }
  0x1b   : > { %p5808_p13 = pneg %p6215_p11  ;;  %p5818_p0 = scmp.ne.s32.totalorder %s279_s12, %s5817_s16 }
  0x1c   : > { %p5826_p7 = scmp.lt.s32.totalorder %s5817_s16, %s5817_s16 }
  0x1d   : > { %p5820_p1 = pnand %p5818_p0, %p5808_p13 }
  0x1e   : > { %p5827_p9 = por %p5826_p7, %p5825_p5 }
  0x1f   : > { %p5821_p2 = pneg %p5820_p1 }
  0x21   : > { %p5828_p3 = pnand %p5827_p9, %p5821_p2 }
  0x23   : > { %5831 = shalt.err (!%p5828_p3)
}
  0x24   : > { %s7633_s6 = sld [smem:[#allocation33_spill]]  ;;  %s37_s19 = sadd.s32 1, %s6088_s28 }
  0x25   : > { %s6235_s20 = sand.u32 1, %s6080_s26   ;;  %p38_p4 = scmp.ge.s32.totalorder %s37_s19, 2 }
  0x26   : > { %s4671_s21 = sshll.u32 %s6235_s20, 5  ;;  %s4828_s22 = sshll.u32 %s6088_s28, 9 }
  0x27   : > { %s7677_s19 = smov (%p38_p4, %s37_s19), 0  ;;  %s7635_s1 = sld [smem:[#allocation32_spill]] }
  0x28   : > { %7634 = sst [smem:[#allocation25_spill]] %s7677_s19  ;;  %s293_s16 = scalar_lea.vmem [#allocation6], %s4671_s21 }
  0x29   : > { %s301_s17 = sshll.u32 %s293_s16, 4  ;;  %s70_s18 = ssub.s32 %s6088_s28, %s7677_s19  ;;  %s302_s17 = int_to_ptr.vmem [resolvable:$true] %s301_s17 }
  0x2a   : > { %5287 = dma.hbm_to_vmem [thread:$0]  (!%p6215_p11), %s7633_s6, 128, %s279_s12, [#allocation13]  }
  0x2b   : > { %p6246_p3 = scmp.eq.s32.totalorder %s70_s18, 0  ;;  %s7616_s6 = scalar_lea.sflag [#allocation7], %s6211_s13 }
  0x2c   : > { %p6254_p10 = pneg %p6219_p12  ;;  %s5845_s7 = scalar_lea.vmem %s302_s17, 512 }
  0x2d   : > { %s299_s11 = scalar_lea.hbm %s7635_s1, %s4828_s22  ;;  %p5846_p0 = scmp.ne.s32.totalorder %s302_s17, %s5845_s7 }
  0x2e   : > { %s6095_s21 = smov [#allocation6]  }
  0x2f   : > { %p5848_p1 = pnand %p5846_p0, %p6254_p10  ;;  %s5850_s22 = sshll.u32 %s6095_s21, 4  ;;  %s5851_s22 = int_to_ptr.vmem [resolvable:$false] %s5850_s22 }
  0x30   : > { %s5852_s23 = scalar_lea.vmem %s5851_s22, 1024  ;;  %p5853_p5 = scmp.lt.s32.totalorder %s302_s17, %s5851_s22 }
  0x31   : > { %p5849_p2 = pneg %p5848_p1  ;;  %p5854_p7 = scmp.lt.s32.totalorder %s5852_s23, %s5845_s7 }
  0x33   : > { %p5855_p9 = por %p5854_p7, %p5853_p5 }
  0x35   : > { %p5856_p4 = pnand %p5855_p9, %p5849_p2 }
  0x37   : > { %5859 = shalt.err (!%p5856_p4)
}
  0x38   : > { %5291 = dma.hbm_to_vmem [thread:$0]  (!%p6219_p12), %s299_s11, 512, %s302_s17, %s7616_s6  }
  0x39   : > { %s7638_s24 = sadd.s32 1, %s6080_s26  ;;  %s4675_s18 = sshll.u32 %s6235_s20, 6 }
  0x3a   : > { %s6269_s16 = scalar_select %p6246_p3, %s6080_s26, %s7638_s24  }
  0x3b   : > { %s4829_s21 = sshll.u32 %s6088_s28, 10  ;;  %s333_s1 = scalar_lea.vmem [#allocation9], %s4675_s18 }
  0x3c   : > { %s339_s8 = scalar_lea.hbm %s7603_s3, %s4829_s21  ;;  %s340_s19 = sshll.u32 %s333_s1, 4  ;;  %s341_s19 = int_to_ptr.vmem [resolvable:$true] %s340_s19 }
  0x3d   : > { %s7615_s27 = scalar_lea.sflag [#allocation10], %s6211_s13  ;;  %s5873_s9 = scalar_lea.vmem %s341_s19, 1024 }
  0x3e   : > { %p5874_p0 = scmp.ne.s32.totalorder %s341_s19, %s5873_s9  ;;  %s6096_s11 = smov [#allocation9]  }
  0x3f   : > { %s5878_s17 = sshll.u32 %s6096_s11, 4  ;;  %s5879_s17 = int_to_ptr.vmem [resolvable:$false] %s5878_s17 }
  0x40   : > { %p5876_p1 = pnand %p5874_p0, %p6254_p10  ;;  %s5880_s12 = scalar_lea.vmem %s5879_s17, 2048 }
  0x41   : > { %p5881_p3 = scmp.lt.s32.totalorder %s341_s19, %s5879_s17  ;;  %p5882_p5 = scmp.lt.s32.totalorder %s5880_s12, %s5873_s9 }
  0x42   : > { %p5877_p2 = pneg %p5876_p1 }
  0x43   : > { %p5883_p7 = por %p5882_p5, %p5881_p3 }
  0x45   : > { %p5884_p9 = pnand %p5883_p7, %p5877_p2 }
  0x47   : > { %5887 = shalt.err (!%p5884_p9)
}
  0x48   : > { %s7613_s24 = smov 64   ;;  %s7614_s1 = smov 4  }
  0x49   : > { %5297 = dma.hbm_to_vmem [thread:$0]  (!%p6219_p12), %s339_s8, 1024, %s341_s19, %s7615_s27, %s7613_s24, %s7613_s24, %s7614_s1  }
  0x4a   : > { %s6099_s18 = smov [#allocation3]  }
  0x4b   : > { %s264_s21 = sshll.u32 %s6099_s18, 4  ;;  %s265_s21 = int_to_ptr.vmem [resolvable:$true] %s264_s21 }
  0x4c   : > { %s5899_s22 = scalar_lea.vmem %s265_s21, 1024  ;;  %p5907_p2 = scmp.lt.s32.totalorder %s265_s21, %s265_s21 }
  0x4d   : > { %p5900_p4 = scmp.ne.s32.totalorder %s265_s21, %s5899_s22  ;;  %p5908_p3 = scmp.lt.s32.totalorder %s5899_s22, %s5899_s22 }
  0x4f   : > { %p5902_p0 = pnand %p5900_p4, %p5808_p13  ;;  %p5909_p5 = por %p5908_p3, %p5907_p2 }
  0x51   : > { %p5903_p1 = pneg %p5902_p0 }
  0x53   : > { %p5910_p7 = pnand %p5909_p5, %p5903_p1 }
  0x55   : > { %5913 = shalt.err (!%p5910_p7)
}
  0x56   : > { %s6100_s9 = smov 128   ;;  %s6101_s8 = smov 8  }
  0x57   : > { %s7639_s0 = sld [smem:[#allocation31_spill]]  ;;  %s5257_s11 = smul.u32 3072, %s6088_s28 }
  0x58   : > { %s7640_s17 = smul.u32 192, %s6235_s20  ;;  %s6102_s7 = smov [#allocation8]  }
  0x59   : > { %s318_s1 = scalar_lea.hbm %s7602_s2, %s5257_s11  ;;  %s5932_s14 = sshll.u32 %s6102_s7, 4  ;;  %s5933_s14 = int_to_ptr.vmem [resolvable:$false] %s5932_s14 }
  0x5a   : > { %s312_s12 = scalar_lea.vmem [#allocation8], %s7640_s17  ;;  %s5934_s6 = scalar_lea.vmem %s5933_s14, 6144 }
  0x5b   : > { %s319_s18 = sshll.u32 %s312_s12, 4  ;;  %s320_s18 = int_to_ptr.vmem [resolvable:$true] %s319_s18 }
  0x5c   : > { %s5927_s27 = scalar_lea.vmem %s320_s18, 3072  ;;  %p5935_p0 = scmp.lt.s32.totalorder %s320_s18, %s5933_s14 }
  0x5d   : > { %5284 = dma.hbm_to_vmem [thread:$0]  (!%p6215_p11), %s7639_s0, 1024, %s265_s21, [#allocation4], %s6100_s9, %s6100_s9, %s6101_s8  }
  0x5e   : > { %p5928_p13 = scmp.ne.s32.totalorder %s320_s18, %s5927_s27  ;;  %p5936_p11 = scmp.lt.s32.totalorder %s5934_s6, %s5927_s27 }
  0x60   : > { %p5930_p9 = pnand %p5928_p13, %p6254_p10  ;;  %p5937_p1 = por %p5936_p11, %p5935_p0 }
  0x62   : > { %p5931_p4 = pneg %p5930_p9 }
  0x64   : > { %p5938_p2 = pnand %p5937_p1, %p5931_p4 }
  0x66   : > { %5941 = shalt.err (!%p5938_p2)
}
  0x67   : > { %s6103_s21 = smov 192   ;;  %s6104_s24 = smov 12  }
  0x68   : > { %s7641_s9 = scalar_lea.sflag [#allocation7], %s6211_s13  ;;  %s4830_s8 = sshll.u32 %s6088_s28, 12 }
  0x69   : > { %5294 = dma.hbm_to_vmem [thread:$0]  (!%p6219_p12), %s318_s1, 3072, %s320_s18, %s7641_s9, %s6103_s21, %s6103_s21, %s6104_s24  }
  0x6a   : > { %s7642_s19 = sshll.u32 %s6235_s20, 8  ;;  %s360_s6 = scalar_lea.hbm %s7604_s4, %s4830_s8 }
  0x6b   : > { %s354_s7 = scalar_lea.vmem [#allocation11], %s7642_s19  ;;  %s6105_s12 = smov [#allocation11]  }
  0x6c   : > { %s361_s23 = sshll.u32 %s354_s7, 4  ;;  %s5960_s22 = sshll.u32 %s6105_s12, 4  ;;  %s362_s23 = int_to_ptr.vmem [resolvable:$true] %s361_s23  ;;  %s5961_s22 = int_to_ptr.vmem [resolvable:$false] %s5960_s22 }
  0x6d   : > { %s5955_s27 = scalar_lea.vmem %s362_s23, 4096  ;;  %s5962_s14 = scalar_lea.vmem %s5961_s22, 8192 }
  0x6e   : > { %p5956_p3 = scmp.ne.s32.totalorder %s362_s23, %s5955_s27  ;;  %p5963_p13 = scmp.lt.s32.totalorder %s362_s23, %s5961_s22 }
  0x6f   : > { %p5964_p9 = scmp.lt.s32.totalorder %s5962_s14, %s5955_s27 }
  0x70   : > { %p5958_p5 = pnand %p5956_p3, %p6254_p10 }
  0x71   : > { %p5965_p4 = por %p5964_p9, %p5963_p13 }
  0x72   : > { %p5959_p7 = pneg %p5958_p5 }
  0x74   : > { %p5966_p0 = pnand %p5965_p4, %p5959_p7 }
  0x76   : > { %5969 = shalt.err (!%p5966_p0)
}
  0x77   : > { %s6106_s1 = smov 256   ;;  %s6107_s18 = smov 16  }
  0x78   : > { %s7643_s21 = scalar_lea.sflag [#allocation10], %s6211_s13  ;;  %s381_s19 = scalar_lea.hbm %s7605_s5, %s4830_s8 }
  0x79   : > { %5300 = dma.hbm_to_vmem [thread:$0]  (!%p6219_p12), %s360_s6, 4096, %s362_s23, %s7643_s21, %s6106_s1, %s6106_s1, %s6107_s18  }
  0x7a   : > { %s7644_s7 = sshll.u32 %s6235_s20, 8  ;;  %s372_s27 = scalar_lea.sflag [#allocation13], %s6211_s13 }
  0x7b   : > { %s375_s11 = scalar_lea.vmem [#allocation12], %s7644_s7  ;;  %s6108_s22 = smov [#allocation12]  }
  0x7c   : > { %s382_s17 = sshll.u32 %s375_s11, 4  ;;  %s5988_s14 = sshll.u32 %s6108_s22, 4  ;;  %s383_s17 = int_to_ptr.vmem [resolvable:$true] %s382_s17  ;;  %s5989_s14 = int_to_ptr.vmem [resolvable:$false] %s5988_s14 }
  0x7d   : > { %s5983_s12 = scalar_lea.vmem %s383_s17, 4096  ;;  %s5990_s0 = scalar_lea.vmem %s5989_s14, 8192 }
  0x7e   : > { %p5984_p11 = scmp.ne.s32.totalorder %s383_s17, %s5983_s12  ;;  %p5991_p3 = scmp.lt.s32.totalorder %s383_s17, %s5989_s14 }
  0x7f   : > { %p5992_p5 = scmp.lt.s32.totalorder %s5990_s0, %s5983_s12 }
  0x80   : > { %p5986_p1 = pnand %p5984_p11, %p6254_p10 }
  0x81   : > { %p5993_p7 = por %p5992_p5, %p5991_p3 }
  0x82   : > { %p5987_p2 = pneg %p5986_p1 }
  0x84   : > { %p5994_p13 = pnand %p5993_p7, %p5987_p2 }
  0x86   : > { %5997 = shalt.err (!%p5994_p13)
}
  0x87   : > { %s7645_s20 = smov 4   ;;  %s7646_s8 = smov 64  }
  0x88   : > { %5303 = dma.hbm_to_vmem [thread:$0]  (!%p6219_p12), %s381_s19, 4096, %s383_s17, %s372_s27, %s7646_s8, %s7646_s8, %s7645_s20  }
  0x89   : > { %394 = sbr.rel (%p6203_p8) target bundleno = 4617 (0x1209), region = 48 }
  0x8e   : > { %p7647_p10 = scmp.eq.s32.totalorder %s6187_s30, 0 }
  0x90   : > { %6047 = dma.done.wait (%p7647_p10), [#allocation4], 1024   ;;  %p7648_p9 = pmov %p7647_p10 }
  0x91   : > { %s400_s29 = sand.u32 1, %s6187_s30   ;;  %s402_s13 = sand.u32 1, %s6076_s25  }
  0x92   : > { %6049 = vsyncadd (%p7648_p9), [#allocation4], 4294966272  ;;  %s4686_s23 = sshll.u32 %s402_s13, 5  ;;  %s401_s15 = scalar_lea.sflag [#allocation7], %s400_s29 }
  0x93   : > { %s6340_s6 = scalar_lea.vmem [#allocation6], %s4686_s23 }
  0x94   : > { %6051 = dma.done.wait (%p6198_p6), %s401_s15, 3584  }
  0x95   : > { %6053 = vsyncadd (%p6198_p6), %s401_s15, 4294963712  ;;  %s5258_s10 = smul.u32 192, %s402_s13  ;;  %s4687_s1 = sshll.u32 %s402_s13, 6 }
  0x96   : > { %s419_s21 = scalar_lea.sflag [#allocation10], %s400_s29  ;;  %s6348_s24 = scalar_lea.vmem [#allocation9], %s4687_s1 }
  0x97   : > { %s6346_s18 = scalar_lea.vmem [#allocation8], %s5258_s10 }
  0x98   : > { %6055 = dma.done.wait (%p6198_p6), %s419_s21, 5120  }
  0x99   : > { %6057 = vsyncadd (%p6198_p6), %s419_s21, 4294962176  ;;  %s4688_s9 = sshll.u32 %s402_s13, 8  ;;  %s437_s7 = scalar_lea.sflag [#allocation13], %s400_s29 }
  0x9a   : > { %s6354_s19 = scalar_lea.vmem [#allocation11], %s4688_s9  ;;  %s6356_s11 = scalar_lea.vmem [#allocation12], %s4688_s9 }
  0x9b   : > { %6059 = dma.done.wait (%p6198_p6), %s437_s7, 4096  }
  0x9c   : > { %6061 = vsyncadd (%p6198_p6), %s437_s7, 4294963200  ;;  %p7650_p8 = pmov %p7648_p9 }
  0x9e   : > { %6063 = dma.done.wait (%p7650_p8), [#allocation13], 128   ;;  %p7651_p12 = pmov %p7650_p8 }
  0x9f   : > { %s7652_s17 = sld [smem:[#allocation22_spill]] }
  0xa0   : > { %6065 = vsyncadd (%p7651_p12), [#allocation13], 4294967168 }
  0xa5   : > { %p4691_p4 = scmp.ne.s32.totalorder %s7652_s17, 0 }
  0xa7   : > { %496 = sbr.rel (%p4691_p4) target bundleno = 177 (0xb1), region = 80 }
  0xac   : > { %v497_v0 = vld [vmem:[#allocation3] sm:$0xff]  ;;  %v498_v1 = vld [vmem:[#allocation3 + $0x8] sm:$0xff]  ;;  %v499_v2 = vld [vmem:[#allocation3 + $0x10] sm:$0xff] }
  0xad   : > { %505 = vst [vmem:[#allocation2 + $0x30] sm:$0xff] %v497_v0  ;;  %506 = vst [vmem:[#allocation2] sm:$0xff] %v498_v1  ;;  %v500_v3 = vld [vmem:[#allocation3 + $0x18] sm:$0xff]  ;;  %v501_v4 = vld [vmem:[#allocation3 + $0x20] sm:$0xff] }
  0xae   : > { %507 = vst [vmem:[#allocation2 + $0x18] sm:$0xff] %v499_v2  ;;  %v502_v5 = vld [vmem:[#allocation3 + $0x28] sm:$0xff]  ;;  %508 = vst [vmem:[#allocation2 + $0x10] sm:$0xff] %v500_v3  ;;  %v503_v6 = vld [vmem:[#allocation3 + $0x30] sm:$0xff] }
  0xaf   : > { %509 = vst [vmem:[#allocation2 + $0x8] sm:$0xff] %v501_v4  ;;  %510 = vst [vmem:[#allocation2 + $0x20] sm:$0xff] %v502_v5  ;;  %v504_v7 = vld [vmem:[#allocation3 + $0x38] sm:$0xff] }
  0xb0   : > { %511 = vst [vmem:[#allocation2 + $0x28] sm:$0xff] %v503_v6  ;;  %512 = vst [vmem:[#allocation2 + $0x38] sm:$0xff] %v504_v7 }
  0xb1 PF: > { %v5438_v16 = vld [vmem:[%s6346_s18 + $0xac] ss:$12 sps:$4 sm:$0xff]   ;;  %v5440_v17 = vld [vmem:[%s6346_s18 + $0xa8] ss:$12 sps:$4 sm:$0xff]   ;;  %v5443_v50 = vld [vmem:[%s6346_s18 + $0xb0] ss:$12 sps:$4 sm:$0xff]  }
  0xb2   : > { %798 = vmatprep.subr.bf16.mxu0 %v5438_v16  ;;  %v5441_v49 = vld [vmem:[%s6346_s18 + $0x94] ss:$12 sps:$4 sm:$0xff]   ;;  %v5444_v51 = vld [vmem:[%s6346_s18 + $0x90] ss:$12 sps:$4 sm:$0xff]   ;;  %5000 = vmatprep.subr.bf16.mxu1 %v5443_v50  ;;  %v5447_v54 = vld [vmem:[%s6346_s18 + $0x98] ss:$12 sps:$4 sm:$0xff]  }
  0xb3   : > { %799 = vmatpush1.bf16.msra.mxu0 %v5440_v17  ;;  %5001 = vmatpush3.bf16.msra.mxu1 %v5443_v50  ;;  %v5445_v53 = vld [vmem:[%s6346_s18 + $0x7c] ss:$12 sps:$4 sm:$0xff]   ;;  %v5448_v55 = vld [vmem:[%s6346_s18 + $0x78] ss:$12 sps:$4 sm:$0xff]   ;;  %v5451_v57 = vld [vmem:[%s6346_s18 + $0x80] ss:$12 sps:$4 sm:$0xff]  }
  0xb4   : > { %v513_v8 = vld [vmem:[#allocation2 + $0x30] sm:$0xff]  ;;  %v514_v10 = vld [vmem:[#allocation2] sm:$0xff]  ;;  %800 = vmatprep.subr.bf16.mxu0 %v5441_v49  ;;  %5002 = vmatprep.subr.bf16.mxu1 %v5447_v54  ;;  %v5453_v59 = vld [vmem:[%s6346_s18 + $0x4c] ss:$12 sps:$4 sm:$0xff]   ;;  %v6109_v6 = vmov 0   ;;  %vm6111_vm0 = vmmov 0  }
  0xb5   : > { %v515_v9 = vld [vmem:[#allocation2 + $0x18] sm:$0xff]  ;;  %529 = vadd.xlane.f32.xlu0 %v513_v8  ;;  %v516_v11 = vld [vmem:[#allocation2 + $0x10] sm:$0xff]  ;;  %v5452_v58 = vld [vmem:[%s6346_s18 + $0x60] ss:$12 sps:$4 sm:$0xff]   ;;  %830 = vmatprep.mubr.bf16.mxu0 %v6109_v6  ;;  %vm963_vm1 = vcmask 261120   ;;  %vm1164_vm3 = vcmask 130048  }
  0xb6   : > { %533 = vadd.xlane.f32.xlu1 %v515_v9  ;;  %v517_v12 = vld [vmem:[#allocation2 + $0x8] sm:$0xff]  ;;  %v518_v13 = vld [vmem:[#allocation2 + $0x20] sm:$0xff]  ;;  %v5459_v63 = vld [vmem:[%s6346_s18 + $0x50] ss:$12 sps:$4 sm:$0xff]   ;;  %s6112_s27 = smov 96   ;;  %s6113_s12 = smov 64  }
  0xb7   : > { %v519_v14 = vld [vmem:[#allocation2 + $0x28] sm:$0xff]  ;;  %v520_v15 = vld [vmem:[#allocation2 + $0x38] sm:$0xff]  ;;  %801 = vmatpush1.bf16.msra.mxu0 %v5444_v51  ;;  %5003 = vmatpush3.bf16.msra.mxu1 %v5447_v54  ;;  %v5449_v56 = vld [vmem:[%s6346_s18 + $0x64] ss:$12 sps:$4 sm:$0xff]   ;;  %s6114_s22 = smov 32   ;;  %vm3025_vm5 = vcmask 523264  }
  0xb8   : > { %802 = vmatprep.subr.bf16.mxu0 %v5445_v53  ;;  %5004 = vmatprep.subr.bf16.mxu1 %v5451_v57  ;;  %v5455_v60 = vld [vmem:[%s6346_s18 + $0x68] ss:$12 sps:$4 sm:$0xff]   ;;  %v5460_v0 = vld [vmem:[%s6346_s18 + $0x30] ss:$12 sps:$4 sm:$0xff]   ;;  %v5463_v2 = vld [vmem:[%s6346_s18 + $0x38] ss:$12 sps:$4 sm:$0xff]  }
  0xb9   : > { %531 = vadd.xlane.f32.xlu0 %v514_v10  ;;  %v5456_v61 = vld [vmem:[%s6346_s18 + $0x48] ss:$12 sps:$4 sm:$0xff]   ;;  %v5464_v3 = vld [vmem:[%s6346_s18 + $0x18] ss:$12 sps:$4 sm:$0xff]   ;;  %v5467_v5 = vld [vmem:[%s6346_s18 + $0x20] ss:$12 sps:$4 sm:$0xff]  }
  0xba   : > { %535 = vadd.xlane.f32.xlu1 %v516_v11  ;;  %v5457_v62 = vld [vmem:[%s6346_s18 + $0x34] ss:$12 sps:$4 sm:$0xff]   ;;  %v5461_v1 = vld [vmem:[%s6346_s18 + $0x1c] ss:$12 sps:$4 sm:$0xff]   ;;  %v5465_v4 = vld [vmem:[%s6346_s18 + $0x4] ss:$12 sps:$4 sm:$0xff]  }
  0xbb   : > { %803 = vmatpush1.bf16.msra.mxu0 %v5448_v55  ;;  %5005 = vmatpush3.bf16.msra.mxu1 %v5451_v57  ;;  %v5468_v7 = vld [vmem:[%s6346_s18] ss:$12 sps:$4 sm:$0xff]   ;;  %vm3034_vm6 = vcmask 785408   ;;  %s7667_s14 = sld [smem:[#allocation22_spill]] }
  0xbc   : > { %804 = vmatprep.subr.bf16.mxu0 %v5449_v56  ;;  %5006 = vmatprep.subr.bf16.mxu1 %v5455_v60 }
  0xbd   : > { %537 = vadd.xlane.f32.xlu0 %v517_v12 }
  0xbe   : > { %539 = vadd.xlane.f32.xlu1 %v518_v13 }
  0xbf   : > { %805 = vmatpush1.bf16.msra.mxu0 %v5452_v58  ;;  %5007 = vmatpush3.bf16.msra.mxu1 %v5455_v60 }
  0xc0   : > { %806 = vmatprep.subr.bf16.mxu0 %v5453_v59  ;;  %5008 = vmatprep.subr.bf16.mxu1 %v5459_v63 }
  0xc1   : > { %541 = vadd.xlane.f32.xlu0 %v519_v14  ;;  %p4821_p6 = scmp.ne.s32.totalorder %s7667_s14, 1 }
  0xc2   : > { %543 = vadd.xlane.f32.xlu1 %v520_v15 }
  0xc3   : > { %807 = vmatpush1.bf16.msra.mxu0 %v5456_v61  ;;  %5009 = vmatpush3.bf16.msra.mxu1 %v5459_v63 }
  0xc4   : > { %808 = vmatprep.subr.bf16.mxu0 %v5457_v62  ;;  %5010 = vmatprep.subr.bf16.mxu1 %v5463_v2 }
  0xc7   : > { %809 = vmatpush1.bf16.msra.mxu0 %v5460_v0  ;;  %5011 = vmatpush3.bf16.msra.mxu1 %v5463_v2 }
  0xc8   : > { %810 = vmatprep.subr.bf16.mxu0 %v5461_v1  ;;  %5012 = vmatprep.subr.bf16.mxu1 %v5467_v5 }
  0xcb   : > { %811 = vmatpush1.bf16.msra.mxu0 %v5464_v3  ;;  %5013 = vmatpush3.bf16.msra.mxu1 %v5467_v5 }
  0xcc   : > { %812 = vmatprep.subr.bf16.mxu0 %v5465_v4 }
  0xcf   : > { %813 = vmatpush1.bf16.msra.mxu0 %v5468_v7 }
 0x13e   : > { %v530_v18 = vpop.xlane.xlu0 %529 }
 0x13f   : > { %v534_v19 = vpop.xlane.xlu1 %533  ;;  %v546_v20 = vmul.f32 0.0078125, %v530_v18 }
 0x140   : > { %v548_v21 = vmul.f32 0.0078125, %v534_v19 }
 0x141   : > { %v6369_v22 = vsub.f32 %v513_v8, %v546_v20  ;;  %v5469_v8 = vld [vmem:[%s6346_s18 + $0x8] ss:$12 sps:$4 sm:$0xff]  }
 0x142   : > { %v6371_v23 = vsub.f32 %v515_v9, %v548_v21  ;;  %v532_v24 = vpop.xlane.xlu0 %531  ;;  %5014 = vmatprep.subr.bf16.mxu1 %v5469_v8 }
 0x143   : > { %v536_v25 = vpop.xlane.xlu1 %535  ;;  %v547_v26 = vmul.f32 0.0078125, %v532_v24  ;;  %v562_v27 = vmul.f32 %v6369_v22, %v6369_v22  ;;  %5015 = vmatpush3.bf16.msra.mxu1 %v5469_v8 }
 0x144   : > { %v549_v28 = vmul.f32 0.0078125, %v536_v25  ;;  %v564_v29 = vmul.f32 %v6371_v23, %v6371_v23 }
 0x145   : > { %570 = vadd.xlane.f32.xlu0 %v562_v27  ;;  %v6377_v30 = vsub.f32 %v514_v10, %v547_v26 }
 0x146   : > { %v6379_v31 = vsub.f32 %v516_v11, %v549_v28  ;;  %v538_v32 = vpop.xlane.xlu0 %537 }
 0x147   : > { %v540_v33 = vpop.xlane.xlu1 %539  ;;  %v550_v34 = vmul.f32 0.0078125, %v538_v32  ;;  %v563_v35 = vmul.f32 %v6377_v30, %v6377_v30 }
 0x148   : > { %v551_v36 = vmul.f32 0.0078125, %v540_v33  ;;  %v565_v37 = vmul.f32 %v6379_v31, %v6379_v31 }
 0x149   : > { %574 = vadd.xlane.f32.xlu0 %v564_v29  ;;  %572 = vadd.xlane.f32.xlu1 %v563_v35  ;;  %v6385_v38 = vsub.f32 %v517_v12, %v550_v34 }
 0x14a   : > { %v6387_v39 = vsub.f32 %v518_v13, %v551_v36  ;;  %v542_v40 = vpop.xlane.xlu0 %541 }
 0x14b   : > { %v544_v41 = vpop.xlane.xlu1 %543  ;;  %v552_v42 = vmul.f32 0.0078125, %v542_v40  ;;  %v566_v43 = vmul.f32 %v6385_v38, %v6385_v38 }
 0x14c   : > { %v553_v44 = vmul.f32 0.0078125, %v544_v41  ;;  %v567_v45 = vmul.f32 %v6387_v39, %v6387_v39  ;;  %v521_v41 = vld [vmem:[%s6340_s6] ss:$0 sm:$0xff] }
 0x14d   : > { %576 = vadd.xlane.f32.xlu1 %v565_v37  ;;  %578 = vadd.xlane.f32.xlu0 %v566_v43  ;;  %v6393_v46 = vsub.f32 %v519_v14, %v552_v42 }
 0x14e   : > { %v6395_v47 = vsub.f32 %v520_v15, %v553_v44 }
 0x14f   : > { %v568_v48 = vmul.f32 %v6393_v46, %v6393_v46 }
 0x150   : > { %v569_v52 = vmul.f32 %v6395_v47, %v6395_v47 }
 0x151   : > { %580 = vadd.xlane.f32.xlu1 %v567_v45  ;;  %582 = vadd.xlane.f32.xlu0 %v568_v48  ;;  %v522_v48 = vld [vmem:[%s6340_s6 + $0x1] ss:$0 sm:$0xff] }
 0x155   : > { %584 = vadd.xlane.f32.xlu1 %v569_v52 }
 0x1ce   : > { %v571_v9 = vpop.xlane.xlu0 %570 }
 0x1cf   : > { %v586_v10 = vmul.f32 0.0078125, %v571_v9 }
 0x1d1   : > { %v594_v11 = vadd.f32 1e-05, %v586_v10 }
 0x1d2   : > { %v573_v12 = vpop.xlane.xlu1 %572  ;;  %v575_v13 = vpop.xlane.xlu0 %574 }
 0x1d3   : > { %5558 = vrsqrt.f32 %v594_v11  ;;  %v587_v14 = vmul.f32 0.0078125, %v573_v12  ;;  %v588_v15 = vmul.f32 0.0078125, %v575_v13 }
 0x1d5   : > { %v595_v16 = vadd.f32 1e-05, %v587_v14  ;;  %v596_v17 = vadd.f32 1e-05, %v588_v15 }
 0x1d6   : > { %v577_v18 = vpop.xlane.xlu1 %576  ;;  %v579_v19 = vpop.xlane.xlu0 %578 }
 0x1d7   : > { %5560 = vrsqrt.f32 %v595_v16  ;;  %v589_v20 = vmul.f32 0.0078125, %v577_v18  ;;  %v590_v21 = vmul.f32 0.0078125, %v579_v19 }
 0x1d8   : > { %5562 = vrsqrt.f32 %v596_v17 }
 0x1d9   : > { %v597_v24 = vadd.f32 1e-05, %v589_v20  ;;  %v598_v25 = vadd.f32 1e-05, %v590_v21 }
 0x1da   : > { %v581_v26 = vpop.xlane.xlu1 %580  ;;  %v583_v27 = vpop.xlane.xlu0 %582 }
 0x1db   : > { %5564 = vrsqrt.f32 %v597_v24  ;;  %v591_v28 = vmul.f32 0.0078125, %v581_v26  ;;  %v592_v29 = vmul.f32 0.0078125, %v583_v27 }
 0x1dc   : > { %5566 = vrsqrt.f32 %v598_v25 }
 0x1dd   : > { %v599_v32 = vadd.f32 1e-05, %v591_v28  ;;  %v600_v33 = vadd.f32 1e-05, %v592_v29 }
 0x1de   : > { %v585_v34 = vpop.xlane.xlu1 %584 }
 0x1df   : > { %5568 = vrsqrt.f32 %v599_v32  ;;  %v593_v35 = vmul.f32 0.0078125, %v585_v34 }
 0x1e0   : > { %v5559_v36 = vpop.eup %5558  ;;  %5570 = vrsqrt.f32 %v600_v33 }
 0x1e1   : > { %v601_v37 = vadd.f32 1e-05, %v593_v35  ;;  %v610_v40 = vmul.f32 %v5559_v36, %v6369_v22 }
 0x1e3   : > { %5572 = vrsqrt.f32 %v601_v37  ;;  %v618_v45 = vmul.f32 %v610_v40, %v521_v41 }
 0x1e4   : > { %v5561_v42 = vpop.eup %5560 }
 0x1e5   : > { %v5563_v43 = vpop.eup %5562  ;;  %v611_v44 = vmul.f32 %v5561_v42, %v6377_v30  ;;  %v626_v54 = vadd.f32 %v618_v45, %v522_v48 }
 0x1e6   : > { %v612_v49 = vmul.f32 %v5563_v43, %v6371_v23 }
 0x1e7   : > { %v619_v50 = vmul.f32 %v611_v44, %v521_v41 }
 0x1e8   : > { %v5565_v51 = vpop.eup %5564  ;;  %v620_v52 = vmul.f32 %v612_v49, %v521_v41 }
 0x1e9   : > { %v5567_v53 = vpop.eup %5566  ;;  %v627_v55 = vadd.f32 %v619_v50, %v522_v48  ;;  %v613_v56 = vmul.f32 %v5565_v51, %v6379_v31 }
 0x1ea   : > { %v614_v22 = vmul.f32 %v5567_v53, %v6385_v38  ;;  %v628_v60 = vadd.f32 %v620_v52, %v522_v48 }
 0x1eb   : > { %v634_v57 = vpack.c.bf16 %v627_v55, %v626_v54  ;;  %v621_v58 = vmul.f32 %v613_v56, %v521_v41 }
 0x1ec   : > { %v5569_v59 = vpop.eup %5568  ;;  %v622_v62 = vmul.f32 %v614_v22, %v521_v41 }
 0x1ed   : > { %v5571_v61 = vpop.eup %5570  ;;  %831 = vmatmul.mubr.bf16.vlgmr.msra.gmra.mxu0 %v634_v57  ;;  %5016 = vmatprep.mubr.bf16.mxu1 %v634_v57  ;;  %v629_v30 = vadd.f32 %v621_v58, %v522_v48  ;;  %v615_v23 = vmul.f32 %v5569_v59, %v6387_v39 }
 0x1ee   : > { %840 = vmatprep.mubr.bf16.mxu0 %v6109_v6  ;;  %v616_v63 = vmul.f32 %v5571_v61, %v6393_v46  ;;  %v630_v38 = vadd.f32 %v622_v62, %v522_v48  ;;  %v6110_v46 = vmov 0.0  }
 0x1ef   : > { %v635_v0 = vpack.c.bf16 %v629_v30, %v628_v60  ;;  %v623_v1 = vmul.f32 %v615_v23, %v521_v41  ;;  %5024 = vmatprep.subr.bf16.mxu1 %v6110_v46  ;;  %5036 = vmatprep.subr.bf16.mxu0 %v6110_v46  ;;  %v956_v30 = vlaneseq }
 0x1f0   : > { %v5573_v31 = vpop.eup %5572  ;;  %v624_v4 = vmul.f32 %v616_v63, %v521_v41 }
 0x1f1   : > { %5017 = vmatmul.mubr.bf16.vlgmr.msra.gmra.mxu1 %v635_v0  ;;  %v631_v2 = vadd.f32 %v623_v1, %v522_v48  ;;  %v617_v3 = vmul.f32 %v5573_v31, %v6395_v47  ;;  %v6499_v23 = vshrl.u32 %v956_v30, 7  ;;  %v960_v62 = vand.u32 127, %v956_v30 }
 0x1f2   : > { %v632_v8 = vadd.f32 %v624_v4, %v522_v48 }
 0x1f3   : > { %v636_v5 = vpack.c.bf16 %v631_v2, %v630_v38  ;;  %v625_v7 = vmul.f32 %v617_v3, %v521_v41  ;;  %vm6504_vm2 = vcmp.gt.s32.totalorder %v960_v62, %v6499_v23  ;;  %v958_v1 = vadd.s32 8, %v6499_v23 }
 0x1f5   : > { %841 = vmatmul.mubr.bf16.gmra.mxu0 %v635_v0  ;;  %5020 = vmatprep.mubr.bf16.mxu1 %v636_v5  ;;  %v633_v39 = vadd.f32 %v625_v7, %v522_v48  ;;  %vm6512_vm4 = vcmp.gt.s32.totalorder %v960_v62, %v958_v1 }
 0x1f6   : > { %850 = vmatprep.mubr.bf16.mxu0 %v6109_v6 }
 0x1f7   : > { %v637_v9 = vpack.c.bf16 %v633_v39, %v632_v8 }
 0x1f9   : > { %5021 = vmatmul.mubr.bf16.gmra.mxu1 %v637_v9 }
 0x1fa   : > { %5026 = vmatprep.mubr.msk.bf16.mxu1 %vm6111_vm0, %v6110_v46 }
 0x1fd   : > { %851 = vmatmul.mubr.bf16.gmra.mxu0 %v636_v5 }
 0x1fe   : > { %860 = vmatprep.mubr.bf16.mxu0 %v6109_v6 }
 0x205   : > { %861 = vmatmul.mubr.bf16.gmra.mxu0 %v637_v9 }
 0x206   : > { %5038 = vmatprep.mubr.msk.bf16.mxu0 %vm6111_vm0, %v6110_v46 }
 0x2ad   : > { %v832_v47 = vpop.f32.mrf.mxu0 }
 0x2ae   : > { %v936_v26 = vmul.f32 0.17677669, %v832_v47 }
 0x2af   : > { %v834_v10 = vpop.f32.mrf.mxu0 }
 0x2b1   : > { %v836_v11 = vpop.f32.mrf.mxu0  ;;  %v5018_v12 = vpop.f32.mrf.mxu1 }
 0x2b2   : > { %v937_v21 = vmul.f32 0.17677669, %v836_v11 }
 0x2b3   : > { %v838_v13 = vpop.f32.mrf.mxu0  ;;  %v905_v14 = vpop.f32.mrf.mxu1 }
 0x2b4   : > { %v6443_v15 = vpack.c.bf16 %v838_v13, %v834_v10  ;;  %v6450_v29 = vpack.c.bf16 %v937_v21, %v936_v26 }
 0x2b5   : > { %v842_v16 = vpop.f32.mrf.mxu0  ;;  %v5019_v17 = vpop.f32.mrf.mxu1 }
 0x2b6   : > { %v968_v18 = vsel %vm963_vm1, %v6443_v15, 0  ;;  %v938_v42 = vmul.f32 0.17677669, %v842_v16  ;;  %v6491_v61 = vpack.c.bf16 %v5019_v17, %v5018_v12 }
 0x2b7   : > { %v844_v19 = vpop.f32.mrf.mxu0  ;;  %v908_v20 = vpop.f32.mrf.mxu1  ;;  %5025 = vmatpush3.bf16.xpose.msra.mxu1 %v968_v18 }
 0x2b8   : > { %5030 = vmatprep.subr.bf16.mxu1 %v6110_v46  ;;  %v6478_v22 = vpack.c.bf16 %v908_v20, %v905_v14 }
 0x2b9   : > { %v846_v24 = vpop.f32.mrf.mxu0  ;;  %v5022_v25 = vpop.f32.mrf.mxu1 }
 0x2ba   : > { %v939_v40 = vmul.f32 0.17677669, %v846_v24 }
 0x2bb   : > { %v848_v27 = vpop.f32.mrf.mxu0  ;;  %v6448_v28 = vpop.f32.mrf.mxu1 }
 0x2bc   : > { %v6452_v32 = vpack.c.bf16 %v848_v27, %v844_v19  ;;  %v6463_v44 = vpack.c.bf16 %v939_v40, %v938_v42 }
 0x2bd   : > { %v852_v33 = vpop.f32.mrf.mxu0  ;;  %v5023_v34 = vpop.f32.mrf.mxu1 }
 0x2be   : > { %v6454_v35 = vpack.c.bf16 %v5023_v34, %v5022_v25  ;;  %5027 = vmatmul.mubr.msk.bf16.vlgmr.msra.gmra.mxu1 %vm963_vm1, %v6450_v29  ;;  %v1015_v36 = vsel %vm963_vm1, %v6452_v32, 0  ;;  %v940_v53 = vmul.f32 0.17677669, %v852_v33 }
 0x2bf   : > { %v854_v37 = vpop.f32.mrf.mxu0  ;;  %5031 = vmatpush3.bf16.xpose.msra.mxu1 %v1015_v36  ;;  %5032 = vmatprep.mubr.msk.bf16.mxu1 %vm6111_vm0, %v6110_v46  ;;  %v6501_v63 = vpop.f32.mrf.mxu1 }
 0x2c0   : > { %5042 = vmatprep.subr.bf16.mxu1 %v6110_v46 }
 0x2c1   : > { %v856_v41 = vpop.f32.mrf.mxu0 }
 0x2c2   : > { %v941_v51 = vmul.f32 0.17677669, %v856_v41 }
 0x2c3   : > { %v858_v43 = vpop.f32.mrf.mxu0 }
 0x2c4   : > { %v6465_v45 = vpack.c.bf16 %v858_v43, %v854_v37  ;;  %v6474_v55 = vpack.c.bf16 %v941_v51, %v940_v53 }
 0x2c5   : > { %v862_v48 = vpop.f32.mrf.mxu0 }
 0x2c6   : > { %5033 = vmatmul.mubr.msk.bf16.vlgmr.msra.gmra.mxu1 %vm963_vm1, %v6463_v44  ;;  %v1062_v49 = vsel %vm963_vm1, %v6465_v45, 0  ;;  %v942_v59 = vmul.f32 0.17677669, %v862_v48 }
 0x2c7   : > { %v864_v50 = vpop.f32.mrf.mxu0  ;;  %5037 = vmatpush3.bf16.xpose.msra.mxu0 %v1062_v49  ;;  %5044 = vmatprep.mubr.msk.bf16.mxu1 %vm6111_vm0, %v6110_v46 }
 0x2c8   : > { %5048 = vmatprep.subr.bf16.mxu0 %v6110_v46 }
 0x2c9   : > { %v866_v52 = vpop.f32.mrf.mxu0 }
 0x2ca   : > { %v943_v58 = vmul.f32 0.17677669, %v866_v52 }
 0x2cb   : > { %v868_v54 = vpop.f32.mrf.mxu0 }
 0x2cc   : > { %v6476_v56 = vpack.c.bf16 %v868_v54, %v864_v50  ;;  %v6489_v60 = vpack.c.bf16 %v943_v58, %v942_v59 }
 0x2ce   : > { %5039 = vmatmul.mubr.msk.bf16.vlgmr.msra.gmra.mxu0 %vm963_vm1, %v6474_v55  ;;  %v1109_v57 = vsel %vm963_vm1, %v6476_v56, 0 }
 0x2cf   : > { %5043 = vmatpush3.bf16.xpose.msra.mxu1 %v1109_v57  ;;  %5049 = vmatpush3.bf16.msra.mxu0 %v6478_v22 }
 0x2d0   : > { %5054 = vmatprep.subr.bf16.mxu1 %v6110_v46  ;;  %5050 = vmatprep.mubr.msk.bf16.mxu0 %vm6111_vm0, %v6110_v46 }
 0x2d1   : > { %5060 = vmatprep.subr.bf16.mxu0 %v6110_v46 }
 0x2d6   : > { %5045 = vmatmul.mubr.msk.bf16.vlgmr.msra.gmra.mxu1 %vm963_vm1, %v6489_v60 }
 0x2d7   : > { %5055 = vmatpush3.bf16.msra.mxu1 %v6491_v61  ;;  %5056 = vmatprep.mubr.msk.bf16.mxu1 %vm6111_vm0, %v6110_v46 }
 0x2d8   : > { %5066 = vmatprep.subr.bf16.mxu1 %v6110_v46 }
 0x37e   : > { %v1004_v31 = vpop.f32.mrf.mxu1 }
 0x37f   : > { %v1156_v38 = vsel %vm6504_vm2, -inf, %v1004_v31 }
 0x380   : > { %v5028_v2 = vpop.f32.mrf.mxu1  ;;  %v1165_v3 = vsel %vm1164_vm3, %v1156_v38, -inf }
 0x381   : > { %1166 = vmax.xlane.f32.xlu0 %v1165_v3 }
 0x382   : > { %v1007_v5 = vpop.f32.mrf.mxu1 }
 0x383   : > { %v1157_v7 = vsel %vm6512_vm4, -inf, %v1007_v5 }
 0x384   : > { %v5029_v8 = vpop.f32.mrf.mxu1  ;;  %v1168_v39 = vsel %vm1164_vm3, %v1157_v7, -inf }
 0x385   : > { %1169 = vmax.xlane.f32.xlu1 %v1168_v39 }
 0x386   : > { %v1051_v9 = vpop.f32.mrf.mxu1 }
 0x387   : > { %v1158_v47 = vsel %vm6504_vm2, -inf, %v1051_v9 }
 0x388   : > { %v5034_v10 = vpop.f32.mrf.mxu1  ;;  %v1171_v11 = vsel %vm1164_vm3, %v1158_v47, -inf }
 0x389   : > { %1172 = vmax.xlane.f32.xlu0 %v1171_v11 }
 0x38a   : > { %v1054_v12 = vpop.f32.mrf.mxu1 }
 0x38b   : > { %v1159_v13 = vsel %vm6512_vm4, -inf, %v1054_v12 }
 0x38c   : > { %v5035_v14 = vpop.f32.mrf.mxu1  ;;  %v1174_v16 = vsel %vm1164_vm3, %v1159_v13, -inf }
 0x38d   : > { %1175 = vmax.xlane.f32.xlu1 %v1174_v16 }
 0x38e   : > { %v1098_v17 = vpop.f32.mrf.mxu0 }
 0x38f   : > { %v1160_v18 = vsel %vm6504_vm2, -inf, %v1098_v17 }
 0x390   : > { %v5040_v19 = vpop.f32.mrf.mxu0  ;;  %v1177_v20 = vsel %vm1164_vm3, %v1160_v18, -inf }
 0x391   : > { %1178 = vmax.xlane.f32.xlu0 %v1177_v20 }
 0x392   : > { %v1101_v21 = vpop.f32.mrf.mxu0 }
 0x393   : > { %v1161_v24 = vsel %vm6512_vm4, -inf, %v1101_v21 }
 0x394   : > { %v5041_v25 = vpop.f32.mrf.mxu0  ;;  %v1180_v26 = vsel %vm1164_vm3, %v1161_v24, -inf }
 0x395   : > { %1181 = vmax.xlane.f32.xlu1 %v1180_v26 }
 0x396   : > { %v1145_v27 = vpop.f32.mrf.mxu1 }
 0x397   : > { %v1162_v33 = vsel %vm6504_vm2, -inf, %v1145_v27 }
 0x398   : > { %v5046_v34 = vpop.f32.mrf.mxu1  ;;  %v1183_v36 = vsel %vm1164_vm3, %v1162_v33, -inf }
 0x399   : > { %1184 = vmax.xlane.f32.xlu0 %v1183_v36 }
 0x39a   : > { %v1148_v37 = vpop.f32.mrf.mxu1 }
 0x39b   : > { %v1163_v40 = vsel %vm6512_vm4, -inf, %v1148_v37 }
 0x39c   : > { %v5047_v41 = vpop.f32.mrf.mxu1  ;;  %v1186_v42 = vsel %vm1164_vm3, %v1163_v40, -inf }
 0x39d   : > { %1187 = vmax.xlane.f32.xlu1 %v1186_v42 }
 0x40a   : > { %v1167_v43 = vpop.xlane.xlu0 %1166 }
 0x40b   : > { %v1189_v48 = vsub.f32 %v1156_v38, %v1167_v43 }
 0x40d   : > { %v1197_v49 = vmul.f32 1.442695, %v1189_v48 }
 0x40e   : > { %v1170_v50 = vpop.xlane.xlu1 %1169 }
 0x40f   : > { %5574 = vpow2.f32 %v1197_v49  ;;  %v1190_v51 = vsub.f32 %v1157_v7, %v1170_v50 }
 0x411   : > { %v1199_v52 = vmul.f32 1.442695, %v1190_v51 }
 0x412   : > { %v1173_v53 = vpop.xlane.xlu0 %1172 }
 0x413   : > { %5576 = vpow2.f32 %v1199_v52  ;;  %v1191_v54 = vsub.f32 %v1158_v47, %v1173_v53  ;;  %v6569_v52 = vpack.c.bf16 %v6501_v63, %v6448_v28 }
 0x415   : > { %v1201_v57 = vmul.f32 1.442695, %v1191_v54 }
 0x416   : > { %v1176_v58 = vpop.xlane.xlu1 %1175 }
 0x417   : > { %5578 = vpow2.f32 %v1201_v57  ;;  %v1192_v59 = vsub.f32 %v1159_v13, %v1176_v58 }
 0x419   : > { %v1203_v30 = vmul.f32 1.442695, %v1192_v59 }
 0x41a   : > { %v1179_v62 = vpop.xlane.xlu0 %1178 }
 0x41b   : > { %5580 = vpow2.f32 %v1203_v30  ;;  %v1193_v1 = vsub.f32 %v1160_v18, %v1179_v62 }
 0x41c   : > { %v5575_v31 = vpop.eup %5574 }
 0x41d   : > { %v1205_v2 = vmul.f32 1.442695, %v1193_v1  ;;  %v1213_v38 = vsel %vm1164_vm3, %v5575_v31, 0.0 }
 0x41e   : > { %v1182_v3 = vpop.xlane.xlu1 %1181  ;;  %1214 = vadd.xlane.f32.xlu0 %v1213_v38 }
 0x41f   : > { %5582 = vpow2.f32 %v1205_v2  ;;  %v1194_v5 = vsub.f32 %v1161_v24, %v1182_v3 }
 0x420   : > { %v5577_v7 = vpop.eup %5576 }
 0x421   : > { %v1207_v8 = vmul.f32 1.442695, %v1194_v5  ;;  %v1216_v39 = vsel %vm1164_vm3, %v5577_v7, 0.0 }
 0x422   : > { %v1185_v9 = vpop.xlane.xlu0 %1184  ;;  %1217 = vadd.xlane.f32.xlu1 %v1216_v39 }
 0x423   : > { %5584 = vpow2.f32 %v1207_v8  ;;  %v1195_v47 = vsub.f32 %v1162_v33, %v1185_v9 }
 0x424   : > { %v5579_v10 = vpop.eup %5578 }
 0x425   : > { %v1209_v11 = vmul.f32 1.442695, %v1195_v47  ;;  %v1219_v12 = vsel %vm1164_vm3, %v5579_v10, 0.0 }
 0x426   : > { %1220 = vadd.xlane.f32.xlu0 %v1219_v12  ;;  %v1188_v24 = vpop.xlane.xlu1 %1187 }
 0x427   : > { %5586 = vpow2.f32 %v1209_v11  ;;  %v1196_v25 = vsub.f32 %v1163_v40, %v1188_v24 }
 0x428   : > { %v5581_v13 = vpop.eup %5580 }
 0x429   : > { %v1222_v14 = vsel %vm1164_vm3, %v5581_v13, 0.0  ;;  %v1211_v26 = vmul.f32 1.442695, %v1196_v25 }
 0x42a   : > { %1223 = vadd.xlane.f32.xlu1 %v1222_v14 }
 0x42b   : > { %5588 = vpow2.f32 %v1211_v26 }
 0x42c   : > { %v5583_v16 = vpop.eup %5582 }
 0x42d   : > { %v1225_v17 = vsel %vm1164_vm3, %v5583_v16, 0.0 }
 0x42e   : > { %1226 = vadd.xlane.f32.xlu0 %v1225_v17 }
 0x430   : > { %v5585_v18 = vpop.eup %5584 }
 0x431   : > { %v1228_v19 = vsel %vm1164_vm3, %v5585_v18, 0.0 }
 0x432   : > { %1229 = vadd.xlane.f32.xlu1 %v1228_v19 }
 0x434   : > { %v6543_v20 = vpop.eup %5586 }
 0x435   : > { %v1231_v21 = vsel %vm1164_vm3, %v6543_v20, 0.0 }
 0x436   : > { %1232 = vadd.xlane.f32.xlu0 %v1231_v21 }
 0x438   : > { %v6557_v27 = vpop.eup %5588 }
 0x439   : > { %v1234_v33 = vsel %vm1164_vm3, %v6557_v27, 0.0 }
 0x443   : > { %1490 = vrot.lane.b32.xlu1 %v6452_v32, %s6112_s27 }
 0x447   : > { %1434 = vrot.lane.b32.xlu1 %v6450_v29, %s6112_s27 }
 0x44c   : > { %1437 = vrot.lane.b32.xlu0 %v6443_v15, %s6112_s27 }
 0x450   : > { %1487 = vrot.lane.b32.xlu0 %v6463_v44, %s6112_s27 }
 0x454   : > { %1540 = vrot.lane.b32.xlu0 %v6474_v55, %s6112_s27 }
 0x46b   : > { %1235 = vadd.xlane.f32.xlu1 %v1234_v33 }
 0x47c   : > { %1543 = vrot.lane.b32.xlu1 %v6465_v45, %s6112_s27 }
 0x480   : > { %1596 = vrot.lane.b32.xlu1 %v6476_v56, %s6112_s27 }
 0x484   : > { %1593 = vrot.lane.b32.xlu1 %v6489_v60, %s6112_s27 }
 0x4a7   : > { %v1215_v34 = vpop.xlane.xlu0 %1214 }
 0x4a8   : > { %5590 = vrcp.f32 %v1215_v34 }
 0x4ab   : > { %v1218_v36 = vpop.xlane.xlu1 %1217 }
 0x4ac   : > { %5592 = vrcp.f32 %v1218_v36 }
 0x4af   : > { %v1221_v37 = vpop.xlane.xlu0 %1220 }
 0x4b0   : > { %5594 = vrcp.f32 %v1221_v37 }
 0x4b3   : > { %v1224_v40 = vpop.xlane.xlu1 %1223 }
 0x4b4   : > { %5596 = vrcp.f32 %v1224_v40 }
 0x4b5   : > { %v5591_v41 = vpop.eup %5590 }
 0x4b6   : > { %v1245_v48 = vmul.f32 %v5591_v41, %v5575_v31 }
 0x4b7   : > { %v1227_v42 = vpop.xlane.xlu0 %1226 }
 0x4b8   : > { %5598 = vrcp.f32 %v1227_v42 }
 0x4b9   : > { %v5593_v43 = vpop.eup %5592 }
 0x4ba   : > { %v1246_v49 = vmul.f32 %v5593_v43, %v5577_v7 }
 0x4bb   : > { %v1230_v50 = vpop.xlane.xlu1 %1229 }
 0x4bc   : > { %5600 = vrcp.f32 %v1230_v50  ;;  %v1253_v51 = vpack.c.bf16 %v1246_v49, %v1245_v48 }
 0x4bd   : > { %v5595_v53 = vpop.eup %5594 }
 0x4be   : > { %5051 = vmatmul.mubr.msk.bf16.vlgmr.msra.gmra.mxu0 %vm1164_vm3, %v1253_v51  ;;  %v1247_v57 = vmul.f32 %v5595_v53, %v5579_v10 }
 0x4bf   : > { %5061 = vmatpush3.bf16.msra.mxu0 %v6569_v52  ;;  %5062 = vmatprep.mubr.msk.bf16.mxu0 %vm6111_vm0, %v6110_v46  ;;  %v1233_v30 = vpop.xlane.xlu0 %1232  ;;  %v1491_v3 = vpop.permute.xlu1 %1490 }
 0x4c0   : > { %5072 = vmatprep.subr.bf16.mxu0 %v6110_v46  ;;  %5602 = vrcp.f32 %v1233_v30 }
 0x4c1   : > { %v5597_v54 = vpop.eup %5596 }
 0x4c2   : > { %v1248_v58 = vmul.f32 %v5597_v54, %v5581_v13 }
 0x4c3   : > { %v1438_v31 = vpop.permute.xlu0 %1437  ;;  %v1435_v5 = vpop.permute.xlu1 %1434 }
 0x4c4   : > { %v1254_v59 = vpack.c.bf16 %v1248_v58, %v1247_v57  ;;  %v1443_v38 = vsel %vm963_vm1, %v1438_v31, 0 }
 0x4c5   : > { %v5599_v62 = vpop.eup %5598 }
 0x4c6   : > { %5057 = vmatmul.mubr.msk.bf16.vlgmr.msra.gmra.mxu1 %vm1164_vm3, %v1254_v59  ;;  %v1249_v63 = vmul.f32 %v5599_v62, %v5583_v16  ;;  %v1496_v16 = vsel %vm963_vm1, %v1491_v3, 0 }
 0x4c7   : > { %5067 = vmatpush3.bf16.msra.mxu1 %v6454_v35  ;;  %5068 = vmatprep.mubr.msk.bf16.mxu1 %vm6111_vm0, %v6110_v46  ;;  %v1488_v9 = vpop.permute.xlu0 %1487 }
 0x4c8   : > { %5078 = vmatprep.subr.bf16.mxu1 %v6110_v46 }
 0x4c9   : > { %v5601_v28 = vpop.eup %5600 }
 0x4ca   : > { %v1250_v1 = vmul.f32 %v5601_v28, %v5585_v18 }
 0x4cb   : > { %v1541_v10 = vpop.permute.xlu0 %1540 }
 0x4cc   : > { %v1255_v2 = vpack.c.bf16 %v1250_v1, %v1249_v63 }
 0x4cd   : > { %v5603_v47 = vpop.eup %5602 }
 0x4ce   : > { %5063 = vmatmul.mubr.msk.bf16.vlgmr.msra.gmra.mxu0 %vm1164_vm3, %v1255_v2  ;;  %v1251_v12 = vmul.f32 %v5603_v47, %v6543_v20 }
 0x4cf   : > { %5073 = vmatpush3.bf16.xpose.msra.mxu0 %v1443_v38  ;;  %5074 = vmatprep.mubr.msk.bf16.mxu0 %vm6111_vm0, %v6110_v46 }
 0x4d0   : > { %5084 = vmatprep.subr.bf16.mxu0 %v6110_v46 }
 0x4d6   : > { %5075 = vmatmul.mubr.msk.bf16.vlgmr.msra.gmra.mxu0 %vm963_vm1, %v1435_v5 }
 0x4d7   : > { %5086 = vmatprep.mubr.msk.bf16.mxu0 %vm6111_vm0, %v6110_v46 }
 0x4f4   : > { %v1236_v7 = vpop.xlane.xlu1 %1235 }
 0x4f5   : > { %5604 = vrcp.f32 %v1236_v7 }
 0x4f8   : > { %v1544_v8 = vpop.permute.xlu1 %1543 }
 0x4f9   : > { %v1549_v39 = vsel %vm963_vm1, %v1544_v8, 0 }
 0x4fa   : > { %5085 = vmatpush3.bf16.xpose.msra.mxu0 %v1549_v39 }
 0x4fb   : > { %5096 = vmatprep.subr.bf16.mxu0 %v6110_v46 }
 0x4fc   : > { %v1597_v17 = vpop.permute.xlu1 %1596 }
 0x4fd   : > { %v1602_v18 = vsel %vm963_vm1, %v1597_v17, 0 }
 0x500   : > { %v1594_v19 = vpop.permute.xlu1 %1593 }
 0x501   : > { %5087 = vmatmul.mubr.msk.bf16.vlgmr.msra.gmra.mxu0 %vm963_vm1, %v1541_v10 }
 0x502   : > { %v5605_v11 = vpop.eup %5604  ;;  %5098 = vmatprep.mubr.msk.bf16.mxu0 %vm6111_vm0, %v6110_v46 }
 0x503   : > { %v1252_v13 = vmul.f32 %v5605_v11, %v6557_v27 }
 0x505   : > { %v1256_v14 = vpack.c.bf16 %v1252_v13, %v1251_v12 }
 0x507   : > { %5069 = vmatmul.mubr.msk.bf16.vlgmr.msra.gmra.mxu1 %vm1164_vm3, %v1256_v14 }
 0x508   : > { %5079 = vmatpush3.bf16.xpose.msra.mxu1 %v1496_v16  ;;  %5080 = vmatprep.mubr.msk.bf16.mxu1 %vm6111_vm0, %v6110_v46 }
 0x509   : > { %5090 = vmatprep.subr.bf16.mxu1 %v6110_v46 }
 0x50f   : > { %5081 = vmatmul.mubr.msk.bf16.vlgmr.msra.gmra.mxu1 %vm963_vm1, %v1488_v9 }
 0x510   : > { %5091 = vmatpush3.bf16.xpose.msra.mxu1 %v1602_v18  ;;  %5092 = vmatprep.mubr.msk.bf16.mxu1 %vm6111_vm0, %v6110_v46 }
 0x511   : > { %5102 = vmatprep.subr.bf16.mxu1 %v6110_v46 }
 0x517   : > { %5093 = vmatmul.mubr.msk.bf16.vlgmr.msra.gmra.mxu1 %vm963_vm1, %v1594_v19 }
 0x518   : > { %5104 = vmatprep.mubr.msk.bf16.mxu1 %vm6111_vm0, %v6110_v46 }
 0x57e   : > { %v6609_v20 = vpop.f32.mrf.mxu0 }
 0x580   : > { %v5052_v21 = vpop.f32.mrf.mxu0 }
 0x582   : > { %v6611_v24 = vpop.f32.mrf.mxu0 }
 0x584   : > { %v5053_v25 = vpop.f32.mrf.mxu0 }
 0x586   : > { %v6613_v26 = vpop.f32.mrf.mxu1 }
 0x588   : > { %v5058_v27 = vpop.f32.mrf.mxu1 }
 0x58a   : > { %v6615_v33 = vpop.f32.mrf.mxu1 }
 0x58c   : > { %v5059_v34 = vpop.f32.mrf.mxu1 }
 0x58e   : > { %v6617_v36 = vpop.f32.mrf.mxu0 }
 0x590   : > { %v5064_v37 = vpop.f32.mrf.mxu0 }
 0x592   : > { %v6619_v40 = vpop.f32.mrf.mxu0 }
 0x594   : > { %v5065_v41 = vpop.f32.mrf.mxu0 }
 0x596   : > { %v1479_v42 = vpop.f32.mrf.mxu0 }
 0x597   : > { %v1645_v43 = vsel %vm6504_vm2, -inf, %v1479_v42 }
 0x598   : > { %v5076_v48 = vpop.f32.mrf.mxu0  ;;  %v1653_v49 = vsel %vm1164_vm3, %v1645_v43, -inf }
 0x599   : > { %1654 = vmax.xlane.f32.xlu0 %v1653_v49 }
 0x59a   : > { %v1482_v50 = vpop.f32.mrf.mxu0 }
 0x59b   : > { %v1646_v51 = vsel %vm6512_vm4, -inf, %v1482_v50 }
 0x59c   : > { %v5077_v53 = vpop.f32.mrf.mxu0  ;;  %v1656_v54 = vsel %vm1164_vm3, %v1646_v51, -inf }
 0x59d   : > { %1657 = vmax.xlane.f32.xlu1 %v1656_v54 }
 0x5c1   : > { %v1585_v57 = vpop.f32.mrf.mxu0 }
 0x5c2   : > { %v1649_v10 = vsel %vm6504_vm2, -inf, %v1585_v57 }
 0x5c3   : > { %v5088_v58 = vpop.f32.mrf.mxu0  ;;  %v1665_v13 = vsel %vm1164_vm3, %v1649_v10, -inf }
 0x5c5   : > { %v1588_v59 = vpop.f32.mrf.mxu0 }
 0x5c6   : > { %v1650_v30 = vsel %vm6512_vm4, -inf, %v1588_v59 }
 0x5c7   : > { %v6629_v62 = vpop.f32.mrf.mxu1  ;;  %v5089_v28 = vpop.f32.mrf.mxu0  ;;  %v1668_v63 = vsel %vm1164_vm3, %v1650_v30, -inf }
 0x5c8   : > { %1669 = vmax.xlane.f32.xlu1 %v1668_v63 }
 0x5c9   : > { %v5070_v1 = vpop.f32.mrf.mxu1 }
 0x5cb   : > { %v6632_v31 = vpop.f32.mrf.mxu1 }
 0x5cd   : > { %v5071_v2 = vpop.f32.mrf.mxu1 }
 0x5cf   : > { %v1532_v38 = vpop.f32.mrf.mxu1 }
 0x5d0   : > { %v1647_v3 = vsel %vm6504_vm2, -inf, %v1532_v38 }
 0x5d1   : > { %v5082_v5 = vpop.f32.mrf.mxu1  ;;  %v1659_v7 = vsel %vm1164_vm3, %v1647_v3, -inf }
 0x5d2   : > { %1660 = vmax.xlane.f32.xlu0 %v1659_v7 }
 0x5d3   : > { %v1535_v8 = vpop.f32.mrf.mxu1 }
 0x5d4   : > { %v1648_v39 = vsel %vm6512_vm4, -inf, %v1535_v8 }
 0x5d5   : > { %v5083_v9 = vpop.f32.mrf.mxu1  ;;  %v1662_v47 = vsel %vm1164_vm3, %v1648_v39, -inf }
 0x5d6   : > { %1663 = vmax.xlane.f32.xlu0 %v1662_v47 }
 0x5d7   : > { %v1638_v11 = vpop.f32.mrf.mxu1 }
 0x5d8   : > { %v1651_v14 = vsel %vm6504_vm2, -inf, %v1638_v11 }
 0x5d9   : > { %1794 = vrot.lane.b32.xlu1 %v6491_v61, %s6112_s27  ;;  %v5094_v12 = vpop.f32.mrf.mxu1  ;;  %v1671_v18 = vsel %vm1164_vm3, %v1651_v14, -inf }
 0x5da   : > { %1666 = vmax.xlane.f32.xlu0 %v1665_v13 }
 0x5db   : > { %v1641_v16 = vpop.f32.mrf.mxu1 }
 0x5dc   : > { %v6654_v19 = vsel %vm6512_vm4, -inf, %v1641_v16 }
 0x5dd   : > { %1842 = vrot.lane.b32.xlu1 %v6569_v52, %s6112_s27  ;;  %v5095_v17 = vpop.f32.mrf.mxu1  ;;  %v1674_v21 = vsel %vm1164_vm3, %v6654_v19, -inf }
 0x5de   : > { %1672 = vmax.xlane.f32.xlu0 %v1671_v18 }
 0x5f4   : > { %1746 = vrot.lane.b32.xlu0 %v6478_v22, %s6112_s27 }
 0x601   : > { %1675 = vmax.xlane.f32.xlu1 %v1674_v21 }
 0x612   : > { %1890 = vrot.lane.b32.xlu1 %v6454_v35, %s6112_s27 }
 0x622   : > { %v1655_v25 = vpop.xlane.xlu0 %1654 }
 0x623   : > { %v1677_v27 = vsub.f32 %v1645_v43, %v1655_v25 }
 0x625   : > { %v1685_v34 = vmul.f32 1.442695, %v1677_v27 }
 0x626   : > { %v1658_v37 = vpop.xlane.xlu1 %1657 }
 0x627   : > { %5606 = vpow2.f32 %v1685_v34  ;;  %v1678_v41 = vsub.f32 %v1646_v51, %v1658_v37 }
 0x629   : > { %v1687_v42 = vmul.f32 1.442695, %v1678_v41 }
 0x62b   : > { %5608 = vpow2.f32 %v1687_v42 }
 0x634   : > { %v6660_v48 = vpop.eup %5606 }
 0x635   : > { %v1701_v49 = vsel %vm1164_vm3, %v6660_v48, 0.0 }
 0x636   : > { %1702 = vadd.xlane.f32.xlu0 %v1701_v49 }
 0x638   : > { %v6664_v50 = vpop.eup %5608 }
 0x639   : > { %v1704_v53 = vsel %vm1164_vm3, %v6664_v50, 0.0 }
 0x63a   : > { %1705 = vadd.xlane.f32.xlu1 %v1704_v53 }
 0x651   : > { %v1670_v54 = vpop.xlane.xlu1 %1669 }
 0x652   : > { %v1682_v58 = vsub.f32 %v1650_v30, %v1670_v54 }
 0x654   : > { %v1695_v1 = vmul.f32 1.442695, %v1682_v58 }
 0x655   : > { %v1795_v43 = vpop.permute.xlu1 %1794 }
 0x656   : > { %5103 = vmatpush3.bf16.msra.mxu1 %v1795_v43 }
 0x657   : > { %5114 = vmatprep.subr.bf16.mxu1 %v6110_v46 }
 0x659   : > { %v1843_v21 = vpop.permute.xlu1 %1842 }
 0x65b   : > { %v1661_v51 = vpop.xlane.xlu0 %1660 }
 0x65c   : > { %v1679_v57 = vsub.f32 %v1647_v3, %v1661_v51 }
 0x65e   : > { %v1689_v59 = vmul.f32 1.442695, %v1679_v57 }
 0x65f   : > { %v1664_v28 = vpop.xlane.xlu0 %1663 }
 0x660   : > { %5610 = vpow2.f32 %v1689_v59  ;;  %v1680_v63 = vsub.f32 %v1648_v39, %v1664_v28 }
 0x662   : > { %v1691_v2 = vmul.f32 1.442695, %v1680_v63 }
 0x663   : > { %v1667_v38 = vpop.xlane.xlu0 %1666 }
 0x664   : > { %5612 = vpow2.f32 %v1691_v2  ;;  %v1681_v5 = vsub.f32 %v1649_v10, %v1667_v38 }
 0x665   : > { %5614 = vpow2.f32 %v1695_v1 }
 0x666   : > { %v1693_v7 = vmul.f32 1.442695, %v1681_v5 }
 0x667   : > { %v1673_v8 = vpop.xlane.xlu0 %1672 }
 0x668   : > { %5616 = vpow2.f32 %v1693_v7  ;;  %v1683_v9 = vsub.f32 %v1651_v14, %v1673_v8 }
 0x66a   : > { %v1697_v47 = vmul.f32 1.442695, %v1683_v9 }
 0x66b   : > { %v1747_v11 = vpop.permute.xlu0 %1746 }
 0x66c   : > { %5618 = vpow2.f32 %v1697_v47  ;;  %5097 = vmatpush3.bf16.msra.mxu0 %v1747_v11 }
 0x66d   : > { %v5611_v3 = vpop.eup %5610  ;;  %5108 = vmatprep.subr.bf16.mxu0 %v6110_v46 }
 0x66e   : > { %v1707_v30 = vsel %vm1164_vm3, %v5611_v3, 0.0 }
 0x66f   : > { %1708 = vadd.xlane.f32.xlu0 %v1707_v30 }
 0x671   : > { %v5613_v39 = vpop.eup %5612 }
 0x672   : > { %v1710_v12 = vsel %vm1164_vm3, %v5613_v39, 0.0  ;;  %v5615_v13 = vpop.eup %5614 }
 0x673   : > { %1711 = vadd.xlane.f32.xlu1 %v1710_v12  ;;  %v1716_v14 = vsel %vm1164_vm3, %v5615_v13, 0.0 }
 0x675   : > { %v5617_v10 = vpop.eup %5616 }
 0x676   : > { %v1713_v16 = vsel %vm1164_vm3, %v5617_v10, 0.0 }
 0x677   : > { %1714 = vadd.xlane.f32.xlu0 %v1713_v16  ;;  %1717 = vadd.xlane.f32.xlu1 %v1716_v14 }
 0x679   : > { %v6674_v17 = vpop.eup %5618 }
 0x67a   : > { %v1719_v18 = vsel %vm1164_vm3, %v6674_v17, 0.0 }
 0x67b   : > { %1720 = vadd.xlane.f32.xlu0 %v1719_v18 }
 0x688   : > { %1990 = vrot.lane.b32.xlu1 %v6452_v32, %s6113_s12 }
 0x68a   : > { %v1676_v25 = vpop.xlane.xlu1 %1675 }
 0x68b   : > { %v1684_v27 = vsub.f32 %v6654_v19, %v1676_v25 }
 0x68d   : > { %v1699_v34 = vmul.f32 1.442695, %v1684_v27 }
 0x68e   : > { %v1891_v19 = vpop.permute.xlu1 %1890 }
 0x68f   : > { %5620 = vpow2.f32 %v1699_v34 }
 0x691   : > { %1939 = vrot.lane.b32.xlu0 %v6443_v15, %s6113_s12 }
 0x695   : > { %1937 = vrot.lane.b32.xlu0 %v6450_v29, %s6113_s12 }
 0x699   : > { %1988 = vrot.lane.b32.xlu0 %v6463_v44, %s6113_s12 }
 0x69c   : > { %v6689_v37 = vpop.eup %5620 }
 0x69d   : > { %2039 = vrot.lane.b32.xlu0 %v6474_v55, %s6113_s12  ;;  %v1722_v41 = vsel %vm1164_vm3, %v6689_v37, 0.0 }
 0x6ac   : > { %1723 = vadd.xlane.f32.xlu1 %v1722_v41 }
 0x6bd   : > { %2041 = vrot.lane.b32.xlu1 %v6465_v45, %s6113_s12 }
 0x6bf   : > { %v1703_v42 = vpop.xlane.xlu0 %1702 }
 0x6c0   : > { %5622 = vrcp.f32 %v1703_v42 }
 0x6c1   : > { %2092 = vrot.lane.b32.xlu1 %v6476_v56, %s6113_s12 }
 0x6c3   : > { %v1706_v49 = vpop.xlane.xlu1 %1705 }
 0x6c4   : > { %5624 = vrcp.f32 %v1706_v49 }
 0x6c5   : > { %2090 = vrot.lane.b32.xlu1 %v6489_v60, %s6113_s12 }
 0x6cd   : > { %v5623_v53 = vpop.eup %5622 }
 0x6ce   : > { %v1733_v43 = vmul.f32 %v5623_v53, %v6660_v48 }
 0x6d1   : > { %v5625_v54 = vpop.eup %5624 }
 0x6d2   : > { %v1734_v51 = vmul.f32 %v5625_v54, %v6664_v50 }
 0x6d4   : > { %v1741_v57 = vpack.c.bf16 %v1734_v51, %v1733_v43 }
 0x6d6   : > { %5099 = vmatmul.mubr.msk.bf16.vlgmr.msra.gmra.mxu0 %vm1164_vm3, %v1741_v57 }
 0x6d7   : > { %5109 = vmatpush3.bf16.msra.mxu0 %v1843_v21  ;;  %5110 = vmatprep.mubr.msk.bf16.mxu0 %vm6111_vm0, %v6110_v46 }
 0x6d8   : > { %5120 = vmatprep.subr.bf16.mxu0 %v6110_v46 }
 0x6f8   : > { %v1709_v58 = vpop.xlane.xlu0 %1708 }
 0x6f9   : > { %5626 = vrcp.f32 %v1709_v58 }
 0x6fc   : > { %v1712_v59 = vpop.xlane.xlu1 %1711 }
 0x6fd   : > { %5628 = vrcp.f32 %v1712_v59 }
 0x700   : > { %v1715_v28 = vpop.xlane.xlu0 %1714  ;;  %v1718_v63 = vpop.xlane.xlu1 %1717 }
 0x701   : > { %5630 = vrcp.f32 %v1715_v28 }
 0x702   : > { %5632 = vrcp.f32 %v1718_v63 }
 0x704   : > { %v1721_v50 = vpop.xlane.xlu0 %1720 }
 0x705   : > { %5634 = vrcp.f32 %v1721_v50 }
 0x706   : > { %v5627_v48 = vpop.eup %5626 }
 0x707   : > { %v1735_v2 = vmul.f32 %v5627_v48, %v5611_v3 }
 0x708   : > { %v1940_v11 = vpop.permute.xlu0 %1939 }
 0x709   : > { %v1945_v12 = vsel %vm963_vm1, %v1940_v11, 0 }
 0x70a   : > { %v5629_v1 = vpop.eup %5628 }
 0x70b   : > { %v1736_v38 = vmul.f32 %v5629_v1, %v5613_v39  ;;  %v1991_v39 = vpop.permute.xlu1 %1990 }
 0x70c   : > { %v1938_v3 = vpop.permute.xlu0 %1937 }
 0x70d   : > { %v1742_v5 = vpack.c.bf16 %v1736_v38, %v1735_v2 }
 0x70e   : > { %v5631_v7 = vpop.eup %5630 }
 0x70f   : > { %v5633_v8 = vpop.eup %5632  ;;  %5105 = vmatmul.mubr.msk.bf16.vlgmr.msra.gmra.mxu1 %vm1164_vm3, %v1742_v5  ;;  %v1737_v9 = vmul.f32 %v5631_v7, %v5617_v10 }
 0x710   : > { %5115 = vmatpush3.bf16.msra.mxu1 %v1891_v19  ;;  %v1738_v47 = vmul.f32 %v5633_v8, %v5615_v13  ;;  %5116 = vmatprep.mubr.msk.bf16.mxu1 %vm6111_vm0, %v6110_v46  ;;  %v1989_v14 = vpop.permute.xlu0 %1988  ;;  %v1996_v19 = vsel %vm963_vm1, %v1991_v39, 0 }
 0x711   : > { %5126 = vmatprep.subr.bf16.mxu1 %v6110_v46 }
 0x712   : > { %v1743_v30 = vpack.c.bf16 %v1738_v47, %v1737_v9  ;;  %v5635_v18 = vpop.eup %5634 }
 0x713   : > { %v1739_v27 = vmul.f32 %v5635_v18, %v6674_v17 }
 0x714   : > { %5111 = vmatmul.mubr.msk.bf16.vlgmr.msra.gmra.mxu0 %vm1164_vm3, %v1743_v30  ;;  %v2040_v21 = vpop.permute.xlu0 %2039 }
 0x715   : > { %5121 = vmatpush3.bf16.xpose.msra.mxu0 %v1945_v12  ;;  %5122 = vmatprep.mubr.msk.bf16.mxu0 %vm6111_vm0, %v6110_v46 }
 0x716   : > { %5132 = vmatprep.subr.bf16.mxu0 %v6110_v46 }
 0x71c   : > { %5123 = vmatmul.mubr.msk.bf16.vlgmr.msra.gmra.mxu0 %vm963_vm1, %v1938_v3 }
 0x71d   : > { %5134 = vmatprep.mubr.msk.bf16.mxu0 %vm6111_vm0, %v6110_v46 }
 0x735   : > { %v1724_v13 = vpop.xlane.xlu1 %1723 }
 0x736   : > { %5636 = vrcp.f32 %v1724_v13 }
 0x739   : > { %v2042_v10 = vpop.permute.xlu1 %2041 }
 0x73a   : > { %v2047_v16 = vsel %vm963_vm1, %v2042_v10, 0 }
 0x73b   : > { %5133 = vmatpush3.bf16.xpose.msra.mxu0 %v2047_v16 }
 0x73c   : > { %5144 = vmatprep.subr.bf16.mxu0 %v6110_v46 }
 0x73d   : > { %v2093_v42 = vpop.permute.xlu1 %2092 }
 0x73e   : > { %v2098_v49 = vsel %vm963_vm1, %v2093_v42, 0 }
 0x741   : > { %v2091_v17 = vpop.permute.xlu1 %2090 }
 0x742   : > { %5135 = vmatmul.mubr.msk.bf16.vlgmr.msra.gmra.mxu0 %vm963_vm1, %v2040_v21 }
 0x743   : > { %v5637_v25 = vpop.eup %5636  ;;  %5146 = vmatprep.mubr.msk.bf16.mxu0 %vm6111_vm0, %v6110_v46 }
 0x744   : > { %v1740_v34 = vmul.f32 %v5637_v25, %v6689_v37 }
 0x746   : > { %v1744_v41 = vpack.c.bf16 %v1740_v34, %v1739_v27 }
 0x748   : > { %5117 = vmatmul.mubr.msk.bf16.vlgmr.msra.gmra.mxu1 %vm1164_vm3, %v1744_v41 }
 0x749   : > { %5127 = vmatpush3.bf16.xpose.msra.mxu1 %v1996_v19  ;;  %5128 = vmatprep.mubr.msk.bf16.mxu1 %vm6111_vm0, %v6110_v46 }
 0x74a   : > { %5138 = vmatprep.subr.bf16.mxu1 %v6110_v46 }
 0x750   : > { %5129 = vmatmul.mubr.msk.bf16.vlgmr.msra.gmra.mxu1 %vm963_vm1, %v1989_v14 }
 0x751   : > { %5139 = vmatpush3.bf16.xpose.msra.mxu1 %v2098_v49  ;;  %5140 = vmatprep.mubr.msk.bf16.mxu1 %vm6111_vm0, %v6110_v46 }
 0x752   : > { %5150 = vmatprep.subr.bf16.mxu1 %v6110_v46 }
 0x758   : > { %5141 = vmatmul.mubr.msk.bf16.vlgmr.msra.gmra.mxu1 %vm963_vm1, %v2091_v17 }
 0x759   : > { %5152 = vmatprep.mubr.msk.bf16.mxu1 %vm6111_vm0, %v6110_v46 }
 0x796   : > { %v6737_v37 = vpop.f32.mrf.mxu0 }
 0x798   : > { %v5100_v53 = vpop.f32.mrf.mxu0 }
 0x79a   : > { %v6739_v54 = vpop.f32.mrf.mxu0 }
 0x79b   : > { %v5378_v43 = vpack.i.bf16 %v6739_v54, %v6737_v37 }
 0x79c   : > { %v5101_v51 = vpop.f32.mrf.mxu0 }
 0x7cf   : > { %v6743_v57 = vpop.f32.mrf.mxu1 }
 0x7d1   : > { %v5106_v58 = vpop.f32.mrf.mxu1 }
 0x7d3   : > { %v6745_v59 = vpop.f32.mrf.mxu1 }
 0x7d4   : > { %v5383_v28 = vpack.i.bf16 %v6745_v59, %v6743_v57  ;;  %v6749_v63 = vpop.f32.mrf.mxu0 }
 0x7d5   : > { %v5107_v48 = vpop.f32.mrf.mxu1 }
 0x7d6   : > { %v5112_v1 = vpop.f32.mrf.mxu0 }
 0x7d8   : > { %v6751_v50 = vpop.f32.mrf.mxu0 }
 0x7d9   : > { %v5408_v2 = vpack.i.bf16 %v6751_v50, %v6749_v63 }
 0x7da   : > { %v5113_v38 = vpop.f32.mrf.mxu0 }
 0x7dc   : > { %v1981_v5 = vpop.f32.mrf.mxu0 }
 0x7dd   : > { %v2141_v7 = vsel %vm6504_vm2, -inf, %v1981_v5 }
 0x7de   : > { %v5124_v8 = vpop.f32.mrf.mxu0  ;;  %v2149_v9 = vsel %vm1164_vm3, %v2141_v7, -inf }
 0x7df   : > { %2150 = vmax.xlane.f32.xlu0 %v2149_v9 }
 0x7e0   : > { %v1984_v47 = vpop.f32.mrf.mxu0 }
 0x7e1   : > { %v2142_v11 = vsel %vm6512_vm4, -inf, %v1984_v47 }
 0x7e2   : > { %v5125_v30 = vpop.f32.mrf.mxu0  ;;  %v2152_v12 = vsel %vm1164_vm3, %v2142_v11, -inf }
 0x7e3   : > { %2153 = vmax.xlane.f32.xlu1 %v2152_v12 }
 0x802   : > { %v2083_v3 = vpop.f32.mrf.mxu0 }
 0x803   : > { %v2145_v48 = vsel %vm6504_vm2, -inf, %v2083_v3 }
 0x804   : > { %v5136_v39 = vpop.f32.mrf.mxu0  ;;  %v2161_v5 = vsel %vm1164_vm3, %v2145_v48, -inf }
 0x806   : > { %v2086_v13 = vpop.f32.mrf.mxu0 }
 0x807   : > { %v2146_v10 = vsel %vm6512_vm4, -inf, %v2086_v13 }
 0x808   : > { %v6763_v16 = vpop.f32.mrf.mxu1  ;;  %v5137_v14 = vpop.f32.mrf.mxu0  ;;  %v2164_v18 = vsel %vm1164_vm3, %v2146_v10, -inf }
 0x809   : > { %2165 = vmax.xlane.f32.xlu1 %v2164_v18 }
 0x80a   : > { %v5118_v21 = vpop.f32.mrf.mxu1 }
 0x80c   : > { %v6766_v25 = vpop.f32.mrf.mxu1 }
 0x80d   : > { %v5413_v27 = vpack.i.bf16 %v6766_v25, %v6763_v16 }
 0x80e   : > { %v5119_v34 = vpop.f32.mrf.mxu1 }
 0x810   : > { %v2032_v41 = vpop.f32.mrf.mxu1 }
 0x811   : > { %v2143_v19 = vsel %vm6504_vm2, -inf, %v2032_v41 }
 0x812   : > { %v5130_v42 = vpop.f32.mrf.mxu1  ;;  %v2155_v49 = vsel %vm1164_vm3, %v2143_v19, -inf }
 0x813   : > { %2156 = vmax.xlane.f32.xlu0 %v2155_v49 }
 0x814   : > { %v2035_v17 = vpop.f32.mrf.mxu1 }
 0x815   : > { %v2144_v53 = vsel %vm6512_vm4, -inf, %v2035_v17 }
 0x816   : > { %v5131_v51 = vpop.f32.mrf.mxu1  ;;  %v2158_v58 = vsel %vm1164_vm3, %v2144_v53, -inf }
 0x817   : > { %2159 = vmax.xlane.f32.xlu0 %v2158_v58 }
 0x818   : > { %v2134_v1 = vpop.f32.mrf.mxu1 }
 0x819   : > { %v2147_v8 = vsel %vm6504_vm2, -inf, %v2134_v1 }
 0x81a   : > { %v5142_v38 = vpop.f32.mrf.mxu1  ;;  %v2167_v12 = vsel %vm1164_vm3, %v2147_v8, -inf }
 0x81b   : > { %2162 = vmax.xlane.f32.xlu0 %v2161_v5 }
 0x81c   : > { %v2137_v9 = vpop.f32.mrf.mxu1 }
 0x81d   : > { %v2148_v47 = vsel %vm6512_vm4, -inf, %v2137_v9 }
 0x81e   : > { %v5143_v30 = vpop.f32.mrf.mxu1  ;;  %v2170_v39 = vsel %vm1164_vm3, %v2148_v47, -inf }
 0x81f   : > { %2168 = vmax.xlane.f32.xlu0 %v2167_v12  ;;  %2171 = vmax.xlane.f32.xlu1 %v2170_v39 }
 0x830   : > { %2288 = vrot.lane.b32.xlu1 %v6491_v61, %s6113_s12 }
 0x834   : > { %2335 = vrot.lane.b32.xlu1 %v6569_v52, %s6113_s12 }
 0x835   : > { %2241 = vrot.lane.b32.xlu0 %v6478_v22, %s6113_s12 }
 0x838   : > { %2382 = vrot.lane.b32.xlu1 %v6454_v35, %s6113_s12 }
 0x868   : > { %v2151_v3 = vpop.xlane.xlu0 %2150 }
 0x869   : > { %v2173_v13 = vsub.f32 %v2141_v7, %v2151_v3 }
 0x86b   : > { %v2181_v14 = vmul.f32 1.442695, %v2173_v13 }
 0x86c   : > { %v2154_v18 = vpop.xlane.xlu1 %2153 }
 0x86d   : > { %5638 = vpow2.f32 %v2181_v14  ;;  %v2174_v21 = vsub.f32 %v2142_v11, %v2154_v18 }
 0x86f   : > { %v2183_v34 = vmul.f32 1.442695, %v2174_v21 }
 0x871   : > { %5640 = vpow2.f32 %v2183_v34 }
 0x87a   : > { %v6793_v41 = vpop.eup %5638 }
 0x87b   : > { %v2197_v42 = vsel %vm1164_vm3, %v6793_v41, 0.0 }
 0x87c   : > { %2198 = vadd.xlane.f32.xlu0 %v2197_v42 }
 0x87e   : > { %v6797_v49 = vpop.eup %5640 }
 0x87f   : > { %v2200_v17 = vsel %vm1164_vm3, %v6797_v49, 0.0 }
 0x880   : > { %2201 = vadd.xlane.f32.xlu1 %v2200_v17 }
 0x892   : > { %v2166_v51 = vpop.xlane.xlu1 %2165 }
 0x893   : > { %v2178_v1 = vsub.f32 %v2146_v10, %v2166_v51 }
 0x895   : > { %v2191_v9 = vmul.f32 1.442695, %v2178_v1 }
 0x89c   : > { %v2157_v7 = vpop.xlane.xlu0 %2156 }
 0x89d   : > { %v2175_v58 = vsub.f32 %v2143_v19, %v2157_v7 }
 0x89f   : > { %v2185_v38 = vmul.f32 1.442695, %v2175_v58 }
 0x8a0   : > { %v2160_v11 = vpop.xlane.xlu0 %2159 }
 0x8a1   : > { %5642 = vpow2.f32 %v2185_v38  ;;  %v2176_v5 = vsub.f32 %v2144_v53, %v2160_v11 }
 0x8a3   : > { %v2187_v30 = vmul.f32 1.442695, %v2176_v5 }
 0x8a4   : > { %v2163_v12 = vpop.xlane.xlu0 %2162 }
 0x8a5   : > { %5644 = vpow2.f32 %v2187_v30  ;;  %v2177_v39 = vsub.f32 %v2145_v48, %v2163_v12 }
 0x8a6   : > { %5646 = vpow2.f32 %v2191_v9 }
 0x8a7   : > { %v2189_v3 = vmul.f32 1.442695, %v2177_v39 }
 0x8a8   : > { %v2169_v13 = vpop.xlane.xlu0 %2168  ;;  %v2172_v14 = vpop.xlane.xlu1 %2171 }
 0x8a9   : > { %5648 = vpow2.f32 %v2189_v3  ;;  %v2179_v18 = vsub.f32 %v2147_v8, %v2169_v13  ;;  %v2180_v21 = vsub.f32 %v2148_v47, %v2172_v14 }
 0x8ab   : > { %v2193_v34 = vmul.f32 1.442695, %v2179_v18  ;;  %v2195_v42 = vmul.f32 1.442695, %v2180_v21 }
 0x8ac   : > { %v2242_v19 = vpop.permute.xlu0 %2241  ;;  %v2289_v10 = vpop.permute.xlu1 %2288 }
 0x8ad   : > { %5650 = vpow2.f32 %v2193_v34  ;;  %5145 = vmatpush3.bf16.msra.mxu0 %v2242_v19  ;;  %5151 = vmatpush3.bf16.msra.mxu1 %v2289_v10 }
 0x8ae   : > { %v5643_v53 = vpop.eup %5642  ;;  %5652 = vpow2.f32 %v2195_v42  ;;  %5156 = vmatprep.subr.bf16.mxu0 %v6110_v46  ;;  %5162 = vmatprep.subr.bf16.mxu1 %v6110_v46 }
 0x8af   : > { %v2203_v48 = vsel %vm1164_vm3, %v5643_v53, 0.0 }
 0x8b0   : > { %2204 = vadd.xlane.f32.xlu0 %v2203_v48 }
 0x8b2   : > { %v5645_v17 = vpop.eup %5644 }
 0x8b3   : > { %v2206_v8 = vsel %vm1164_vm3, %v5645_v17, 0.0  ;;  %v5647_v47 = vpop.eup %5646 }
 0x8b4   : > { %2207 = vadd.xlane.f32.xlu1 %v2206_v8  ;;  %v2212_v58 = vsel %vm1164_vm3, %v5647_v47, 0.0 }
 0x8b6   : > { %v5649_v51 = vpop.eup %5648 }
 0x8b7   : > { %v2209_v7 = vsel %vm1164_vm3, %v5649_v51, 0.0 }
 0x8b8   : > { %2210 = vadd.xlane.f32.xlu0 %v2209_v7  ;;  %2213 = vadd.xlane.f32.xlu1 %v2212_v58 }
 0x8ba   : > { %v5651_v1 = vpop.eup %5650 }
 0x8bb   : > { %v6807_v38 = vpop.eup %5652  ;;  %v2215_v11 = vsel %vm1164_vm3, %v5651_v1, 0.0 }
 0x8bc   : > { %2216 = vadd.xlane.f32.xlu0 %v2215_v11  ;;  %v2218_v5 = vsel %vm1164_vm3, %v6807_v38, 0.0 }
 0x8bd   : > { %2219 = vadd.xlane.f32.xlu1 %v2218_v5 }
 0x8ce   : > { %2482 = vrot.lane.b32.xlu1 %v6452_v32, %s6114_s22  ;;  %v2336_v32 = vpop.permute.xlu1 %2335 }
 0x8d2   : > { %2480 = vrot.lane.b32.xlu1 %v6463_v44, %s6114_s22  ;;  %2431 = vrot.lane.b32.xlu0 %v6443_v15, %s6114_s22  ;;  %v2383_v44 = vpop.permute.xlu1 %2382 }
 0x8d6   : > { %2584 = vrot.lane.b32.xlu1 %v6476_v56, %s6114_s22  ;;  %2429 = vrot.lane.b32.xlu0 %v6450_v29, %s6114_s22 }
 0x8da   : > { %2582 = vrot.lane.b32.xlu1 %v6489_v60, %s6114_s22  ;;  %2533 = vrot.lane.b32.xlu0 %v6465_v45, %s6114_s22 }
 0x8de   : > { %2531 = vrot.lane.b32.xlu0 %v6474_v55, %s6114_s22 }
 0x905   : > { %v2199_v9 = vpop.xlane.xlu0 %2198 }
 0x906   : > { %5654 = vrcp.f32 %v2199_v9 }
 0x909   : > { %v2202_v15 = vpop.xlane.xlu1 %2201 }
 0x90a   : > { %5656 = vrcp.f32 %v2202_v15 }
 0x913   : > { %v5655_v30 = vpop.eup %5654 }
 0x914   : > { %v2229_v12 = vmul.f32 %v5655_v30, %v6793_v41 }
 0x917   : > { %v5657_v56 = vpop.eup %5656 }
 0x918   : > { %v2230_v29 = vmul.f32 %v5657_v56, %v6797_v49 }
 0x91a   : > { %v2237_v39 = vpack.c.bf16 %v2230_v29, %v2229_v12 }
 0x91c   : > { %5147 = vmatmul.mubr.msk.bf16.vlgmr.msra.gmra.mxu0 %vm1164_vm3, %v2237_v39 }
 0x91d   : > { %5157 = vmatpush3.bf16.msra.mxu0 %v2336_v32  ;;  %5158 = vmatprep.mubr.msk.bf16.mxu0 %vm6111_vm0, %v6110_v46 }
 0x91e   : > { %5168 = vmatprep.subr.bf16.mxu0 %v6110_v46 }
 0x939   : > { %v2205_v45 = vpop.xlane.xlu0 %2204 }
 0x93a   : > { %5658 = vrcp.f32 %v2205_v45 }
 0x93d   : > { %v2208_v55 = vpop.xlane.xlu1 %2207 }
 0x93e   : > { %5660 = vrcp.f32 %v2208_v55 }
 0x941   : > { %v2211_v60 = vpop.xlane.xlu0 %2210  ;;  %v2214_v3 = vpop.xlane.xlu1 %2213 }
 0x942   : > { %5662 = vrcp.f32 %v2211_v60 }
 0x943   : > { %5664 = vrcp.f32 %v2214_v3 }
 0x945   : > { %v2217_v41 = vpop.xlane.xlu0 %2216 }
 0x946   : > { %5666 = vrcp.f32 %v2217_v41  ;;  %v2220_v49 = vpop.xlane.xlu1 %2219 }
 0x947   : > { %5668 = vrcp.f32 %v2220_v49  ;;  %v5659_v13 = vpop.eup %5658 }
 0x948   : > { %v2231_v18 = vmul.f32 %v5659_v13, %v5643_v53 }
 0x949   : > { %v2432_v34 = vpop.permute.xlu0 %2431 }
 0x94a   : > { %v2483_v7 = vpop.permute.xlu1 %2482  ;;  %v2437_v32 = vsel %vm963_vm1, %v2432_v34, 0 }
 0x94b   : > { %v5661_v14 = vpop.eup %5660 }
 0x94c   : > { %v2232_v21 = vmul.f32 %v5661_v14, %v5645_v17 }
 0x94d   : > { %v2430_v53 = vpop.permute.xlu0 %2429 }
 0x94e   : > { %v2238_v42 = vpack.c.bf16 %v2232_v21, %v2231_v18 }
 0x94f   : > { %v5663_v19 = vpop.eup %5662 }
 0x950   : > { %v5665_v10 = vpop.eup %5664  ;;  %5153 = vmatmul.mubr.msk.bf16.vlgmr.msra.gmra.mxu1 %vm1164_vm3, %v2238_v42  ;;  %v2233_v48 = vmul.f32 %v5663_v19, %v5649_v51  ;;  %v2481_v51 = vpop.permute.xlu1 %2480 }
 0x951   : > { %5163 = vmatpush3.bf16.msra.mxu1 %v2383_v44  ;;  %v2234_v8 = vmul.f32 %v5665_v10, %v5647_v47  ;;  %5164 = vmatprep.mubr.msk.bf16.mxu1 %vm6111_vm0, %v6110_v46  ;;  %v2488_v44 = vsel %vm963_vm1, %v2483_v7, 0  ;;  %v2534_v15 = vpop.permute.xlu0 %2533 }
 0x952   : > { %5174 = vmatprep.subr.bf16.mxu1 %v6110_v46 }
 0x953   : > { %v5667_v58 = vpop.eup %5666  ;;  %v2239_v11 = vpack.c.bf16 %v2234_v8, %v2233_v48 }
 0x954   : > { %v5669_v5 = vpop.eup %5668  ;;  %v2235_v17 = vmul.f32 %v5667_v58, %v5651_v1  ;;  %v2539_v1 = vsel %vm963_vm1, %v2534_v15, 0 }
 0x955   : > { %5159 = vmatmul.mubr.msk.bf16.vlgmr.msra.gmra.mxu0 %vm1164_vm3, %v2239_v11  ;;  %v2236_v9 = vmul.f32 %v5669_v5, %v6807_v38  ;;  %v2585_v38 = vpop.permute.xlu1 %2584  ;;  %v2532_v56 = vpop.permute.xlu0 %2531 }
 0x956   : > { %5169 = vmatpush3.bf16.xpose.msra.mxu0 %v2437_v32  ;;  %5170 = vmatprep.mubr.msk.bf16.mxu0 %vm6111_vm0, %v6110_v46  ;;  %v2590_v30 = vsel %vm963_vm1, %v2585_v38, 0 }
 0x957   : > { %v2240_v47 = vpack.c.bf16 %v2236_v9, %v2235_v17  ;;  %5180 = vmatprep.subr.bf16.mxu0 %v6110_v46 }
 0x959   : > { %5165 = vmatmul.mubr.msk.bf16.vlgmr.msra.gmra.mxu1 %vm1164_vm3, %v2240_v47  ;;  %v2583_v12 = vpop.permute.xlu1 %2582 }
 0x95a   : > { %5175 = vmatpush3.bf16.xpose.msra.mxu1 %v2488_v44  ;;  %5176 = vmatprep.mubr.msk.bf16.mxu1 %vm6111_vm0, %v6110_v46 }
 0x95b   : > { %5186 = vmatprep.subr.bf16.mxu1 %v6110_v46 }
 0x95d   : > { %5171 = vmatmul.mubr.msk.bf16.vlgmr.msra.gmra.mxu0 %vm963_vm1, %v2430_v53 }
 0x95e   : > { %5181 = vmatpush3.bf16.xpose.msra.mxu0 %v2539_v1  ;;  %5182 = vmatprep.mubr.msk.bf16.mxu0 %vm6111_vm0, %v6110_v46 }
 0x95f   : > { %5192 = vmatprep.subr.bf16.mxu0 %v6110_v46 }
 0x961   : > { %5177 = vmatmul.mubr.msk.bf16.vlgmr.msra.gmra.mxu1 %vm963_vm1, %v2481_v51 }
 0x962   : > { %5187 = vmatpush3.bf16.xpose.msra.mxu1 %v2590_v30  ;;  %5188 = vmatprep.mubr.msk.bf16.mxu1 %vm6111_vm0, %v6110_v46 }
 0x963   : > { %5198 = vmatprep.subr.bf16.mxu1 %v6110_v46 }
 0x965   : > { %5183 = vmatmul.mubr.msk.bf16.vlgmr.msra.gmra.mxu0 %vm963_vm1, %v2532_v56 }
 0x966   : > { %5194 = vmatprep.mubr.msk.bf16.mxu0 %vm6111_vm0, %v6110_v46 }
 0x969   : > { %5189 = vmatmul.mubr.msk.bf16.vlgmr.msra.gmra.mxu1 %vm963_vm1, %v2583_v12 }
 0x96a   : > { %5200 = vmatprep.mubr.msk.bf16.mxu1 %vm6111_vm0, %v6110_v46 }
 0x9dc   : > { %v6865_v29 = vpop.f32.mrf.mxu0 }
 0x9de   : > { %v5148_v39 = vpop.f32.mrf.mxu0 }
 0x9e0   : > { %v6867_v45 = vpop.f32.mrf.mxu0 }
 0x9e1   : > { %v5388_v55 = vpack.i.bf16 %v6867_v45, %v6865_v29 }
 0x9e2   : > { %v5149_v60 = vpop.f32.mrf.mxu0 }
 0xa10   : > { %v6871_v3 = vpop.f32.mrf.mxu1 }
 0xa12   : > { %v5154_v41 = vpop.f32.mrf.mxu1 }
 0xa14   : > { %v6873_v49 = vpop.f32.mrf.mxu1 }
 0xa15   : > { %v5393_v13 = vpack.i.bf16 %v6873_v49, %v6871_v3  ;;  %v6877_v14 = vpop.f32.mrf.mxu0 }
 0xa16   : > { %v5155_v18 = vpop.f32.mrf.mxu1 }
 0xa17   : > { %v5160_v21 = vpop.f32.mrf.mxu0 }
 0xa19   : > { %v6879_v34 = vpop.f32.mrf.mxu0  ;;  %v6881_v42 = vpop.f32.mrf.mxu1 }
 0xa1a   : > { %v5418_v19 = vpack.i.bf16 %v6879_v34, %v6877_v14 }
 0xa1b   : > { %v5161_v10 = vpop.f32.mrf.mxu0  ;;  %v5166_v48 = vpop.f32.mrf.mxu1 }
 0xa1d   : > { %v6885_v8 = vpop.f32.mrf.mxu1  ;;  %v2473_v7 = vpop.f32.mrf.mxu0 }
 0xa1e   : > { %v5423_v58 = vpack.i.bf16 %v6885_v8, %v6881_v42  ;;  %v2633_v11 = vsel %vm6504_vm2, -inf, %v2473_v7 }
 0xa1f   : > { %v5167_v5 = vpop.f32.mrf.mxu1  ;;  %v5172_v53 = vpop.f32.mrf.mxu0  ;;  %v2641_v17 = vsel %vm1164_vm3, %v2633_v11, -inf }
 0xa20   : > { %2642 = vmax.xlane.f32.xlu0 %v2641_v17 }
 0xa21   : > { %v2476_v32 = vpop.f32.mrf.mxu0  ;;  %v2524_v9 = vpop.f32.mrf.mxu1 }
 0xa22   : > { %v2634_v47 = vsel %vm6512_vm4, -inf, %v2476_v32  ;;  %v2635_v51 = vsel %vm6504_vm2, -inf, %v2524_v9 }
 0xa23   : > { %v2644_v44 = vsel %vm1164_vm3, %v2634_v47, -inf  ;;  %v5173_v15 = vpop.f32.mrf.mxu0  ;;  %v5178_v1 = vpop.f32.mrf.mxu1  ;;  %v2647_v38 = vsel %vm1164_vm3, %v2635_v51, -inf }
 0xa24   : > { %2645 = vmax.xlane.f32.xlu1 %v2644_v44  ;;  %2648 = vmax.xlane.f32.xlu0 %v2647_v38 }
 0xa25   : > { %v2527_v30 = vpop.f32.mrf.mxu1  ;;  %v2575_v56 = vpop.f32.mrf.mxu0 }
 0xa26   : > { %v2636_v12 = vsel %vm6512_vm4, -inf, %v2527_v30  ;;  %v2637_v18 = vsel %vm6504_vm2, -inf, %v2575_v56 }
 0xa27   : > { %v2650_v39 = vsel %vm1164_vm3, %v2636_v12, -inf  ;;  %v5179_v60 = vpop.f32.mrf.mxu1  ;;  %v5184_v41 = vpop.f32.mrf.mxu0  ;;  %v2653_v7 = vsel %vm1164_vm3, %v2637_v18, -inf }
 0xa28   : > { %2651 = vmax.xlane.f32.xlu0 %v2650_v39 }
 0xa29   : > { %v2578_v21 = vpop.f32.mrf.mxu0  ;;  %v2626_v10 = vpop.f32.mrf.mxu1 }
 0xa2a   : > { %v2638_v48 = vsel %vm6512_vm4, -inf, %v2578_v21  ;;  %v2639_v32 = vsel %vm6504_vm2, -inf, %v2626_v10 }
 0xa2b   : > { %v2656_v5 = vsel %vm1164_vm3, %v2638_v48, -inf  ;;  %v5185_v53 = vpop.f32.mrf.mxu0  ;;  %v5190_v17 = vpop.f32.mrf.mxu1  ;;  %v2659_v15 = vsel %vm1164_vm3, %v2639_v32, -inf }
 0xa2c   : > { %2657 = vmax.xlane.f32.xlu1 %v2656_v5  ;;  %2654 = vmax.xlane.f32.xlu0 %v2653_v7 }
 0xa2d   : > { %v2629_v9 = vpop.f32.mrf.mxu1 }
 0xa2e   : > { %v2640_v44 = vsel %vm6512_vm4, -inf, %v2629_v9 }
 0xa2f   : > { %v2662_v1 = vsel %vm1164_vm3, %v2640_v44, -inf  ;;  %v5191_v38 = vpop.f32.mrf.mxu1 }
 0xa30   : > { %2660 = vmax.xlane.f32.xlu0 %v2659_v15  ;;  %2663 = vmax.xlane.f32.xlu1 %v2662_v1 }
 0xaa9   : > { %v2643_v30 = vpop.xlane.xlu0 %2642 }
 0xaaa   : > { %v2665_v56 = vsub.f32 %v2633_v11, %v2643_v30 }
 0xaac   : > { %v2673_v39 = vmul.f32 1.442695, %v2665_v56 }
 0xaad   : > { %v2646_v60 = vpop.xlane.xlu1 %2645  ;;  %v2649_v41 = vpop.xlane.xlu0 %2648 }
 0xaae   : > { %5670 = vpow2.f32 %v2673_v39  ;;  %v2666_v0 = vsub.f32 %v2634_v47, %v2646_v60  ;;  %v2667_v21 = vsub.f32 %v2635_v51, %v2649_v41 }
 0xab0   : > { %v2675_v10 = vmul.f32 1.442695, %v2666_v0  ;;  %v2677_v7 = vmul.f32 1.442695, %v2667_v21 }
 0xab1   : > { %v2652_v5 = vpop.xlane.xlu0 %2651 }
 0xab2   : > { %5672 = vpow2.f32 %v2675_v10  ;;  %v2668_v4 = vsub.f32 %v2636_v12, %v2652_v5 }
 0xab3   : > { %5674 = vpow2.f32 %v2677_v7 }
 0xab4   : > { %v2679_v53 = vmul.f32 1.442695, %v2668_v4 }
 0xab5   : > { %v2658_v17 = vpop.xlane.xlu1 %2657  ;;  %v2655_v9 = vpop.xlane.xlu0 %2654 }
 0xab6   : > { %5676 = vpow2.f32 %v2679_v53  ;;  %v2670_v15 = vsub.f32 %v2638_v48, %v2658_v17  ;;  %v2669_v1 = vsub.f32 %v2637_v18, %v2655_v9 }
 0xab8   : > { %v2683_v38 = vmul.f32 1.442695, %v2670_v15  ;;  %v2681_v11 = vmul.f32 1.442695, %v2669_v1 }
 0xab9   : > { %v2661_v30 = vpop.xlane.xlu0 %2660  ;;  %v2664_v53 = vpop.xlane.xlu1 %2663 }
 0xaba   : > { %5678 = vpow2.f32 %v2683_v38  ;;  %v2671_v56 = vsub.f32 %v2639_v32, %v2661_v30  ;;  %v2672_v17 = vsub.f32 %v2640_v44, %v2664_v53  ;;  %v5475_v53 = vld [vmem:[%s6348_s24 + $0x10] sm:$0xff]  }
 0xabb   : > { %v5671_v39 = vpop.eup %5670  ;;  %5680 = vpow2.f32 %v2681_v11 }
 0xabc   : > { %v2685_v47 = vmul.f32 1.442695, %v2671_v56  ;;  %v2689_v51 = vsel %vm1164_vm3, %v5671_v39, 0.0  ;;  %v2687_v9 = vmul.f32 1.442695, %v2672_v17  ;;  %v5476_v17 = vld [vmem:[%s6348_s24 + $0x8] sm:$0xff]  }
 0xabd   : > { %2690 = vadd.xlane.f32.xlu0 %v2689_v51 }
 0xabe   : > { %5682 = vpow2.f32 %v2685_v47 }
 0xabf   : > { %v5673_v12 = vpop.eup %5672  ;;  %5684 = vpow2.f32 %v2687_v9  ;;  %v5477_v9 = vld [vmem:[%s6348_s24] sm:$0xff]  }
 0xac0   : > { %v5675_v60 = vpop.eup %5674  ;;  %v2692_v41 = vsel %vm1164_vm3, %v5673_v12, 0.0 }
 0xac1   : > { %v2695_v0 = vsel %vm1164_vm3, %v5675_v60, 0.0  ;;  %2693 = vadd.xlane.f32.xlu1 %v2692_v41 }
 0xac2   : > { %2696 = vadd.xlane.f32.xlu0 %v2695_v0 }
 0xac3   : > { %v5677_v18 = vpop.eup %5676 }
 0xac4   : > { %v2698_v48 = vsel %vm1164_vm3, %v5677_v18, 0.0 }
 0xac5   : > { %2699 = vadd.xlane.f32.xlu1 %v2698_v48 }
 0xac7   : > { %v5679_v32 = vpop.eup %5678 }
 0xac8   : > { %v5681_v21 = vpop.eup %5680  ;;  %v2704_v10 = vsel %vm1164_vm3, %v5679_v32, 0.0 }
 0xac9   : > { %v2701_v7 = vsel %vm1164_vm3, %v5681_v21, 0.0  ;;  %2705 = vadd.xlane.f32.xlu1 %v2704_v10  ;;  %v5471_v10 = vld [vmem:[%s6348_s24 + $0x30] sm:$0xff]  }
 0xaca   : > { %2702 = vadd.xlane.f32.xlu0 %v2701_v7  ;;  %v5472_v7 = vld [vmem:[%s6348_s24 + $0x28] sm:$0xff]  }
 0xacb   : > { %v6919_v5 = vpop.eup %5682 }
 0xacc   : > { %v2707_v4 = vsel %vm1164_vm3, %v6919_v5, 0.0 }
 0xace   : > { %2708 = vadd.xlane.f32.xlu0 %v2707_v4  ;;  %v5473_v4 = vld [vmem:[%s6348_s24 + $0x20] sm:$0xff]  }
 0xada   : > { %2780 = vrot.lane.b32.xlu1 %v6491_v61, %s6114_s22  ;;  %v5685_v61 = vpop.eup %5684 }
 0xade   : > { %2827 = vrot.lane.b32.xlu1 %v6569_v52, %s6114_s22  ;;  %v2710_v52 = vsel %vm1164_vm3, %v5685_v61, 0.0 }
 0xae4   : > { %2733 = vrot.lane.b32.xlu0 %v6478_v22, %s6114_s22 }
 0xae8   : > { %5379 = vrot.lane.b32.xlu0 %v5378_v43, %s6114_s22 }
 0xaec   : > { %5389 = vrot.lane.b32.xlu0 %v5388_v55, %s6113_s12 }
 0xb02   : > { %2711 = vadd.xlane.f32.xlu1 %v2710_v52 }
 0xb13   : > { %2874 = vrot.lane.b32.xlu1 %v6454_v35, %s6114_s22 }
 0xb17   : > { %5384 = vrot.lane.b32.xlu1 %v5383_v28, %s6114_s22 }
 0xb1b   : > { %5394 = vrot.lane.b32.xlu1 %v5393_v13, %s6113_s12 }
 0xb46   : > { %v2691_v22 = vpop.xlane.xlu0 %2690 }
 0xb47   : > { %5686 = vrcp.f32 %v2691_v22 }
 0xb4a   : > { %v2694_v37 = vpop.xlane.xlu1 %2693 }
 0xb4b   : > { %v2697_v54 = vpop.xlane.xlu0 %2696  ;;  %5688 = vrcp.f32 %v2694_v37 }
 0xb4c   : > { %5690 = vrcp.f32 %v2697_v54 }
 0xb4e   : > { %v2700_v43 = vpop.xlane.xlu1 %2699 }
 0xb4f   : > { %5692 = vrcp.f32 %v2700_v43 }
 0xb52   : > { %v2706_v29 = vpop.xlane.xlu1 %2705 }
 0xb53   : > { %v2703_v35 = vpop.xlane.xlu0 %2702  ;;  %5694 = vrcp.f32 %v2706_v29 }
 0xb54   : > { %5696 = vrcp.f32 %v2703_v35  ;;  %v5687_v45 = vpop.eup %5686 }
 0xb55   : > { %v2721_v55 = vmul.f32 %v5687_v45, %v5671_v39 }
 0xb56   : > { %v2781_v57 = vpop.permute.xlu1 %2780 }
 0xb57   : > { %v2709_v59 = vpop.xlane.xlu0 %2708  ;;  %5199 = vmatpush3.bf16.msra.mxu1 %v2781_v57 }
 0xb58   : > { %v5689_v28 = vpop.eup %5688  ;;  %5210 = vmatprep.subr.bf16.mxu1 %v6110_v46  ;;  %5698 = vrcp.f32 %v2709_v59 }
 0xb59   : > { %v2722_v3 = vmul.f32 %v5689_v28, %v5673_v12  ;;  %v5691_v49 = vpop.eup %5690 }
 0xb5a   : > { %v2723_v1 = vmul.f32 %v5691_v49, %v5675_v60  ;;  %v2828_v11 = vpop.permute.xlu1 %2827 }
 0xb5b   : > { %v2734_v13 = vpop.permute.xlu0 %2733  ;;  %v2729_v44 = vpack.c.bf16 %v2722_v3, %v2721_v55 }
 0xb5c   : > { %v5693_v15 = vpop.eup %5692  ;;  %5193 = vmatpush3.bf16.msra.mxu0 %v2734_v13 }
 0xb5d   : > { %5204 = vmatprep.subr.bf16.mxu0 %v6110_v46  ;;  %v2724_v38 = vmul.f32 %v5693_v15, %v5677_v18 }
 0xb5f   : > { %5195 = vmatmul.mubr.msk.bf16.vlgmr.msra.gmra.mxu0 %vm1164_vm3, %v2729_v44  ;;  %v2730_v30 = vpack.c.bf16 %v2724_v38, %v2723_v1  ;;  %v5380_v25 = vpop.permute.xlu0 %5379 }
 0xb60   : > { %v5695_v56 = vpop.eup %5694  ;;  %5205 = vmatpush3.bf16.msra.mxu0 %v2828_v11  ;;  %5206 = vmatprep.mubr.msk.bf16.mxu0 %vm6111_vm0, %v6110_v46  ;;  %v5382_v14 = vunpack.i.h.bf16 %v5380_v25  ;;  %v5381_v34 = vunpack.i.l.bf16 %v5380_v25 }
 0xb61   : > { %v5697_v39 = vpop.eup %5696  ;;  %5201 = vmatmul.mubr.msk.bf16.vlgmr.msra.gmra.mxu1 %vm1164_vm3, %v2730_v30  ;;  %v2726_v47 = vmul.f32 %v5695_v56, %v5679_v32 }
 0xb62   : > { %v2725_v51 = vmul.f32 %v5697_v39, %v5681_v21  ;;  %5212 = vmatprep.mubr.msk.bf16.mxu1 %vm6111_vm0, %v6110_v46  ;;  %v5470_v46 = vld [vmem:[%s6348_s24 + $0x38] sm:$0xff]   ;;  %v3018_v30 = vsel %vm963_vm1, %v6611_v24, %v5382_v14  ;;  %v3017_v56 = vsel %vm963_vm1, %v6609_v20, %v5381_v34 }
 0xb63   : > { %5216 = vmatprep.subr.bf16.mxu0 %v5470_v46  ;;  %v5390_v44 = vpop.permute.xlu0 %5389 }
 0xb64   : > { %v2731_v12 = vpack.c.bf16 %v2726_v47, %v2725_v51  ;;  %v5392_v15 = vunpack.i.h.bf16 %v5390_v44  ;;  %v5391_v1 = vunpack.i.l.bf16 %v5390_v44 }
 0xb65   : > { %v5699_v0 = vpop.eup %5698 }
 0xb66   : > { %v2727_v48 = vmul.f32 %v5699_v0, %v6919_v5  ;;  %v5474_v5 = vld [vmem:[%s6348_s24 + $0x18] sm:$0xff]   ;;  %v3026_v51 = vsel %vm3025_vm5, %v3017_v56, %v5391_v1 }
 0xb67   : > { %5207 = vmatmul.mubr.msk.bf16.vlgmr.msra.gmra.mxu0 %vm1164_vm3, %v2731_v12  ;;  %v3027_v12 = vsel %vm3025_vm5, %v3018_v30, %v5392_v15 }
 0xb68   : > { %5217 = vmatpush3.bf16.msra.mxu0 %v5470_v46 }
 0xb69   : > { %5218 = vmatprep.subr.bf16.mxu0 %v5471_v10 }
 0xb6c   : > { %5219 = vmatpush3.bf16.msra.mxu0 %v5471_v10 }
 0xb6d   : > { %5220 = vmatprep.subr.bf16.mxu0 %v5472_v7 }
 0xb70   : > { %5221 = vmatpush3.bf16.msra.mxu0 %v5472_v7 }
 0xb71   : > { %5222 = vmatprep.subr.bf16.mxu0 %v5473_v4 }
 0xb74   : > { %5223 = vmatpush3.bf16.msra.mxu0 %v5473_v4 }
 0xb75   : > { %5224 = vmatprep.subr.bf16.mxu0 %v5474_v5 }
 0xb78   : > { %5225 = vmatpush3.bf16.msra.mxu0 %v5474_v5 }
 0xb79   : > { %5226 = vmatprep.subr.bf16.mxu0 %v5475_v53 }
 0xb7c   : > { %5227 = vmatpush3.bf16.msra.mxu0 %v5475_v53 }
 0xb7d   : > { %5228 = vmatprep.subr.bf16.mxu0 %v5476_v17 }
 0xb80   : > { %5229 = vmatpush3.bf16.msra.mxu0 %v5476_v17 }
 0xb81   : > { %5230 = vmatprep.subr.bf16.mxu0 %v5477_v9 }
 0xb84   : > { %5231 = vmatpush3.bf16.msra.mxu0 %v5477_v9 }
 0xb8b   : > { %v2712_v60 = vpop.xlane.xlu1 %2711 }
 0xb8c   : > { %5700 = vrcp.f32 %v2712_v60 }
 0xb8f   : > { %v2875_v41 = vpop.permute.xlu1 %2874 }
 0xb90   : > { %5211 = vmatpush3.bf16.msra.mxu1 %v2875_v41 }
 0xb99   : > { %v5701_v18 = vpop.eup %5700 }
 0xb9a   : > { %v2728_v32 = vmul.f32 %v5701_v18, %v5685_v61 }
 0xb9c   : > { %v2732_v21 = vpack.c.bf16 %v2728_v32, %v2727_v48 }
 0xb9e   : > { %5213 = vmatmul.mubr.msk.bf16.vlgmr.msra.gmra.mxu1 %vm1164_vm3, %v2732_v21 }
 0xb9f   : > { %3537 = vmatprep.mubr.bf16.mxu1 %v6109_v6 }
 0xc1f   : > { %v2773_v61 = vpop.f32.mrf.mxu0 }
 0xc21   : > { %v5196_v52 = vpop.f32.mrf.mxu0  ;;  %v2820_v22 = vpop.f32.mrf.mxu1 }
 0xc23   : > { %v2776_v37 = vpop.f32.mrf.mxu0  ;;  %v5202_v54 = vpop.f32.mrf.mxu1 }
 0xc24   : > { %v5398_v43 = vpack.i.bf16 %v2776_v37, %v2773_v61 }
 0xc25   : > { %v5197_v29 = vpop.f32.mrf.mxu0  ;;  %v2823_v35 = vpop.f32.mrf.mxu1 }
 0xc26   : > { %5399 = vrot.lane.b32.xlu0 %v5398_v43, %s6112_s27  ;;  %v5403_v45 = vpack.i.bf16 %v2823_v35, %v2820_v22 }
 0xc27   : > { %v2867_v57 = vpop.f32.mrf.mxu0  ;;  %v5203_v59 = vpop.f32.mrf.mxu1 }
 0xc28   : > { %5404 = vrot.lane.b32.xlu1 %v5403_v45, %s6112_s27 }
 0xc29   : > { %v5208_v28 = vpop.f32.mrf.mxu0 }
 0xc2a   : > { %5409 = vrot.lane.b32.xlu0 %v5408_v2, %s6114_s22 }
 0xc2b   : > { %v2870_v55 = vpop.f32.mrf.mxu0 }
 0xc2c   : > { %5414 = vrot.lane.b32.xlu1 %v5413_v27, %s6114_s22  ;;  %v5428_v49 = vpack.i.bf16 %v2870_v55, %v2867_v57  ;;  %v5385_v27 = vpop.permute.xlu1 %5384 }
 0xc2d   : > { %v5209_v3 = vpop.f32.mrf.mxu0  ;;  %v5387_v38 = vunpack.i.h.bf16 %v5385_v27  ;;  %v5386_v42 = vunpack.i.l.bf16 %v5385_v27 }
 0xc2e   : > { %5419 = vrot.lane.b32.xlu0 %v5418_v19, %s6113_s12 }
 0xc2f   : > { %v3020_v60 = vsel %vm963_vm1, %v6615_v33, %v5387_v38  ;;  %v3019_v41 = vsel %vm963_vm1, %v6613_v26, %v5386_v42  ;;  %v5782_v38 = vld [vmem:[#allocation2 + $0x30] sm:$0xff] }
 0xc30   : > { %5424 = vrot.lane.b32.xlu1 %v5423_v58, %s6113_s12  ;;  %v5395_v19 = vpop.permute.xlu1 %5394 }
 0xc31   : > { %v5397_v8 = vunpack.i.h.bf16 %v5395_v19  ;;  %v5396_v58 = vunpack.i.l.bf16 %v5395_v19  ;;  %v523_v19 = vld [vmem:[%s6340_s6 + $0x2] ss:$0 sm:$0xff] }
 0xc32   : > { %5429 = vrot.lane.b32.xlu0 %v5428_v49, %s6112_s27 }
 0xc33   : > { %v3028_v20 = vsel %vm3025_vm5, %v3019_v41, %v5396_v58  ;;  %v3029_v21 = vsel %vm3025_vm5, %v3020_v60, %v5397_v8 }
 0xc5e   : > { %v2914_v63 = vpop.f32.mrf.mxu1 }
 0xc60   : > { %v5214_v50 = vpop.f32.mrf.mxu1 }
 0xc62   : > { %v2917_v2 = vpop.f32.mrf.mxu1 }
 0xc63   : > { %v5433_v13 = vpack.i.bf16 %v2917_v2, %v2914_v63 }
 0xc64   : > { %v5215_v16 = vpop.f32.mrf.mxu1 }
 0xc65   : > { %5434 = vrot.lane.b32.xlu1 %v5433_v13, %s6112_s27 }
 0xc98   : > { %v5400_v11 = vpop.permute.xlu0 %5399 }
 0xc99   : > { %v5402_v39 = vunpack.i.h.bf16 %v5400_v11  ;;  %v5401_v47 = vunpack.i.l.bf16 %v5400_v11  ;;  %v5783_v11 = vld [vmem:[#allocation2 + $0x18] sm:$0xff] }
 0xc9a   : > { %v5405_v0 = vpop.permute.xlu1 %5404 }
 0xc9b   : > { %v5407_v18 = vunpack.i.h.bf16 %v5405_v0  ;;  %v5406_v48 = vunpack.i.l.bf16 %v5405_v0  ;;  %v3035_v24 = vsel %vm3034_vm6, %v3026_v51, %v5401_v47  ;;  %v3036_v32 = vsel %vm3034_vm6, %v3027_v12, %v5402_v39  ;;  %v5784_v39 = vld [vmem:[#allocation2] sm:$0xff]  ;;  %v5785_v51 = vld [vmem:[#allocation2 + $0x10] sm:$0xff] }
 0xc9c   : > { %v5410_v46 = vpop.permute.xlu0 %5409  ;;  %v3043_v10 = vpack.c.bf16 %v3036_v32, %v3035_v24  ;;  %v5786_v24 = vld [vmem:[#allocation2 + $0x8] sm:$0xff] }
 0xc9d   : > { %v3038_v7 = vsel %vm3034_vm6, %v3029_v21, %v5407_v18  ;;  %v3037_v33 = vsel %vm3034_vm6, %v3028_v20, %v5406_v48  ;;  %v5412_v5 = vunpack.i.h.bf16 %v5410_v46  ;;  %v5411_v53 = vunpack.i.l.bf16 %v5410_v46  ;;  %v5787_v46 = vld [vmem:[#allocation2 + $0x28] sm:$0xff] }
 0xc9e   : > { %v3044_v4 = vpack.c.bf16 %v3038_v7, %v3037_v33  ;;  %5232 = vmatprep.mubr.bf16.mxu0 %v3043_v10  ;;  %v5415_v59 = vpop.permute.xlu1 %5414  ;;  %v5788_v33 = vld [vmem:[#allocation2 + $0x20] sm:$0xff] }
 0xc9f   : > { %v3022_v52 = vsel %vm963_vm1, %v6619_v40, %v5412_v5  ;;  %v3021_v22 = vsel %vm963_vm1, %v6617_v36, %v5411_v53  ;;  %v5417_v55 = vunpack.i.h.bf16 %v5415_v59  ;;  %v5416_v3 = vunpack.i.l.bf16 %v5415_v59  ;;  %v5478_v53 = vld [vmem:[%s6354_s19 + $0xe0] ss:$16 sps:$4 sm:$0xff]  }
 0xca0   : > { %v5420_v26 = vpop.permute.xlu0 %5419  ;;  %5233 = vmatmul.mubr.bf16.vlgmr.msra.gmra.mxu0 %v3044_v4 }
 0xca1   : > { %v5422_v17 = vunpack.i.h.bf16 %v5420_v26  ;;  %v5421_v9 = vunpack.i.l.bf16 %v5420_v26  ;;  %v3024_v63 = vsel %vm963_vm1, %v6632_v31, %v5417_v55  ;;  %v3023_v50 = vsel %vm963_vm1, %v6629_v62, %v5416_v3  ;;  %v5789_v26 = vld [vmem:[#allocation2 + $0x38] sm:$0xff] }
 0xca2   : > { %v5425_v28 = vpop.permute.xlu1 %5424 }
 0xca3   : > { %v3030_v43 = vsel %vm3025_vm5, %v3021_v22, %v5421_v9  ;;  %v3031_v29 = vsel %vm3025_vm5, %v3022_v52, %v5422_v17  ;;  %v5427_v40 = vunpack.i.h.bf16 %v5425_v28  ;;  %v5426_v49 = vunpack.i.l.bf16 %v5425_v28  ;;  %v5480_v17 = vld [vmem:[%s6354_s19 + $0xe4] ss:$16 sps:$4 sm:$0xff]   ;;  %v5481_v9 = vld [vmem:[%s6354_s19 + $0xe8] ss:$16 sps:$4 sm:$0xff]  }
 0xca4   : > { %v5430_v61 = vpop.permute.xlu0 %5429  ;;  %3505 = vmatprep.subr.bf16.mxu1 %v5480_v17 }
 0xca5   : > { %v5432_v37 = vunpack.i.h.bf16 %v5430_v61  ;;  %v5431_v54 = vunpack.i.l.bf16 %v5430_v61  ;;  %v3032_v16 = vsel %vm3025_vm5, %v3023_v50, %v5426_v49  ;;  %v3033_v25 = vsel %vm3025_vm5, %v3024_v63, %v5427_v40  ;;  %v5483_v61 = vld [vmem:[%s6354_s19 + $0xec] ss:$16 sps:$4 sm:$0xff]   ;;  %3506 = vmatpush1.bf16.msra.mxu1 %v5478_v53  ;;  %v5486_v63 = vld [vmem:[%s6354_s19 + $0xc4] ss:$16 sps:$4 sm:$0xff]  }
 0xca6   : > { %3578 = vmatprep.subr.bf16.mxu0 %v5483_v61  ;;  %v5489_v50 = vld [vmem:[%s6354_s19 + $0xcc] ss:$16 sps:$4 sm:$0xff]   ;;  %3507 = vmatprep.subr.bf16.mxu1 %v5486_v63 }
 0xca7   : > { %v3039_v35 = vsel %vm3034_vm6, %v3030_v43, %v5431_v54  ;;  %v3040_v45 = vsel %vm3034_vm6, %v3031_v29, %v5432_v37  ;;  %3579 = vmatpush1.bf16.msra.mxu0 %v5481_v9 }
 0xca8   : > { %v3045_v57 = vpack.c.bf16 %v3040_v45, %v3039_v35  ;;  %3580 = vmatprep.subr.bf16.mxu0 %v5489_v50 }
 0xcaa   : > { %5236 = vmatprep.mubr.bf16.mxu0 %v3045_v57 }
 0xcd7   : > { %v5435_v36 = vpop.permute.xlu1 %5434 }
 0xcd8   : > { %v5437_v2 = vunpack.i.h.bf16 %v5435_v36  ;;  %v5436_v13 = vunpack.i.l.bf16 %v5435_v36 }
 0xcda   : > { %v3041_v27 = vsel %vm3034_vm6, %v3032_v16, %v5436_v13  ;;  %v3042_v44 = vsel %vm3034_vm6, %v3033_v25, %v5437_v2  ;;  %v5484_v2 = vld [vmem:[%s6354_s19 + $0xc0] ss:$16 sps:$4 sm:$0xff]   ;;  %v5487_v13 = vld [vmem:[%s6354_s19 + $0xc8] ss:$16 sps:$4 sm:$0xff]   ;;  %v5492_v16 = vld [vmem:[%s6354_s19 + $0xa4] ss:$16 sps:$4 sm:$0xff]  }
 0xcdb   : > { %v3046_v14 = vpack.c.bf16 %v3042_v44, %v3041_v27  ;;  %3508 = vmatpush1.bf16.msra.mxu1 %v5484_v2  ;;  %3581 = vmatpush1.bf16.msra.mxu0 %v5487_v13  ;;  %v5495_v25 = vld [vmem:[%s6354_s19 + $0xac] ss:$16 sps:$4 sm:$0xff]   ;;  %v5490_v27 = vld [vmem:[%s6354_s19 + $0xa0] ss:$16 sps:$4 sm:$0xff]   ;;  %v5493_v44 = vld [vmem:[%s6354_s19 + $0xa8] ss:$16 sps:$4 sm:$0xff]  }
 0xcdc   : > { %3509 = vmatprep.subr.bf16.mxu1 %v5492_v16  ;;  %3582 = vmatprep.subr.bf16.mxu0 %v5495_v25 }
 0xcdd   : > { %5237 = vmatmul.mubr.bf16.gmra.mxu0 %v3046_v14  ;;  %v5498_v14 = vld [vmem:[%s6354_s19 + $0x84] ss:$16 sps:$4 sm:$0xff]  }
 0xcde   : > { %3610 = vmatprep.mubr.bf16.mxu0 %v6109_v6 }
 0xcdf   : > { %3510 = vmatpush1.bf16.msra.mxu1 %v5490_v27  ;;  %3583 = vmatpush1.bf16.msra.mxu0 %v5493_v44 }
 0xce0   : > { %3511 = vmatprep.subr.bf16.mxu1 %v5498_v14  ;;  %v524_v14 = vld [vmem:[%s6340_s6 + $0x3] ss:$0 sm:$0xff] }
 0xd60   : > { %v5234_v34 = vpop.f32.mrf.mxu0 }
 0xd61   : > { %v3154_v62 = vadd.f32 %v5234_v34, %v523_v19  ;;  %v5501_v34 = vld [vmem:[%s6354_s19 + $0x8c] ss:$16 sps:$4 sm:$0xff]  }
 0xd62   : > { %v3145_v31 = vpop.f32.mrf.mxu0  ;;  %3584 = vmatprep.subr.bf16.mxu0 %v5501_v34 }
 0xd63   : > { %v3146_v15 = vadd.f32 %v3145_v31, %v523_v19  ;;  %v7025_v30 = vadd.f32 %v5783_v11, %v3154_v62  ;;  %v5499_v31 = vld [vmem:[%s6354_s19 + $0x88] ss:$16 sps:$4 sm:$0xff]   ;;  %v5508_v11 = vld [vmem:[%s6354_s19 + $0x40] ss:$16 sps:$4 sm:$0xff]  }
 0xd64   : > { %v5235_v1 = vpop.f32.mrf.mxu0  ;;  %3585 = vmatpush1.bf16.msra.mxu0 %v5499_v31  ;;  %v5505_v62 = vld [vmem:[%s6354_s19 + $0x68] ss:$16 sps:$4 sm:$0xff]  }
 0xd65   : > { %v7022_v42 = vadd.f32 %v5782_v38, %v3146_v15  ;;  %v3157_v56 = vadd.f32 %v5235_v1, %v523_v19  ;;  %v5502_v15 = vld [vmem:[%s6354_s19 + $0x60] ss:$16 sps:$4 sm:$0xff]   ;;  %v5504_v1 = vld [vmem:[%s6354_s19 + $0x64] ss:$16 sps:$4 sm:$0xff]   ;;  %v5507_v38 = vld [vmem:[%s6354_s19 + $0x6c] ss:$16 sps:$4 sm:$0xff]  }
 0xd66   : > { %v3148_v8 = vpop.f32.mrf.mxu0  ;;  %3586 = vmatprep.subr.bf16.mxu0 %v5507_v38 }
 0xd67   : > { %v3149_v58 = vadd.f32 %v3148_v8, %v523_v19  ;;  %3184 = vadd.xlane.f32.xlu0 %v7022_v42  ;;  %v7031_v12 = vadd.f32 %v5785_v51, %v3157_v56  ;;  %v5510_v8 = vld [vmem:[%s6354_s19 + $0x44] ss:$16 sps:$4 sm:$0xff]   ;;  %v5511_v56 = vld [vmem:[%s6354_s19 + $0x48] ss:$16 sps:$4 sm:$0xff]   ;;  %v5519_v51 = vld [vmem:[%s6354_s19 + $0x2c] ss:$16 sps:$4 sm:$0xff]  }
 0xd68   : > { %3587 = vmatpush1.bf16.msra.mxu0 %v5505_v62 }
 0xd69   : > { %v7027_v47 = vadd.f32 %v5784_v39, %v3149_v58  ;;  %7657 = vst [vmem:[#allocation26_spill] sm:$0xff] %v7031_v12  ;;  %v5513_v58 = vld [vmem:[%s6354_s19 + $0x4c] ss:$16 sps:$4 sm:$0xff]   ;;  %v5516_v39 = vld [vmem:[%s6354_s19 + $0x24] ss:$16 sps:$4 sm:$0xff]  }
 0xd6a   : > { %3588 = vmatprep.subr.bf16.mxu0 %v5513_v58 }
 0xd6b   : > { %3188 = vadd.xlane.f32.xlu0 %v7025_v30  ;;  %3186 = vadd.xlane.f32.xlu1 %v7027_v47 }
 0xd6c   : > { %3589 = vmatpush1.bf16.msra.mxu0 %v5511_v56 }
 0xd6d   : > { %3590 = vmatprep.subr.bf16.mxu0 %v5519_v51 }
 0xd6f   : > { %3190 = vadd.xlane.f32.xlu0 %v7031_v12 }
 0xd9d   : > { %v5238_v60 = vpop.f32.mrf.mxu0 }
 0xd9e   : > { %v3170_v48 = vadd.f32 %v5238_v60, %v523_v19  ;;  %v5514_v60 = vld [vmem:[%s6354_s19 + $0x20] ss:$16 sps:$4 sm:$0xff]  }
 0xd9f   : > { %v3161_v41 = vpop.f32.mrf.mxu0 }
 0xda0   : > { %v3162_v0 = vadd.f32 %v3161_v41, %v523_v19  ;;  %v7037_v10 = vadd.f32 %v5787_v46, %v3170_v48  ;;  %v5517_v41 = vld [vmem:[%s6354_s19 + $0x28] ss:$16 sps:$4 sm:$0xff]   ;;  %v5520_v48 = vld [vmem:[%s6354_s19] ss:$16 sps:$4 sm:$0xff]  }
 0xda1   : > { %v5239_v18 = vpop.f32.mrf.mxu0  ;;  %3591 = vmatpush1.bf16.msra.mxu0 %v5517_v41 }
 0xda2   : > { %v7034_v32 = vadd.f32 %v5786_v24, %v3162_v0  ;;  %7659 = vst [vmem:[#allocation28_spill] sm:$0xff] %v7037_v10  ;;  %v3173_v7 = vadd.f32 %v5239_v18, %v523_v19  ;;  %v5522_v0 = vld [vmem:[%s6354_s19 + $0x4] ss:$16 sps:$4 sm:$0xff]   ;;  %v5525_v18 = vld [vmem:[%s6354_s19 + $0xc] ss:$16 sps:$4 sm:$0xff]  }
 0xda3   : > { %v3164_v20 = vpop.f32.mrf.mxu0  ;;  %v5523_v24 = vld [vmem:[%s6354_s19 + $0x8] ss:$16 sps:$4 sm:$0xff]   ;;  %3592 = vmatprep.subr.bf16.mxu0 %v5525_v18 }
 0xda4   : > { %7658 = vst [vmem:[#allocation27_spill] sm:$0xff] %v7034_v32  ;;  %v3165_v21 = vadd.f32 %v3164_v20, %v523_v19  ;;  %3192 = vadd.xlane.f32.xlu0 %v7034_v32  ;;  %v7043_v5 = vadd.f32 %v5789_v26, %v3173_v7  ;;  %v5496_v19 = vld [vmem:[%s6354_s19 + $0x80] ss:$16 sps:$4 sm:$0xff]  }
 0xda5   : > { %3512 = vmatpush1.bf16.msra.mxu1 %v5496_v19  ;;  %3593 = vmatpush1.bf16.msra.mxu0 %v5523_v24 }
 0xda6   : > { %v7039_v4 = vadd.f32 %v5788_v33, %v3165_v21  ;;  %7661 = vst [vmem:[#allocation30_spill] sm:$0xff] %v7043_v5  ;;  %3513 = vmatprep.subr.bf16.mxu1 %v5504_v1  ;;  %v525_v1 = vld [vmem:[%s6340_s6 + $0x4] ss:$0 sm:$0xff] }
 0xda8   : > { %7660 = vst [vmem:[#allocation29_spill] sm:$0xff] %v7039_v4  ;;  %3194 = vadd.xlane.f32.xlu1 %v7039_v4  ;;  %3196 = vadd.xlane.f32.xlu0 %v7037_v10 }
 0xda9   : > { %3514 = vmatpush1.bf16.msra.mxu1 %v5502_v15 }
 0xdaa   : > { %3515 = vmatprep.subr.bf16.mxu1 %v5510_v8 }
 0xdac   : > { %3198 = vadd.xlane.f32.xlu1 %v7043_v5 }
 0xdad   : > { %3516 = vmatpush1.bf16.msra.mxu1 %v5508_v11 }
 0xdae   : > { %3517 = vmatprep.subr.bf16.mxu1 %v5516_v39 }
 0xdb1   : > { %3518 = vmatpush1.bf16.msra.mxu1 %v5514_v60 }
 0xdb2   : > { %3519 = vmatprep.subr.bf16.mxu1 %v5522_v0 }
 0xdb5   : > { %3520 = vmatpush1.bf16.msra.mxu1 %v5520_v48 }
 0xdf0   : > { %v3185_v52 = vpop.xlane.xlu0 %3184 }
 0xdf1   : > { %v3200_v22 = vmul.f32 0.0078125, %v3185_v52 }
 0xdf3   : > { %v7051_v37 = vsub.f32 %v7022_v42, %v3200_v22 }
 0xdf4   : > { %v3189_v54 = vpop.xlane.xlu0 %3188  ;;  %v3187_v43 = vpop.xlane.xlu1 %3186 }
 0xdf5   : > { %v3202_v29 = vmul.f32 0.0078125, %v3189_v54  ;;  %v3201_v35 = vmul.f32 0.0078125, %v3187_v43  ;;  %v3216_v45 = vmul.f32 %v7051_v37, %v7051_v37 }
 0xdf7   : > { %v7056_v57 = vsub.f32 %v7025_v30, %v3202_v29  ;;  %v7059_v59 = vsub.f32 %v7027_v47, %v3201_v35  ;;  %3224 = vadd.xlane.f32.xlu0 %v3216_v45 }
 0xdf8   : > { %v3191_v28 = vpop.xlane.xlu0 %3190 }
 0xdf9   : > { %v3203_v55 = vmul.f32 0.0078125, %v3191_v28  ;;  %v3217_v3 = vmul.f32 %v7059_v59, %v7059_v59  ;;  %v3218_v40 = vmul.f32 %v7056_v57, %v7056_v57 }
 0xdfb   : > { %v7066_v49 = vsub.f32 %v7031_v12, %v3203_v55  ;;  %3226 = vadd.xlane.f32.xlu1 %v3217_v3  ;;  %3228 = vadd.xlane.f32.xlu0 %v3218_v40 }
 0xdfd   : > { %v3219_v36 = vmul.f32 %v7066_v49, %v7066_v49 }
 0xdff   : > { %3230 = vadd.xlane.f32.xlu1 %v3219_v36 }
 0xe2d   : > { %v3193_v20 = vpop.xlane.xlu0 %3192 }
 0xe2e   : > { %v3204_v21 = vmul.f32 0.0078125, %v3193_v20 }
 0xe30   : > { %v7099_v46 = vsub.f32 %v7034_v32, %v3204_v21 }
 0xe31   : > { %v3195_v7 = vpop.xlane.xlu1 %3194  ;;  %v3197_v33 = vpop.xlane.xlu0 %3196 }
 0xe32   : > { %v3205_v26 = vmul.f32 0.0078125, %v3195_v7  ;;  %v3206_v53 = vmul.f32 0.0078125, %v3197_v33  ;;  %v3220_v17 = vmul.f32 %v7099_v46, %v7099_v46 }
 0xe34   : > { %v7104_v9 = vsub.f32 %v7039_v4, %v3205_v26  ;;  %v7107_v61 = vsub.f32 %v7037_v10, %v3206_v53  ;;  %3232 = vadd.xlane.f32.xlu0 %v3220_v17 }
 0xe35   : > { %v3199_v52 = vpop.xlane.xlu1 %3198 }
 0xe36   : > { %v3207_v22 = vmul.f32 0.0078125, %v3199_v52  ;;  %v3221_v54 = vmul.f32 %v7104_v9, %v7104_v9  ;;  %v3222_v43 = vmul.f32 %v7107_v61, %v7107_v61 }
 0xe38   : > { %v7114_v29 = vsub.f32 %v7043_v5, %v3207_v22  ;;  %3234 = vadd.xlane.f32.xlu1 %v3221_v54  ;;  %3236 = vadd.xlane.f32.xlu0 %v3222_v43 }
 0xe3a   : > { %v3223_v35 = vmul.f32 %v7114_v29, %v7114_v29 }
 0xe3c   : > { %3238 = vadd.xlane.f32.xlu1 %v3223_v35 }
 0xe80   : > { %v3225_v45 = vpop.xlane.xlu0 %3224 }
 0xe81   : > { %v3240_v28 = vmul.f32 0.0078125, %v3225_v45 }
 0xe83   : > { %v3248_v55 = vadd.f32 1e-05, %v3240_v28 }
 0xe84   : > { %v3227_v3 = vpop.xlane.xlu1 %3226  ;;  %v3229_v40 = vpop.xlane.xlu0 %3228 }
 0xe85   : > { %5702 = vrsqrt.f32 %v3248_v55  ;;  %v3241_v36 = vmul.f32 0.0078125, %v3227_v3  ;;  %v3242_v63 = vmul.f32 0.0078125, %v3229_v40 }
 0xe87   : > { %v3249_v50 = vadd.f32 1e-05, %v3241_v36  ;;  %v3250_v2 = vadd.f32 1e-05, %v3242_v63 }
 0xe88   : > { %v3231_v13 = vpop.xlane.xlu1 %3230 }
 0xe89   : > { %5704 = vrsqrt.f32 %v3249_v50  ;;  %v3243_v16 = vmul.f32 0.0078125, %v3231_v13  ;;  %v5527_v13 = vld [vmem:[%s6356_s11 + $0xf8] sm:$0xff]  }
 0xe8a   : > { %5706 = vrsqrt.f32 %v3250_v2  ;;  %4960 = vmatprep.subr.bf16.mxu0 %v5527_v13 }
 0xe8b   : > { %v3251_v25 = vadd.f32 1e-05, %v3243_v16  ;;  %v5528_v16 = vld [vmem:[%s6356_s11 + $0x38] sm:$0xff]  }
 0xe8d   : > { %5708 = vrsqrt.f32 %v3251_v25  ;;  %v7138_v25 = vld [vmem:[%s6356_s11 + $0xb8] sm:$0xff]  }
 0xe92   : > { %v5703_v27 = vpop.eup %5702 }
 0xe93   : > { %v3264_v44 = vmul.f32 %v5703_v27, %v7051_v37  ;;  %v7143_v27 = vld [vmem:[%s6356_s11 + $0xf0] sm:$0xff]  }
 0xe95   : > { %v3272_v31 = vmul.f32 %v3264_v44, %v524_v14  ;;  %v5532_v44 = vld [vmem:[%s6356_s11 + $0x30] sm:$0xff]  }
 0xe96   : > { %v5705_v34 = vpop.eup %5704 }
 0xe97   : > { %v3265_v19 = vmul.f32 %v5705_v34, %v7059_v59  ;;  %v5707_v15 = vpop.eup %5706  ;;  %v3280_v8 = vadd.f32 %v3272_v31, %v525_v1  ;;  %v5534_v34 = vld [vmem:[%s6356_s11 + $0x68] sm:$0xff]  }
 0xe98   : > { %v3266_v11 = vmul.f32 %v5707_v15, %v7056_v57  ;;  %v5536_v31 = vld [vmem:[%s6356_s11 + $0x28] sm:$0xff]  }
 0xe99   : > { %v3273_v62 = vmul.f32 %v3265_v19, %v524_v14  ;;  %v7153_v19 = vld [vmem:[%s6356_s11 + $0xe8] sm:$0xff]  }
 0xe9a   : > { %v5709_v38 = vpop.eup %5708  ;;  %v3274_v37 = vmul.f32 %v3266_v11, %v524_v14  ;;  %v7157_v15 = vld [vmem:[%s6356_s11 + $0xa8] sm:$0xff]   ;;  %v7173_v11 = vld [vmem:[%s6356_s11 + $0xd8] sm:$0xff]  }
 0xe9b   : > { %v3281_v58 = vadd.f32 %v3273_v62, %v525_v1  ;;  %v3267_v56 = vmul.f32 %v5709_v38, %v7066_v49  ;;  %v7163_v62 = vld [vmem:[%s6356_s11 + $0xe0] sm:$0xff]  }
 0xe9c   : > { %v3282_v60 = vadd.f32 %v3274_v37, %v525_v1  ;;  %v5540_v38 = vld [vmem:[%s6356_s11 + $0x20] sm:$0xff]   ;;  %v7183_v37 = vld [vmem:[%s6356_s11 + $0xd0] sm:$0xff]  }
 0xe9d   : > { %v3288_v39 = vpack.c.bf16 %v3281_v58, %v3280_v8  ;;  %v3275_v51 = vmul.f32 %v3267_v56, %v524_v14  ;;  %v7167_v8 = vld [vmem:[%s6356_s11 + $0xa0] sm:$0xff]   ;;  %v5542_v58 = vld [vmem:[%s6356_s11 + $0x58] sm:$0xff]  }
 0xe9e   : > { %v5544_v56 = vld [vmem:[%s6356_s11 + $0x18] sm:$0xff]  }
 0xe9f   : > { %3538 = vmatmul.mubr.bf16.vlgmr.msra.gmra.mxu1 %v3288_v39  ;;  %3611 = vmatmul.mubr.bf16.vlgmr.msra.gmra.mxu0 %v3288_v39  ;;  %v3283_v59 = vadd.f32 %v3275_v51, %v525_v1  ;;  %v7177_v39 = vld [vmem:[%s6356_s11 + $0x98] sm:$0xff]   ;;  %v5546_v51 = vld [vmem:[%s6356_s11 + $0x50] sm:$0xff]  }
 0xea0   : > { %3547 = vmatprep.mubr.bf16.mxu1 %v6109_v6  ;;  %3620 = vmatprep.mubr.bf16.mxu0 %v6109_v6 }
 0xea1   : > { %v3289_v41 = vpack.c.bf16 %v3283_v59, %v3282_v60  ;;  %4961 = vmatpush3.bf16.msra.mxu0 %v7138_v25  ;;  %v5548_v59 = vld [vmem:[%s6356_s11 + $0x10] sm:$0xff]  }
 0xea2   : > { %4962 = vmatprep.subr.bf16.mxu0 %v7143_v27  ;;  %v7187_v60 = vld [vmem:[%s6356_s11 + $0x90] sm:$0xff]  }
 0xea7   : > { %3548 = vmatmul.mubr.bf16.gmra.mxu1 %v3289_v41  ;;  %3621 = vmatmul.mubr.bf16.gmra.mxu0 %v3289_v41  ;;  %v5550_v41 = vld [vmem:[%s6356_s11 + $0x48] sm:$0xff]  }
 0xea8   : > { %3557 = vmatprep.mubr.bf16.mxu1 %v6109_v6  ;;  %3630 = vmatprep.mubr.bf16.mxu0 %v6109_v6 }
 0xebd   : > { %v3233_v57 = vpop.xlane.xlu0 %3232 }
 0xebe   : > { %v3244_v49 = vmul.f32 0.0078125, %v3233_v57  ;;  %v7192_v57 = vld [vmem:[%s6356_s11 + $0xc8] sm:$0xff]  }
 0xec0   : > { %v3252_v0 = vadd.f32 1e-05, %v3244_v49  ;;  %v5552_v49 = vld [vmem:[%s6356_s11 + $0x8] sm:$0xff]  }
 0xec1   : > { %v3235_v18 = vpop.xlane.xlu1 %3234  ;;  %v3237_v48 = vpop.xlane.xlu0 %3236 }
 0xec2   : > { %5710 = vrsqrt.f32 %v3252_v0  ;;  %v3245_v24 = vmul.f32 0.0078125, %v3235_v18  ;;  %v3246_v20 = vmul.f32 0.0078125, %v3237_v48  ;;  %v7197_v0 = vld [vmem:[%s6356_s11 + $0x88] sm:$0xff]   ;;  %v5554_v18 = vld [vmem:[%s6356_s11 + $0x40] sm:$0xff]  }
 0xec3   : > { %v7202_v48 = vld [vmem:[%s6356_s11 + $0xc0] sm:$0xff]  }
 0xec4   : > { %v3253_v21 = vadd.f32 1e-05, %v3245_v24  ;;  %v3254_v7 = vadd.f32 1e-05, %v3246_v20  ;;  %v5556_v24 = vld [vmem:[%s6356_s11] sm:$0xff]  }
 0xec5   : > { %v3239_v33 = vpop.xlane.xlu1 %3238  ;;  %v7207_v20 = vld [vmem:[%s6356_s11 + $0x80] sm:$0xff]  }
 0xec6   : > { %5712 = vrsqrt.f32 %v3253_v21  ;;  %v3247_v26 = vmul.f32 0.0078125, %v3239_v33  ;;  %v3327_v21 = vsub.s32 0, %v6499_v23  ;;  %v4692_v33 = vld [vmem:[%s6340_s6 + $0x6] ss:$8 sm:$0xf] }
 0xec7   : > { %5714 = vrsqrt.f32 %v3254_v7  ;;  %v3335_v7 = vsub.s32 2, %v6499_v23 }
 0xec8   : > { %v3255_v53 = vadd.f32 1e-05, %v3247_v26  ;;  %v3331_v26 = vsub.s32 1, %v6499_v23 }
 0xeca   : > { %5716 = vrsqrt.f32 %v3255_v53  ;;  %v3339_v53 = vsub.s32 3, %v6499_v23 }
 0xecf   : > { %v5711_v17 = vpop.eup %5710 }
 0xed0   : > { %v3268_v52 = vmul.f32 %v5711_v17, %v7099_v46  ;;  %v7216_v17 = vrot.slane %v4692_v33, %v3327_v21 }
 0xed2   : > { %v3276_v43 = vmul.f32 %v3268_v52, %v524_v14  ;;  %v7218_v52 = vrot.slane %v4692_v33, %v3335_v7 }
 0xed3   : > { %v5713_v22 = vpop.eup %5712 }
 0xed4   : > { %v3269_v54 = vmul.f32 %v5713_v22, %v7104_v9  ;;  %v5715_v35 = vpop.eup %5714  ;;  %v3284_v55 = vadd.f32 %v3276_v43, %v525_v1  ;;  %v7220_v22 = vrot.slane %v4692_v33, %v3331_v26 }
 0xed5   : > { %v3270_v40 = vmul.f32 %v5715_v35, %v7107_v61 }
 0xed6   : > { %v3277_v45 = vmul.f32 %v3269_v54, %v524_v14  ;;  %v7222_v54 = vrot.slane %v4692_v33, %v3339_v53 }
 0xed7   : > { %v5717_v28 = vpop.eup %5716  ;;  %v3278_v46 = vmul.f32 %v3270_v40, %v524_v14 }
 0xed8   : > { %v3285_v3 = vadd.f32 %v3277_v45, %v525_v1  ;;  %v3271_v36 = vmul.f32 %v5717_v28, %v7114_v29  ;;  %v5526_v29 = vld [vmem:[%s6356_s11 + $0x78] sm:$0xff]  }
 0xed9   : > { %v3286_v2 = vadd.f32 %v3278_v46, %v525_v1  ;;  %4920 = vmatprep.subr.bf16.mxu1 %v5526_v29 }
 0xeda   : > { %v3290_v63 = vpack.c.bf16 %v3285_v3, %v3284_v55  ;;  %v3279_v50 = vmul.f32 %v3271_v36, %v524_v14  ;;  %4921 = vmatpush3.bf16.msra.mxu1 %v5528_v16  ;;  %v7147_v14 = vld [vmem:[%s6356_s11 + $0xb0] sm:$0xff]  }
 0xedb   : > { %4963 = vmatpush3.bf16.msra.mxu0 %v7147_v14 }
 0xedc   : > { %3558 = vmatmul.mubr.bf16.gmra.mxu1 %v3290_v63  ;;  %3631 = vmatmul.mubr.bf16.gmra.mxu0 %v3290_v63  ;;  %v3287_v9 = vadd.f32 %v3279_v50, %v525_v1  ;;  %v5538_v1 = vld [vmem:[%s6356_s11 + $0x60] sm:$0xff]  }
 0xedd   : > { %3567 = vmatprep.mubr.bf16.mxu1 %v6109_v6  ;;  %3640 = vmatprep.mubr.bf16.mxu0 %v6109_v6  ;;  %v5530_v6 = vld [vmem:[%s6356_s11 + $0x70] sm:$0xff]  }
 0xede   : > { %v3291_v61 = vpack.c.bf16 %v3287_v9, %v3286_v2  ;;  %4922 = vmatprep.subr.bf16.mxu1 %v5530_v6  ;;  %4964 = vmatprep.subr.bf16.mxu0 %v7153_v19 }
 0xedf   : > { %4923 = vmatpush3.bf16.msra.mxu1 %v5532_v44  ;;  %4965 = vmatpush3.bf16.msra.mxu0 %v7157_v15 }
 0xee0   : > { %4924 = vmatprep.subr.bf16.mxu1 %v5534_v34  ;;  %4966 = vmatprep.subr.bf16.mxu0 %v7163_v62 }
 0xee3   : > { %4925 = vmatpush3.bf16.msra.mxu1 %v5536_v31  ;;  %4967 = vmatpush3.bf16.msra.mxu0 %v7167_v8 }
 0xee4   : > { %3568 = vmatmul.mubr.bf16.gmra.mxu1 %v3291_v61  ;;  %3641 = vmatmul.mubr.bf16.gmra.mxu0 %v3291_v61 }
 0xee5   : > { %4926 = vmatprep.subr.bf16.mxu1 %v5538_v1  ;;  %4968 = vmatprep.subr.bf16.mxu0 %v7173_v11 }
 0xee7   : > { %4927 = vmatpush3.bf16.msra.mxu1 %v5540_v38  ;;  %4969 = vmatpush3.bf16.msra.mxu0 %v7177_v39 }
 0xee8   : > { %4928 = vmatprep.subr.bf16.mxu1 %v5542_v58  ;;  %4970 = vmatprep.subr.bf16.mxu0 %v7183_v37 }
 0xeeb   : > { %4929 = vmatpush3.bf16.msra.mxu1 %v5544_v56  ;;  %4971 = vmatpush3.bf16.msra.mxu0 %v7187_v60 }
 0xeec   : > { %4930 = vmatprep.subr.bf16.mxu1 %v5546_v51  ;;  %4972 = vmatprep.subr.bf16.mxu0 %v7192_v57 }
 0xeef   : > { %4931 = vmatpush3.bf16.msra.mxu1 %v5548_v59  ;;  %4973 = vmatpush3.bf16.msra.mxu0 %v7197_v0 }
 0xef0   : > { %4932 = vmatprep.subr.bf16.mxu1 %v5550_v41  ;;  %4974 = vmatprep.subr.bf16.mxu0 %v7202_v48 }
 0xef3   : > { %4933 = vmatpush3.bf16.msra.mxu1 %v5552_v49  ;;  %4975 = vmatpush3.bf16.msra.mxu0 %v7207_v20 }
 0xef4   : > { %4934 = vmatprep.subr.bf16.mxu1 %v5554_v18 }
 0xef7   : > { %4935 = vmatpush3.bf16.msra.mxu1 %v5556_v24 }
 0xef8   : > { %5240 = vmatprep.subr.bf16.mxu1 %v5527_v13 }
 0xf5f   : > { %v3539_v43 = vpop.f32.mrf.mxu1  ;;  %v3612_v35 = vpop.f32.mrf.mxu0 }
 0xf60   : > { %v7225_v45 = vadd.f32 %v3539_v43, %v7216_v17  ;;  %v7228_v28 = vadd.f32 %v3612_v35, %v7218_v52 }
 0xf61   : > { %v3541_v55 = vpop.f32.mrf.mxu1  ;;  %v3614_v3 = vpop.f32.mrf.mxu0 }
 0xf62   : > { %v3651_v23 = vmul.f32 %v7225_v45, %v7225_v45  ;;  %v3653_v40 = vmul.f32 %v7228_v28, %v7228_v28  ;;  %v7235_v36 = vadd.f32 %v3541_v55, %v7220_v22  ;;  %v7238_v63 = vadd.f32 %v3614_v3, %v7222_v54 }
 0xf63   : > { %v3543_v50 = vpop.f32.mrf.mxu1  ;;  %v3616_v46 = vpop.f32.mrf.mxu0 }
 0xf64   : > { %v3683_v9 = vmul.f32 %v3651_v23, %v7225_v45  ;;  %v3685_v2 = vmul.f32 %v3653_v40, %v7228_v28  ;;  %v3652_v61 = vmul.f32 %v7235_v36, %v7235_v36  ;;  %v3654_v29 = vmul.f32 %v7238_v63, %v7238_v63 }
 0xf65   : > { %v7247_v13 = vadd.f32 %v3543_v50, %v7216_v17  ;;  %v7250_v16 = vadd.f32 %v3616_v46, %v7218_v52  ;;  %v3545_v6 = vpop.f32.mrf.mxu1  ;;  %v3618_v44 = vpop.f32.mrf.mxu0 }
 0xf66   : > { %v3715_v34 = vmul.f32 0.044715, %v3683_v9  ;;  %v3717_v31 = vmul.f32 0.044715, %v3685_v2  ;;  %v3684_v1 = vmul.f32 %v3652_v61, %v7235_v36  ;;  %v3686_v38 = vmul.f32 %v3654_v29, %v7238_v63 }
 0xf67   : > { %v3655_v58 = vmul.f32 %v7247_v13, %v7247_v13  ;;  %v3657_v56 = vmul.f32 %v7250_v16, %v7250_v16  ;;  %v7259_v51 = vadd.f32 %v3545_v6, %v7220_v22  ;;  %v7262_v59 = vadd.f32 %v3618_v44, %v7222_v54  ;;  %v3549_v41 = vpop.f32.mrf.mxu1  ;;  %v3622_v49 = vpop.f32.mrf.mxu0 }
 0xf68   : > { %v3747_v18 = vadd.f32 %v3715_v34, %v7225_v45  ;;  %v3749_v24 = vadd.f32 %v3717_v31, %v7228_v28  ;;  %v3716_v21 = vmul.f32 0.044715, %v3684_v1  ;;  %v3718_v7 = vmul.f32 0.044715, %v3686_v38 }
 0xf69   : > { %v3687_v33 = vmul.f32 %v3655_v58, %v7247_v13  ;;  %v3689_v26 = vmul.f32 %v3657_v56, %v7250_v16  ;;  %v3656_v53 = vmul.f32 %v7259_v51, %v7259_v51  ;;  %v3658_v43 = vmul.f32 %v7262_v59, %v7262_v59  ;;  %v3551_v40 = vpop.f32.mrf.mxu1  ;;  %v3624_v61 = vpop.f32.mrf.mxu0 }
 0xf6a   : > { %v3779_v35 = vmul.f32 0.7978846, %v3747_v18  ;;  %v3781_v55 = vmul.f32 0.7978846, %v3749_v24  ;;  %v3748_v3 = vadd.f32 %v3716_v21, %v7235_v36  ;;  %v3750_v23 = vadd.f32 %v3718_v7, %v7238_v63 }
 0xf6b   : > { %v3719_v50 = vmul.f32 0.044715, %v3687_v33  ;;  %v3721_v46 = vmul.f32 0.044715, %v3689_v26  ;;  %v3688_v9 = vmul.f32 %v3656_v53, %v7259_v51  ;;  %v3690_v2 = vmul.f32 %v3658_v43, %v7262_v59  ;;  %v3553_v18 = vpop.f32.mrf.mxu1  ;;  %v3626_v7 = vpop.f32.mrf.mxu0 }
 0xf6c   : > { %5718 = vtanh.f32 %v3779_v35  ;;  %v3780_v29 = vmul.f32 0.7978846, %v3748_v3  ;;  %v3782_v6 = vmul.f32 0.7978846, %v3750_v23  ;;  %v7277_v44 = vadd.f32 %v3549_v41, %v7216_v17 }
 0xf6d   : > { %5720 = vtanh.f32 %v3781_v55  ;;  %v3751_v34 = vadd.f32 %v3719_v50, %v7247_v13  ;;  %v3753_v31 = vadd.f32 %v3721_v46, %v7250_v16  ;;  %v3720_v1 = vmul.f32 0.044715, %v3688_v9  ;;  %v3555_v46 = vpop.f32.mrf.mxu1 }
 0xf6e   : > { %5722 = vtanh.f32 %v3780_v29  ;;  %v3722_v38 = vmul.f32 0.044715, %v3690_v2  ;;  %v3659_v58 = vmul.f32 %v7277_v44, %v7277_v44  ;;  %v7284_v56 = vadd.f32 %v3622_v49, %v7218_v52 }
 0xf6f   : > { %5724 = vtanh.f32 %v3782_v6  ;;  %v3783_v24 = vmul.f32 0.7978846, %v3751_v34  ;;  %v3785_v21 = vmul.f32 0.7978846, %v3753_v31  ;;  %v3752_v41 = vadd.f32 %v3720_v1, %v7259_v51 }
 0xf70   : > { %v3754_v33 = vadd.f32 %v3722_v38, %v7262_v59  ;;  %v3691_v26 = vmul.f32 %v3659_v58, %v7277_v44  ;;  %v3661_v53 = vmul.f32 %v7284_v56, %v7284_v56  ;;  %v7292_v43 = vadd.f32 %v3551_v40, %v7220_v22 }
 0xf71   : > { %5726 = vtanh.f32 %v3783_v24  ;;  %v3784_v49 = vmul.f32 0.7978846, %v3752_v41  ;;  %v7295_v35 = vadd.f32 %v3624_v61, %v7222_v54  ;;  %v7298_v55 = vadd.f32 %v3553_v18, %v7216_v17  ;;  %v3628_v61 = vpop.f32.mrf.mxu0 }
 0xf72   : > { %5728 = vtanh.f32 %v3785_v21  ;;  %v3786_v3 = vmul.f32 0.7978846, %v3754_v33  ;;  %v3723_v23 = vmul.f32 0.044715, %v3691_v26  ;;  %v3693_v50 = vmul.f32 %v3661_v53, %v7284_v56 }
 0xf73   : > { %5730 = vtanh.f32 %v3784_v49  ;;  %v3660_v9 = vmul.f32 %v7292_v43, %v7292_v43  ;;  %v3662_v40 = vmul.f32 %v7295_v35, %v7295_v35  ;;  %v3663_v2 = vmul.f32 %v7298_v55, %v7298_v55 }
 0xf74   : > { %5732 = vtanh.f32 %v3786_v3  ;;  %v3755_v29 = vadd.f32 %v3723_v23, %v7277_v44  ;;  %v3725_v6 = vmul.f32 0.044715, %v3693_v50  ;;  %v7309_v34 = vadd.f32 %v3626_v7, %v7218_v52 }
 0xf75   : > { %v3692_v31 = vmul.f32 %v3660_v9, %v7292_v43  ;;  %v3694_v1 = vmul.f32 %v3662_v40, %v7295_v35  ;;  %v3695_v38 = vmul.f32 %v3663_v2, %v7298_v55  ;;  %v7315_v58 = vadd.f32 %v3555_v46, %v7220_v22 }
 0xf76   : > { %v3787_v18 = vmul.f32 0.7978846, %v3755_v29  ;;  %v3757_v24 = vadd.f32 %v3725_v6, %v7284_v56  ;;  %v3665_v21 = vmul.f32 %v7309_v34, %v7309_v34  ;;  %v7321_v41 = vadd.f32 %v3628_v61, %v7222_v54 }
 0xf77   : > { %v3724_v7 = vmul.f32 0.044715, %v3692_v31  ;;  %v3726_v33 = vmul.f32 0.044715, %v3694_v1  ;;  %v3727_v26 = vmul.f32 0.044715, %v3695_v38  ;;  %v3664_v53 = vmul.f32 %v7315_v58, %v7315_v58 }
 0xf78   : > { %v3789_v49 = vmul.f32 0.7978846, %v3757_v24  ;;  %v3697_v3 = vmul.f32 %v3665_v21, %v7309_v34  ;;  %v3666_v23 = vmul.f32 %v7321_v41, %v7321_v41  ;;  %5734 = vtanh.f32 %v3787_v18 }
 0xf79   : > { %v5719_v50 = vpop.eup %5718  ;;  %v3756_v46 = vadd.f32 %v3724_v7, %v7292_v43  ;;  %v3758_v9 = vadd.f32 %v3726_v33, %v7295_v35  ;;  %v3759_v40 = vadd.f32 %v3727_v26, %v7298_v55  ;;  %v3696_v2 = vmul.f32 %v3664_v53, %v7315_v58 }
 0xf7a   : > { %v5721_v61 = vpop.eup %5720  ;;  %v3729_v29 = vmul.f32 0.044715, %v3697_v3  ;;  %v3698_v6 = vmul.f32 %v3666_v23, %v7321_v41  ;;  %5736 = vtanh.f32 %v3789_v49  ;;  %v3843_v4 = vadd.f32 1.0, %v5719_v50 }
 0xf7b   : > { %v5723_v31 = vpop.eup %5722  ;;  %v3788_v1 = vmul.f32 0.7978846, %v3756_v46  ;;  %v3790_v38 = vmul.f32 0.7978846, %v3758_v9  ;;  %v3791_v21 = vmul.f32 0.7978846, %v3759_v40 }
 0xf7c   : > { %v5725_v24 = vpop.eup %5724  ;;  %v3761_v5 = vadd.f32 %v3729_v29, %v7309_v34  ;;  %v3728_v7 = vmul.f32 0.044715, %v3696_v2  ;;  %v3730_v33 = vmul.f32 0.044715, %v3698_v6  ;;  %v3844_v10 = vadd.f32 1.0, %v5723_v31 }
 0xf7d   : > { %5738 = vtanh.f32 %v3788_v1  ;;  %v3845_v32 = vadd.f32 1.0, %v5721_v61  ;;  %v3846_v50 = vadd.f32 1.0, %v5725_v24 }
 0xf7e   : > { %v5727_v26 = vpop.eup %5726  ;;  %5740 = vtanh.f32 %v3790_v38  ;;  %v3793_v53 = vmul.f32 0.7978846, %v3761_v5  ;;  %v3760_v3 = vadd.f32 %v3728_v7, %v7315_v58  ;;  %v3762_v46 = vadd.f32 %v3730_v33, %v7321_v41 }
 0xf7f   : > { %v5729_v23 = vpop.eup %5728  ;;  %v3847_v18 = vadd.f32 1.0, %v5727_v26  ;;  %5742 = vtanh.f32 %v3791_v21  ;;  %v3876_v2 = vmul.f32 0.5, %v3844_v10  ;;  %v3875_v38 = vmul.f32 0.5, %v3843_v4 }
 0xf80   : > { %v5731_v49 = vpop.eup %5730  ;;  %v3849_v9 = vadd.f32 1.0, %v5729_v23  ;;  %5744 = vtanh.f32 %v3793_v53  ;;  %v3792_v40 = vmul.f32 0.7978846, %v3760_v3  ;;  %v3794_v31 = vmul.f32 0.7978846, %v3762_v46 }
 0xf81   : > { %v5733_v29 = vpop.eup %5732  ;;  %v3879_v6 = vmul.f32 0.5, %v3847_v18  ;;  %v3848_v1 = vadd.f32 1.0, %v5731_v49  ;;  %v3877_v12 = vmul.f32 0.5, %v3845_v32  ;;  %v3878_v21 = vmul.f32 0.5, %v3846_v50 }
 0xf82   : > { %v3881_v5 = vmul.f32 0.5, %v3849_v9  ;;  %5746 = vtanh.f32 %v3792_v40  ;;  %v3850_v7 = vadd.f32 1.0, %v5733_v29  ;;  %v3908_v10 = vmul.f32 %v3876_v2, %v7235_v36 }
 0xf83   : > { %5748 = vtanh.f32 %v3794_v31  ;;  %v3880_v61 = vmul.f32 0.5, %v3848_v1  ;;  %v3911_v33 = vmul.f32 %v3879_v6, %v7247_v13  ;;  %v3907_v23 = vmul.f32 %v3875_v38, %v7225_v45 }
 0xf84   : > { %v3882_v26 = vmul.f32 0.5, %v3850_v7  ;;  %v3913_v53 = vmul.f32 %v3881_v5, %v7250_v16  ;;  %v3910_v4 = vmul.f32 %v3878_v21, %v7238_v63  ;;  %v3909_v32 = vmul.f32 %v3877_v12, %v7228_v28 }
 0xf85   : > { %v3912_v3 = vmul.f32 %v3880_v61, %v7259_v51  ;;  %v5735_v46 = vpop.eup %5734  ;;  %v3939_v49 = vpack.c.bf16 %v3911_v33, %v3907_v23 }
 0xf86   : > { %v3914_v24 = vmul.f32 %v3882_v26, %v7262_v59  ;;  %v3941_v40 = vpack.c.bf16 %v3913_v53, %v3909_v32  ;;  %v3851_v28 = vadd.f32 1.0, %v5735_v46 }
 0xf87   : > { %v3940_v18 = vpack.c.bf16 %v3912_v3, %v3908_v10  ;;  %v5737_v13 = vpop.eup %5736 }
 0xf88   : > { %v3942_v9 = vpack.c.bf16 %v3914_v24, %v3910_v4  ;;  %v3853_v2 = vadd.f32 1.0, %v5737_v13  ;;  %v3883_v61 = vmul.f32 0.5, %v3851_v28 }
 0xf89   : > { %4243 = vmatprep.mubr.bf16.mxu1 %v3940_v18 }
 0xf8a   : > { %v5739_v16 = vpop.eup %5738  ;;  %4308 = vmatprep.mubr.bf16.mxu0 %v3942_v9  ;;  %4244 = vmatmul.mubr.bf16.vlgmr.msra.gmra.mxu1 %v3939_v49  ;;  %v3885_v21 = vmul.f32 0.5, %v3853_v2  ;;  %v3915_v23 = vmul.f32 %v3883_v61, %v7277_v44 }
 0xf8b   : > { %v5741_v36 = vpop.eup %5740  ;;  %4309 = vmatmul.mubr.bf16.vlgmr.msra.gmra.mxu0 %v3941_v40  ;;  %5248 = vmatpush3.bf16.msra.mxu1 %v7138_v25  ;;  %v3852_v63 = vadd.f32 1.0, %v5739_v16 }
 0xf8c   : > { %v5743_v45 = vpop.eup %5742  ;;  %5241 = vmatprep.subr.bf16.mxu1 %v7143_v27  ;;  %v3854_v12 = vadd.f32 1.0, %v5741_v36  ;;  %v3917_v24 = vmul.f32 %v3885_v21, %v7284_v56 }
 0xf8d   : > { %v5745_v51 = vpop.eup %5744  ;;  %v3855_v59 = vadd.f32 1.0, %v5743_v45  ;;  %v3884_v38 = vmul.f32 0.5, %v3852_v63 }
 0xf8e   : > { %v3857_v29 = vadd.f32 1.0, %v5745_v51  ;;  %v3886_v7 = vmul.f32 0.5, %v3854_v12 }
 0xf8f   : > { %v5747_v6 = vpop.eup %5746  ;;  %v3887_v31 = vmul.f32 0.5, %v3855_v59  ;;  %5249 = vmatpush3.bf16.msra.mxu1 %v7147_v14  ;;  %v3916_v53 = vmul.f32 %v3884_v38, %v7292_v43 }
 0xf90   : > { %v5749_v1 = vpop.eup %5748  ;;  %v3856_v50 = vadd.f32 1.0, %v5747_v6  ;;  %v3889_v5 = vmul.f32 0.5, %v3857_v29  ;;  %5242 = vmatprep.subr.bf16.mxu1 %v7153_v19  ;;  %v3918_v19 = vmul.f32 %v3886_v7, %v7295_v35 }
 0xf91   : > { %v3858_v25 = vadd.f32 1.0, %v5749_v1  ;;  %v3919_v26 = vmul.f32 %v3887_v31, %v7298_v55 }
 0xf92   : > { %v3888_v27 = vmul.f32 0.5, %v3856_v50  ;;  %v3921_v10 = vmul.f32 %v3889_v5, %v7309_v34 }
 0xf93   : > { %v3890_v33 = vmul.f32 0.5, %v3858_v25  ;;  %5250 = vmatpush3.bf16.msra.mxu1 %v7157_v15  ;;  %v3943_v32 = vpack.c.bf16 %v3919_v26, %v3915_v23 }
 0xf94   : > { %v3920_v14 = vmul.f32 %v3888_v27, %v7315_v58  ;;  %5243 = vmatprep.subr.bf16.mxu1 %v7163_v62  ;;  %v3945_v15 = vpack.c.bf16 %v3921_v10, %v3917_v24 }
 0xf95   : > { %v3922_v3 = vmul.f32 %v3890_v33, %v7321_v41 }
 0xf96   : > { %v3944_v4 = vpack.c.bf16 %v3920_v14, %v3916_v53 }
 0xf97   : > { %v3946_v55 = vpack.c.bf16 %v3922_v3, %v3918_v19  ;;  %5251 = vmatpush3.bf16.msra.mxu1 %v7167_v8 }
 0xf98   : > { %4251 = vmatprep.mubr.bf16.mxu1 %v3944_v4  ;;  %5244 = vmatprep.subr.bf16.mxu1 %v7173_v11 }
 0xf99   : > { %4316 = vmatprep.mubr.bf16.mxu0 %v3946_v55  ;;  %4252 = vmatmul.mubr.bf16.gmra.mxu1 %v3943_v32 }
 0xf9a   : > { %4317 = vmatmul.mubr.bf16.gmra.mxu0 %v3945_v15 }
 0xf9b   : > { %5252 = vmatpush3.bf16.msra.mxu1 %v7177_v39 }
 0xf9c   : > { %v3559_v62 = vpop.f32.mrf.mxu1  ;;  %v3632_v43 = vpop.f32.mrf.mxu0  ;;  %5245 = vmatprep.subr.bf16.mxu1 %v7183_v37 }
 0xf9d   : > { %v7363_v44 = vadd.f32 %v3559_v62, %v7216_v17  ;;  %v7396_v51 = vadd.f32 %v3632_v43, %v7218_v52 }
 0xf9e   : > { %v3561_v56 = vpop.f32.mrf.mxu1  ;;  %v3634_v35 = vpop.f32.mrf.mxu0 }
 0xf9f   : > { %v3667_v8 = vmul.f32 %v7363_v44, %v7363_v44  ;;  %v7368_v34 = vadd.f32 %v3561_v56, %v7220_v22  ;;  %v7371_v11 = vadd.f32 %v3634_v35, %v7222_v54  ;;  %5253 = vmatpush3.bf16.msra.mxu1 %v7187_v60  ;;  %v3669_v25 = vmul.f32 %v7396_v51, %v7396_v51 }
 0xfa0   : > { %v3563_v39 = vpop.f32.mrf.mxu1  ;;  %v3636_v58 = vpop.f32.mrf.mxu0  ;;  %5246 = vmatprep.subr.bf16.mxu1 %v7192_v57 }
 0xfa1   : > { %v3699_v37 = vmul.f32 %v3667_v8, %v7363_v44  ;;  %v3668_v41 = vmul.f32 %v7368_v34, %v7368_v34  ;;  %v7379_v18 = vadd.f32 %v3563_v39, %v7216_v17  ;;  %v3670_v60 = vmul.f32 %v7371_v11, %v7371_v11 }
 0xfa2   : > { %v3565_v46 = vpop.f32.mrf.mxu1  ;;  %v3638_v49 = vpop.f32.mrf.mxu0  ;;  %v3701_v23 = vmul.f32 %v3669_v25, %v7396_v51 }
 0xfa3   : > { %v3731_v9 = vmul.f32 0.044715, %v3699_v37  ;;  %v3700_v13 = vmul.f32 %v3668_v41, %v7368_v34  ;;  %5254 = vmatpush3.bf16.msra.mxu1 %v7197_v0  ;;  %v3671_v57 = vmul.f32 %v7379_v18, %v7379_v18  ;;  %v7388_v40 = vadd.f32 %v3565_v46, %v7220_v22 }
 0xfa4   : > { %v7391_v16 = vadd.f32 %v3638_v49, %v7222_v54  ;;  %v3569_v36 = vpop.f32.mrf.mxu1  ;;  %v3642_v45 = vpop.f32.mrf.mxu0  ;;  %5247 = vmatprep.subr.bf16.mxu1 %v7202_v48  ;;  %v7399_v0 = vadd.f32 %v3636_v58, %v7218_v52  ;;  %v3702_v6 = vmul.f32 %v3670_v60, %v7371_v11  ;;  %v3733_v46 = vmul.f32 0.044715, %v3701_v23 }
 0xfa5   : > { %v3763_v63 = vadd.f32 %v3731_v9, %v7363_v44  ;;  %v3732_v12 = vmul.f32 0.044715, %v3700_v13  ;;  %v3703_v28 = vmul.f32 %v3671_v57, %v7379_v18  ;;  %v3672_v59 = vmul.f32 %v7388_v40, %v7388_v40 }
 0xfa6   : > { %v3674_v2 = vmul.f32 %v7391_v16, %v7391_v16  ;;  %v3571_v31 = vpop.f32.mrf.mxu1  ;;  %v3644_v5 = vpop.f32.mrf.mxu0  ;;  %v3673_v61 = vmul.f32 %v7399_v0, %v7399_v0  ;;  %v7416_v27 = vadd.f32 %v3569_v36, %v7216_v17  ;;  %v3734_v33 = vmul.f32 0.044715, %v3702_v6 }
 0xfa7   : > { %v3795_v29 = vmul.f32 0.7978846, %v3763_v63  ;;  %v3764_v48 = vadd.f32 %v3732_v12, %v7368_v34  ;;  %5255 = vmatpush3.bf16.msra.mxu1 %v7207_v20  ;;  %v3735_v1 = vmul.f32 0.044715, %v3703_v28  ;;  %v3704_v50 = vmul.f32 %v3672_v59, %v7388_v40 }
 0xfa8   : > { %v3706_v38 = vmul.f32 %v3674_v2, %v7391_v16  ;;  %v3675_v53 = vmul.f32 %v7416_v27, %v7416_v27  ;;  %v3573_v14 = vpop.f32.mrf.mxu1  ;;  %v3646_v3 = vpop.f32.mrf.mxu0  ;;  %v3705_v4 = vmul.f32 %v3673_v61, %v7399_v0  ;;  %v7426_v55 = vadd.f32 %v3571_v31, %v7220_v22 }
 0xfa9   : > { %v3796_v7 = vmul.f32 0.7978846, %v3764_v48  ;;  %5750 = vtanh.f32 %v3795_v29  ;;  %v3767_v21 = vadd.f32 %v3735_v1, %v7379_v18  ;;  %v3736_v20 = vmul.f32 0.044715, %v3704_v50 }
 0xfaa   : > { %v3738_v26 = vmul.f32 0.044715, %v3706_v38  ;;  %v3707_v24 = vmul.f32 %v3675_v53, %v7416_v27  ;;  %v7429_v15 = vadd.f32 %v3644_v5, %v7222_v54  ;;  %v7432_v62 = vadd.f32 %v3573_v14, %v7216_v17  ;;  %v3575_v8 = vpop.f32.mrf.mxu1  ;;  %v3648_v41 = vpop.f32.mrf.mxu0 }
 0xfab   : > { %5752 = vtanh.f32 %v3796_v7  ;;  %v3799_v10 = vmul.f32 0.7978846, %v3767_v21  ;;  %v3768_v19 = vadd.f32 %v3736_v20, %v7388_v40  ;;  %v3766_v43 = vadd.f32 %v3734_v33, %v7371_v11 }
 0xfac   : > { %v3770_v56 = vadd.f32 %v3738_v26, %v7391_v16  ;;  %v3739_v35 = vmul.f32 0.044715, %v3707_v24  ;;  %v3676_v39 = vmul.f32 %v7426_v55, %v7426_v55  ;;  %v3678_v58 = vmul.f32 %v7429_v15, %v7429_v15 }
 0xfad   : > { %5754 = vtanh.f32 %v3799_v10  ;;  %v3800_v32 = vmul.f32 0.7978846, %v3768_v19  ;;  %v3679_v37 = vmul.f32 %v7432_v62, %v7432_v62  ;;  %v3737_v17 = vmul.f32 0.044715, %v3705_v4 }
 0xfae   : > { %v3771_v49 = vadd.f32 %v3739_v35, %v7416_v27  ;;  %v7444_v9 = vadd.f32 %v3646_v3, %v7218_v52  ;;  %v7447_v13 = vadd.f32 %v3642_v45, %v7218_v52  ;;  %v3708_v60 = vmul.f32 %v3676_v39, %v7426_v55 }
 0xfaf   : > { %5756 = vtanh.f32 %v3800_v32  ;;  %v3711_v57 = vmul.f32 %v3679_v37, %v7432_v62  ;;  %v7452_v36 = vadd.f32 %v3575_v8, %v7220_v22  ;;  %v3798_v63 = vmul.f32 0.7978846, %v3766_v43 }
 0xfb0   : > { %v3802_v12 = vmul.f32 0.7978846, %v3770_v56  ;;  %v3710_v28 = vmul.f32 %v3678_v58, %v7429_v15  ;;  %v7456_v59 = vadd.f32 %v3648_v41, %v7222_v54  ;;  %v3740_v2 = vmul.f32 0.044715, %v3708_v60 }
 0xfb1   : > { %v3743_v29 = vmul.f32 0.044715, %v3711_v57  ;;  %v3681_v52 = vmul.f32 %v7444_v9, %v7444_v9  ;;  %v3680_v45 = vmul.f32 %v7452_v36, %v7452_v36  ;;  %v3803_v48 = vmul.f32 0.7978846, %v3771_v49 }
 0xfb2   : > { %v3682_v22 = vmul.f32 %v7456_v59, %v7456_v59  ;;  %v3677_v6 = vmul.f32 %v7447_v13, %v7447_v13  ;;  %v3772_v31 = vadd.f32 %v3740_v2, %v7426_v55  ;;  %v3765_v38 = vadd.f32 %v3733_v46, %v7396_v51 }
 0xfb3   : > { %v3775_v54 = vadd.f32 %v3743_v29, %v7432_v62  ;;  %v3712_v1 = vmul.f32 %v3680_v45, %v7452_v36  ;;  %5758 = vtanh.f32 %v3798_v63  ;;  %v3742_v5 = vmul.f32 0.044715, %v3710_v28 }
 0xfb4   : > { %v3714_v25 = vmul.f32 %v3682_v22, %v7456_v59  ;;  %v3769_v61 = vadd.f32 %v3737_v17, %v7399_v0  ;;  %5760 = vtanh.f32 %v3802_v12  ;;  %v3804_v21 = vmul.f32 0.7978846, %v3772_v31 }
 0xfb5   : > { %v3713_v20 = vmul.f32 %v3681_v52, %v7444_v9  ;;  %5762 = vtanh.f32 %v3803_v48  ;;  %v3807_v33 = vmul.f32 0.7978846, %v3775_v54  ;;  %v3744_v26 = vmul.f32 0.044715, %v3712_v1 }
 0xfb6   : > { %v5751_v50 = vpop.eup %5750  ;;  %v3746_v53 = vmul.f32 0.044715, %v3714_v25  ;;  %v3709_v14 = vmul.f32 %v3677_v6, %v7447_v13  ;;  %5764 = vtanh.f32 %v3804_v21  ;;  %v3774_v3 = vadd.f32 %v3742_v5, %v7429_v15 }
 0xfb7   : > { %v3776_v23 = vadd.f32 %v3744_v26, %v7452_v36  ;;  %v3859_v24 = vadd.f32 1.0, %v5751_v50  ;;  %v3801_v32 = vmul.f32 0.7978846, %v3769_v61  ;;  %5766 = vtanh.f32 %v3807_v33 }
 0xfb8   : > { %v5753_v7 = vpop.eup %5752  ;;  %v3778_v4 = vadd.f32 %v3746_v53, %v7456_v59  ;;  %v3745_v43 = vmul.f32 0.044715, %v3713_v20  ;;  %v3797_v8 = vmul.f32 0.7978846, %v3765_v38  ;;  %v3741_v37 = vmul.f32 0.044715, %v3709_v14 }
 0xfb9   : > { %v3860_v10 = vadd.f32 1.0, %v5753_v7  ;;  %v3808_v39 = vmul.f32 0.7978846, %v3776_v23  ;;  %v3806_v49 = vmul.f32 0.7978846, %v3774_v3  ;;  %v3891_v60 = vmul.f32 0.5, %v3859_v24 }
 0xfba   : > { %v5755_v19 = vpop.eup %5754  ;;  %v3810_v58 = vmul.f32 0.7978846, %v3778_v4  ;;  %v3777_v57 = vadd.f32 %v3745_v43, %v7444_v9  ;;  %v3773_v28 = vadd.f32 %v3741_v37, %v7447_v13 }
 0xfbb   : > { %v3863_v56 = vadd.f32 1.0, %v5755_v19  ;;  %v3892_v46 = vmul.f32 0.5, %v3860_v10  ;;  %5768 = vtanh.f32 %v3808_v39  ;;  %v3923_v52 = vmul.f32 %v3891_v60, %v7363_v44 }
 0xfbc   : > { %v5757_v35 = vpop.eup %5756  ;;  %5770 = vtanh.f32 %v3801_v32  ;;  %v3809_v48 = vmul.f32 0.7978846, %v3777_v57  ;;  %v3805_v1 = vmul.f32 0.7978846, %v3773_v28 }
 0xfbd   : > { %v3864_v41 = vadd.f32 1.0, %v5757_v35  ;;  %v3895_v17 = vmul.f32 0.5, %v3863_v56  ;;  %5772 = vtanh.f32 %v3810_v58  ;;  %v3924_v2 = vmul.f32 %v3892_v46, %v7368_v34 }
 0xfbe   : > { %5774 = vtanh.f32 %v3797_v8 }
 0xfbf   : > { %v3896_v63 = vmul.f32 0.5, %v3864_v41  ;;  %v3927_v12 = vmul.f32 %v3895_v17, %v7379_v18  ;;  %5776 = vtanh.f32 %v3806_v49 }
 0xfc0   : > { %v5759_v45 = vpop.eup %5758  ;;  %5778 = vtanh.f32 %v3809_v48 }
 0xfc1   : > { %v3928_v29 = vmul.f32 %v3896_v63, %v7388_v40  ;;  %v5761_v6 = vpop.eup %5760  ;;  %v3947_v31 = vpack.c.bf16 %v3927_v12, %v3923_v52  ;;  %5780 = vtanh.f32 %v3805_v1  ;;  %v3862_v25 = vadd.f32 1.0, %v5759_v45 }
 0xfc2   : > { %v5763_v54 = vpop.eup %5762  ;;  %v3866_v5 = vadd.f32 1.0, %v5761_v6  ;;  %v7496_v6 = vld [vmem:[%s6340_s6 + $0x5] ss:$0 sm:$0xff] }
 0xfc3   : > { %v3948_v22 = vpack.c.bf16 %v3928_v29, %v3924_v2  ;;  %v5765_v50 = vpop.eup %5764  ;;  %v3867_v34 = vadd.f32 1.0, %v5763_v54  ;;  %v3894_v19 = vmul.f32 0.5, %v3862_v25 }
 0xfc4   : > { %v5767_v18 = vpop.eup %5766  ;;  %v3868_v38 = vadd.f32 1.0, %v5765_v50  ;;  %v3898_v33 = vmul.f32 0.5, %v3866_v5 }
 0xfc5   : > { %4259 = vmatprep.mubr.bf16.mxu1 %v3948_v22  ;;  %v3871_v40 = vadd.f32 1.0, %v5767_v18  ;;  %v3899_v53 = vmul.f32 0.5, %v3867_v34  ;;  %v3926_v58 = vmul.f32 %v3894_v19, %v7371_v11 }
 0xfc6   : > { %4260 = vmatmul.mubr.bf16.gmra.mxu1 %v3947_v31  ;;  %v3900_v20 = vmul.f32 0.5, %v3868_v38  ;;  %v3930_v43 = vmul.f32 %v3898_v33, %v7391_v16 }
 0xfc7   : > { %v3903_v44 = vmul.f32 0.5, %v3871_v40  ;;  %v3931_v8 = vmul.f32 %v3899_v53, %v7416_v27 }
 0xfc8   : > { %v5769_v7 = vpop.eup %5768  ;;  %v3932_v24 = vmul.f32 %v3900_v20, %v7426_v55  ;;  %v3950_v49 = vpack.c.bf16 %v3930_v43, %v3926_v58 }
 0xfc9   : > { %v5771_v61 = vpop.eup %5770  ;;  %v3872_v21 = vadd.f32 1.0, %v5769_v7  ;;  %v3935_v4 = vmul.f32 %v3903_v44, %v7432_v62 }
 0xfca   : > { %v5773_v26 = vpop.eup %5772  ;;  %v3865_v23 = vadd.f32 1.0, %v5771_v61 }
 0xfcb   : > { %v5775_v14 = vpop.eup %5774  ;;  %v3904_v10 = vmul.f32 0.5, %v3872_v21  ;;  %v3874_v56 = vadd.f32 1.0, %v5773_v26  ;;  %v3951_v46 = vpack.c.bf16 %v3935_v4, %v3931_v8 }
 0xfcc   : > { %v5777_v3 = vpop.eup %5776  ;;  %v3861_v35 = vadd.f32 1.0, %v5775_v14  ;;  %v3897_v41 = vmul.f32 0.5, %v3865_v23 }
 0xfcd   : > { %v3936_v32 = vmul.f32 %v3904_v10, %v7452_v36  ;;  %v3870_v37 = vadd.f32 1.0, %v5777_v3  ;;  %v5779_v17 = vpop.eup %5778  ;;  %v3906_v62 = vmul.f32 0.5, %v3874_v56  ;;  %v7662_v56 = vld [vmem:[#allocation26_spill] sm:$0xff] }
 0xfce   : > { %v3893_v60 = vmul.f32 0.5, %v3861_v35  ;;  %v5781_v55 = vpop.eup %5780  ;;  %v3929_v16 = vmul.f32 %v3897_v41, %v7399_v0  ;;  %v3873_v57 = vadd.f32 1.0, %v5779_v17 }
 0xfcf   : > { %v3952_v39 = vpack.c.bf16 %v3936_v32, %v3932_v24  ;;  %v3902_v36 = vmul.f32 0.5, %v3870_v37  ;;  %v3938_v27 = vmul.f32 %v3906_v62, %v7456_v59  ;;  %v3869_v63 = vadd.f32 1.0, %v5781_v55 }
 0xfd0   : > { %v3925_v11 = vmul.f32 %v3893_v60, %v7396_v51  ;;  %v3905_v2 = vmul.f32 0.5, %v3873_v57 }
 0xfd1   : > { %4267 = vmatprep.mubr.bf16.mxu1 %v3952_v39  ;;  %v3934_v12 = vmul.f32 %v3902_v36, %v7429_v15  ;;  %v3901_v52 = vmul.f32 0.5, %v3869_v63 }
 0xfd2   : > { %4268 = vmatmul.mubr.bf16.gmra.mxu1 %v3951_v46  ;;  %v3949_v28 = vpack.c.bf16 %v3929_v16, %v3925_v11  ;;  %v3937_v45 = vmul.f32 %v3905_v2, %v7444_v9 }
 0xfd3   : > { %4324 = vmatprep.mubr.bf16.mxu1 %v3950_v49  ;;  %v3954_v29 = vpack.c.bf16 %v3938_v27, %v3934_v12  ;;  %v3933_v48 = vmul.f32 %v3901_v52, %v7447_v13 }
 0xfd5   : > { %v3953_v0 = vpack.c.bf16 %v3937_v45, %v3933_v48 }
 0xfda   : > { %4325 = vmatmul.mubr.bf16.vlgmr.msra.gmra.mxu1 %v3949_v28  ;;  %v7663_v28 = vld [vmem:[#allocation27_spill] sm:$0xff] }
 0xfdb   : > { %4332 = vmatprep.mubr.bf16.mxu1 %v3954_v29 }
 0xfe2   : > { %4333 = vmatmul.mubr.bf16.gmra.mxu1 %v3953_v0 }
0x104a   : > { %v4936_v22 = vpop.f32.mrf.mxu1 }
0x104b   : > { %v4976_v59 = vpop.f32.mrf.mxu0 }
0x104c   : > { %v4937_v51 = vpop.f32.mrf.mxu1 }
0x104d   : > { %v4938_v31 = vadd.f32 %v4937_v51, %v4936_v22  ;;  %v4977_v54 = vpop.f32.mrf.mxu0 }
0x104e   : > { %v4939_v15 = vpop.f32.mrf.mxu1  ;;  %v4978_v50 = vadd.f32 %v4977_v54, %v4976_v59  ;;  %v7664_v59 = vld [vmem:[#allocation29_spill] sm:$0xff] }
0x104f   : > { %v4246_v1 = vadd.f32 %v4938_v31, %v7496_v6  ;;  %v4979_v18 = vpop.f32.mrf.mxu0 }
0x1050   : > { %v4940_v38 = vpop.f32.mrf.mxu1 }
0x1051   : > { %v4311_v5 = vadd.f32 %v4978_v50, %v4246_v1  ;;  %v4941_v34 = vadd.f32 %v4940_v38, %v4939_v15  ;;  %v4980_v9 = vpop.f32.mrf.mxu0 }
0x1052   : > { %v4981_v25 = vadd.f32 %v4980_v9, %v4979_v18  ;;  %v7665_v18 = vld [vmem:[#allocation28_spill] sm:$0xff]  ;;  %v7666_v9 = vld [vmem:[#allocation30_spill] sm:$0xff] }
0x1053   : > { %v7500_v13 = vadd.f32 %v4311_v5, %v7022_v42  ;;  %v4249_v40 = vadd.f32 %v4941_v34, %v7496_v6 }
0x1055   : > { %4349 = vst [vmem:[#allocation2 + $0x30] sm:$0xff] %v7500_v13  ;;  %v4314_v7 = vadd.f32 %v4981_v25, %v4249_v40 }
0x1057   : > { %v7505_v44 = vadd.f32 %v4314_v7, %v7027_v47 }
0x1059   : > { %4350 = vst [vmem:[#allocation2] sm:$0xff] %v7505_v44  ;;  %v4942_v61 = vpop.f32.mrf.mxu1 }
0x105a   : > { %v4982_v21 = vpop.f32.mrf.mxu0 }
0x105b   : > { %v4943_v20 = vpop.f32.mrf.mxu1 }
0x105c   : > { %v4944_v33 = vadd.f32 %v4943_v20, %v4942_v61  ;;  %v4983_v26 = vpop.f32.mrf.mxu0 }
0x105d   : > { %v4945_v53 = vpop.f32.mrf.mxu1  ;;  %v4984_v14 = vadd.f32 %v4983_v26, %v4982_v21 }
0x105e   : > { %v4254_v42 = vadd.f32 %v4944_v33, %v7496_v6  ;;  %v4985_v10 = vpop.f32.mrf.mxu0 }
0x105f   : > { %v4946_v19 = vpop.f32.mrf.mxu1 }
0x1060   : > { %v4319_v3 = vadd.f32 %v4984_v14, %v4254_v42  ;;  %v4947_v23 = vadd.f32 %v4946_v19, %v4945_v53  ;;  %v4986_v4 = vpop.f32.mrf.mxu0 }
0x1061   : > { %v4987_v32 = vadd.f32 %v4986_v4, %v4985_v10 }
0x1062   : > { %v4343_v24 = vadd.f32 %v4319_v3, %v7025_v30  ;;  %v4257_v47 = vadd.f32 %v4947_v23, %v7496_v6 }
0x1064   : > { %4351 = vst [vmem:[#allocation2 + $0x18] sm:$0xff] %v4343_v24  ;;  %v4322_v43 = vadd.f32 %v4987_v32, %v4257_v47 }
0x1066   : > { %v7512_v35 = vadd.f32 %v4322_v43, %v7662_v56 }
0x1068   : > { %4352 = vst [vmem:[#allocation2 + $0x10] sm:$0xff] %v7512_v35 }
0x1086   : > { %v4948_v8 = vpop.f32.mrf.mxu1 }
0x1088   : > { %v4949_v39 = vpop.f32.mrf.mxu1 }
0x1089   : > { %v4950_v62 = vadd.f32 %v4949_v39, %v4948_v8 }
0x108a   : > { %v4951_v58 = vpop.f32.mrf.mxu1 }
0x108b   : > { %v4262_v55 = vadd.f32 %v4950_v62, %v7496_v6 }
0x108c   : > { %v4952_v37 = vpop.f32.mrf.mxu1 }
0x108d   : > { %v4953_v36 = vadd.f32 %v4952_v37, %v4951_v58 }
0x108f   : > { %v4265_v63 = vadd.f32 %v4953_v36, %v7496_v6 }
0x1092   : > { %v4954_v41 = vpop.f32.mrf.mxu1 }
0x1094   : > { %v4955_v46 = vpop.f32.mrf.mxu1 }
0x1095   : > { %v4956_v12 = vadd.f32 %v4955_v46, %v4954_v41 }
0x1096   : > { %v4957_v17 = vpop.f32.mrf.mxu1 }
0x1097   : > { %v4270_v0 = vadd.f32 %v4956_v12, %v7496_v6 }
0x1098   : > { %v4958_v49 = vpop.f32.mrf.mxu1 }
0x1099   : > { %v4959_v22 = vadd.f32 %v4958_v49, %v4957_v17 }
0x109a   : > { %v4988_v30 = vpop.f32.mrf.mxu1 }
0x109b   : > { %v4273_v50 = vadd.f32 %v4959_v22, %v7496_v6 }
0x109c   : > { %v4989_v60 = vpop.f32.mrf.mxu1 }
0x109d   : > { %v4990_v16 = vadd.f32 %v4989_v60, %v4988_v30 }
0x109e   : > { %v4991_v57 = vpop.f32.mrf.mxu1 }
0x109f   : > { %v4327_v27 = vadd.f32 %v4990_v16, %v4262_v55 }
0x10a0   : > { %v4992_v11 = vpop.f32.mrf.mxu1 }
0x10a1   : > { %v4345_v2 = vadd.f32 %v4327_v27, %v7663_v28  ;;  %v4993_v29 = vadd.f32 %v4992_v11, %v4991_v57 }
0x10a2   : > { %v4994_v52 = vpop.f32.mrf.mxu1 }
0x10a3   : > { %4353 = vst [vmem:[#allocation2 + $0x8] sm:$0xff] %v4345_v2  ;;  %v4330_v45 = vadd.f32 %v4993_v29, %v4265_v63 }
0x10a4   : > { %v4995_v48 = vpop.f32.mrf.mxu1 }
0x10a5   : > { %v4346_v51 = vadd.f32 %v4330_v45, %v7664_v59  ;;  %v4996_v31 = vadd.f32 %v4995_v48, %v4994_v52 }
0x10a6   : > { %v4997_v54 = vpop.f32.mrf.mxu1 }
0x10a7   : > { %4354 = vst [vmem:[#allocation2 + $0x20] sm:$0xff] %v4346_v51  ;;  %v4335_v15 = vadd.f32 %v4996_v31, %v4270_v0 }
0x10a8   : > { %v4998_v1 = vpop.f32.mrf.mxu1 }
0x10a9   : > { %v4347_v38 = vadd.f32 %v4335_v15, %v7665_v18  ;;  %v4999_v5 = vadd.f32 %v4998_v1, %v4997_v54 }
0x10ab   : > { %4355 = vst [vmem:[#allocation2 + $0x28] sm:$0xff] %v4347_v38  ;;  %v4338_v34 = vadd.f32 %v4999_v5, %v4273_v50  ;;  %4360 = sbr.rel (%p4821_p6) target bundleno = 4595 (0x11f3), region = 84 }
0x10ad   : > { %v4348_v40 = vadd.f32 %v4338_v34, %v7666_v9 }
0x10af   : > { %4356 = vst [vmem:[#allocation2 + $0x38] sm:$0xff] %v4348_v40 }
0x10b0   : > { %4363 = vadd.xlane.f32.xlu0 %v7500_v13  ;;  %4367 = vadd.xlane.f32.xlu1 %v4343_v24  ;;  %v4822_v1 = vld [vmem:[#allocation14] ss:$0 sm:$0xff] }
0x10b4   : > { %4365 = vadd.xlane.f32.xlu0 %v7505_v44  ;;  %4369 = vadd.xlane.f32.xlu1 %v7512_v35 }
0x10b8   : > { %4371 = vadd.xlane.f32.xlu0 %v4345_v2  ;;  %4373 = vadd.xlane.f32.xlu1 %v4346_v51 }
0x10bc   : > { %4375 = vadd.xlane.f32.xlu0 %v4347_v38  ;;  %4377 = vadd.xlane.f32.xlu1 %v4348_v40 }
0x1139   : > { %v4364_v6 = vpop.xlane.xlu0 %4363  ;;  %v4368_v25 = vpop.xlane.xlu1 %4367 }
0x113a   : > { %v4379_v7 = vmul.f32 0.0078125, %v4364_v6  ;;  %v4381_v61 = vmul.f32 0.0078125, %v4368_v25 }
0x113c   : > { %v7528_v21 = vsub.f32 %v7500_v13, %v4379_v7  ;;  %v7530_v20 = vsub.f32 %v4343_v24, %v4381_v61 }
0x113d   : > { %v4366_v33 = vpop.xlane.xlu0 %4365  ;;  %v4370_v26 = vpop.xlane.xlu1 %4369 }
0x113e   : > { %v4380_v53 = vmul.f32 0.0078125, %v4366_v33  ;;  %v4395_v42 = vmul.f32 %v7528_v21, %v7528_v21  ;;  %v4382_v14 = vmul.f32 0.0078125, %v4370_v26  ;;  %v4397_v13 = vmul.f32 %v7530_v20, %v7530_v20 }
0x1140   : > { %v7535_v10 = vsub.f32 %v7505_v44, %v4380_v53  ;;  %4403 = vadd.xlane.f32.xlu0 %v4395_v42  ;;  %v7538_v19 = vsub.f32 %v7512_v35, %v4382_v14 }
0x1141   : > { %v4372_v3 = vpop.xlane.xlu0 %4371  ;;  %v4374_v23 = vpop.xlane.xlu1 %4373 }
0x1142   : > { %v4383_v4 = vmul.f32 0.0078125, %v4372_v3  ;;  %v4396_v24 = vmul.f32 %v7535_v10, %v7535_v10  ;;  %v4384_v47 = vmul.f32 0.0078125, %v4374_v23  ;;  %v4398_v43 = vmul.f32 %v7538_v19, %v7538_v19 }
0x1144   : > { %v7544_v32 = vsub.f32 %v4345_v2, %v4383_v4  ;;  %4407 = vadd.xlane.f32.xlu0 %v4397_v13  ;;  %4405 = vadd.xlane.f32.xlu1 %v4396_v24  ;;  %v7546_v44 = vsub.f32 %v4346_v51, %v4384_v47 }
0x1145   : > { %v4376_v56 = vpop.xlane.xlu0 %4375  ;;  %v4378_v35 = vpop.xlane.xlu1 %4377 }
0x1146   : > { %v4385_v8 = vmul.f32 0.0078125, %v4376_v56  ;;  %v4399_v39 = vmul.f32 %v7544_v32, %v7544_v32  ;;  %v4386_v58 = vmul.f32 0.0078125, %v4378_v35  ;;  %v4400_v46 = vmul.f32 %v7546_v44, %v7546_v44 }
0x1148   : > { %v7552_v37 = vsub.f32 %v4347_v38, %v4385_v8  ;;  %4409 = vadd.xlane.f32.xlu1 %v4398_v43  ;;  %4411 = vadd.xlane.f32.xlu0 %v4399_v39  ;;  %v7554_v41 = vsub.f32 %v4348_v40, %v4386_v58  ;;  %v4823_v38 = vld [vmem:[#allocation14 + $0x1] ss:$0 sm:$0xff] }
0x114a   : > { %v4401_v17 = vmul.f32 %v7552_v37, %v7552_v37  ;;  %v4402_v49 = vmul.f32 %v7554_v41, %v7554_v41 }
0x114c   : > { %4413 = vadd.xlane.f32.xlu1 %v4400_v46  ;;  %4415 = vadd.xlane.f32.xlu0 %v4401_v17 }
0x1150   : > { %4417 = vadd.xlane.f32.xlu1 %v4402_v49 }
0x11c9   : > { %v4404_v62 = vpop.xlane.xlu0 %4403 }
0x11ca   : > { %v4419_v30 = vmul.f32 0.0078125, %v4404_v62 }
0x11cc   : > { %v4427_v60 = vadd.f32 1e-05, %v4419_v30 }
0x11cd   : > { %v4406_v55 = vpop.xlane.xlu1 %4405  ;;  %v4408_v36 = vpop.xlane.xlu0 %4407 }
0x11ce   : > { %5790 = vrsqrt.f32 %v4427_v60  ;;  %v4420_v16 = vmul.f32 0.0078125, %v4406_v55  ;;  %v4421_v57 = vmul.f32 0.0078125, %v4408_v36 }
0x11d0   : > { %v4428_v27 = vadd.f32 1e-05, %v4420_v16  ;;  %v4429_v11 = vadd.f32 1e-05, %v4421_v57 }
0x11d1   : > { %v4410_v63 = vpop.xlane.xlu1 %4409  ;;  %v4412_v12 = vpop.xlane.xlu0 %4411 }
0x11d2   : > { %5792 = vrsqrt.f32 %v4428_v27  ;;  %v4422_v28 = vmul.f32 0.0078125, %v4410_v63  ;;  %v4423_v2 = vmul.f32 0.0078125, %v4412_v12 }
0x11d3   : > { %5794 = vrsqrt.f32 %v4429_v11 }
0x11d4   : > { %v4430_v29 = vadd.f32 1e-05, %v4422_v28  ;;  %v4431_v52 = vadd.f32 1e-05, %v4423_v2 }
0x11d5   : > { %v4414_v45 = vpop.xlane.xlu1 %4413  ;;  %v4416_v48 = vpop.xlane.xlu0 %4415 }
0x11d6   : > { %5796 = vrsqrt.f32 %v4430_v29  ;;  %v4424_v0 = vmul.f32 0.0078125, %v4414_v45  ;;  %v4425_v22 = vmul.f32 0.0078125, %v4416_v48 }
0x11d7   : > { %5798 = vrsqrt.f32 %v4431_v52 }
0x11d8   : > { %v4432_v59 = vadd.f32 1e-05, %v4424_v0  ;;  %v4433_v51 = vadd.f32 1e-05, %v4425_v22 }
0x11d9   : > { %v4418_v31 = vpop.xlane.xlu1 %4417 }
0x11da   : > { %5800 = vrsqrt.f32 %v4432_v59  ;;  %v4426_v54 = vmul.f32 0.0078125, %v4418_v31 }
0x11db   : > { %v5791_v15 = vpop.eup %5790  ;;  %5802 = vrsqrt.f32 %v4433_v51 }
0x11dc   : > { %v4443_v50 = vmul.f32 %v5791_v15, %v7528_v21  ;;  %v4434_v18 = vadd.f32 1e-05, %v4426_v54 }
0x11de   : > { %v4455_v5 = vmul.f32 %v4822_v1, %v4443_v50  ;;  %5804 = vrsqrt.f32 %v4434_v18 }
0x11df   : > { %v5793_v34 = vpop.eup %5792 }
0x11e0   : > { %v5795_v9 = vpop.eup %5794  ;;  %v4467_v40 = vadd.f32 %v4823_v38, %v4455_v5  ;;  %v4444_v6 = vmul.f32 %v5793_v34, %v7535_v10 }
0x11e1   : > { %v4445_v25 = vmul.f32 %v5795_v9, %v7530_v20 }
0x11e2   : > { %4475 = vst [vmem:[#allocation15] sm:$0xff] %v4467_v40  ;;  %v4456_v7 = vmul.f32 %v4822_v1, %v4444_v6 }
0x11e3   : > { %v5797_v61 = vpop.eup %5796  ;;  %v4457_v33 = vmul.f32 %v4822_v1, %v4445_v25 }
0x11e4   : > { %v5799_v26 = vpop.eup %5798  ;;  %v4468_v53 = vadd.f32 %v4823_v38, %v4456_v7  ;;  %v4446_v42 = vmul.f32 %v5797_v61, %v7538_v19 }
0x11e5   : > { %v4469_v21 = vadd.f32 %v4823_v38, %v4457_v33  ;;  %v4447_v14 = vmul.f32 %v5799_v26, %v7544_v32 }
0x11e6   : > { %4476 = vst [vmem:[#allocation15 + $0x8] sm:$0xff] %v4468_v53  ;;  %v4458_v13 = vmul.f32 %v4822_v1, %v4446_v42 }
0x11e7   : > { %v5801_v3 = vpop.eup %5800  ;;  %4477 = vst [vmem:[#allocation15 + $0x10] sm:$0xff] %v4469_v21  ;;  %v4459_v23 = vmul.f32 %v4822_v1, %v4447_v14 }
0x11e8   : > { %v5803_v4 = vpop.eup %5802  ;;  %v4470_v10 = vadd.f32 %v4823_v38, %v4458_v13  ;;  %v4448_v20 = vmul.f32 %v5801_v3, %v7546_v44 }
0x11e9   : > { %v4471_v24 = vadd.f32 %v4823_v38, %v4459_v23  ;;  %v4449_v47 = vmul.f32 %v5803_v4, %v7552_v37 }
0x11ea   : > { %4478 = vst [vmem:[#allocation15 + $0x18] sm:$0xff] %v4470_v10  ;;  %v4460_v43 = vmul.f32 %v4822_v1, %v4448_v20 }
0x11eb   : > { %v5805_v56 = vpop.eup %5804  ;;  %4479 = vst [vmem:[#allocation15 + $0x20] sm:$0xff] %v4471_v24  ;;  %v4461_v19 = vmul.f32 %v4822_v1, %v4449_v47 }
0x11ec   : > { %v4472_v35 = vadd.f32 %v4823_v38, %v4460_v43  ;;  %v4450_v32 = vmul.f32 %v5805_v56, %v7554_v41 }
0x11ed   : > { %v4473_v8 = vadd.f32 %v4823_v38, %v4461_v19 }
0x11ee   : > { %4480 = vst [vmem:[#allocation15 + $0x28] sm:$0xff] %v4472_v35  ;;  %v4462_v39 = vmul.f32 %v4822_v1, %v4450_v32 }
0x11ef   : > { %4481 = vst [vmem:[#allocation15 + $0x30] sm:$0xff] %v4473_v8 }
0x11f0   : > { %v4474_v58 = vadd.f32 %v4823_v38, %v4462_v39 }
0x11f2   : > { %4482 = vst [vmem:[#allocation15 + $0x38] sm:$0xff] %v4474_v58 }
0x11f3 PF: > { %p5309_p0 = scmp.eq.s32.totalorder %s6187_s30, 1  ;;  %s6115_s20 = smov [#allocation15]  }
0x11f4   : > { %s4493_s8 = sshll.u32 %s6115_s20, 4  ;;  %s4494_s8 = int_to_ptr.vmem [resolvable:$true] %s4493_s8 }
0x11f5   : > { %s5998_s0 = scalar_lea.vmem %s4494_s8, 1024  ;;  %p6005_p3 = scmp.lt.s32.totalorder %s4494_s8, %s4494_s8 }
0x11f6   : > { %p5999_p11 = scmp.ne.s32.totalorder %s4494_s8, %s5998_s0  ;;  %p6006_p5 = scmp.lt.s32.totalorder %s5998_s0, %s5998_s0 }
0x11f8   : > { %p6000_p1 = pnand %p5999_p11, %p5309_p0  ;;  %p6007_p7 = por %p6006_p5, %p6005_p3 }
0x11fa   : > { %p6001_p2 = pneg %p6000_p1 }
0x11fc   : > { %p6008_p13 = pnand %p6007_p7, %p6001_p2 }
0x11fe   : > { %6011 = shalt.err (!%p6008_p13)
}
0x11ff   : > { %s6116_s29 = smov 128   ;;  %s6117_s13 = smov 8  }
0x1200   : > { %s7668_s6 = sld [smem:[#allocation34_spill]] }
0x1206   : > { %5278 = dma.vmem_to_hbm [thread:$0]  (%p5309_p0), %s4494_s8, 1024, %s7668_s6, [#allocation5], %s6116_s29, %s6116_s29, %s6117_s13  }
0x1207   : > { %6067 = dma.done.wait (%p5309_p0), [#allocation5], 1024  }
0x1208   : > { %6069 = vsyncadd (%p5309_p0), [#allocation5], 4294966272 }
0x1209 PF: > { %s7669_s10 = sld [smem:[#allocation23_spill]]  ;;  %s7671_s24 = smov %s6076_s25 }
0x120a   : > { %s7670_s1 = sld [smem:[#allocation25_spill]]  ;;  %s7672_s25 = smov %s6080_s26 }
0x120b   : > { %s7673_s26 = smov %s6269_s16  ;;  %s7674_s27 = smov %s6088_s28 }
0x120f   : > { %s28_s29 = sadd.s32 1, %s7669_s10  }
0x1210   : > { %p25_p10 = scmp.ge.s32.totalorder %s28_s29, 4   ;;  %s7675_s28 = smov %s7670_s1 }
0x1212   :  { %27 = sbr.rel (!%p25_p10) target bundleno = 15 (0xf), region = 153 }
0x1217   :  { %4509 = vsyncpa [#allocation4], 1 }
0x1218   :  { %4511 = vsyncpa [#allocation4 + $0x1], 1 }
0x1219   :  { %4512 = vsyncpa [#allocation7], 1 }
0x121a   :  { %4514 = vsyncpa [#allocation7 + $0x1], 1 }
0x121b   :  { %4515 = vsyncpa [#allocation10], 1 }
0x121c   :  { %4517 = vsyncpa [#allocation10 + $0x1], 1 }
0x121d   :  { %4518 = vsyncpa [#allocation13], 1 }
0x121e   :  { %4520 = vsyncpa [#allocation13 + $0x1], 1 }
0x121f   :  { %4521 = vsyncpa [#allocation5], 1 }
0x1220   :  { %4523 = vsyncpa [#allocation5 + $0x1], 1 }

</bundles_post_ra>
